<compile_context>
chip_gen: v7x
topology: tpu7x:2x2x1
jax: 0.10.0
libtpu: 0.0.40
codegen_flags: <defaults>
</compile_context>

<pallas_src>
import jax
import jax.numpy as jnp
from jax.experimental import pallas as pl
from jax.experimental.pallas import tpu as pltpu

EPS = 1e-5  # PyTorch BatchNorm1d default eps


def tucker_kernel(ere_ref, w3_ref, t1_ref, out_ref):
    """One batch tile; batch lives on the 128-lane axis throughout.

    ere_ref : [3, R, Bt]    stacked (e1^T, r^T, e2^T)
    w3_ref  : [R*R + R, R]  rows j*R+s hold s1[s]*s0[j]*W[k,j,s]
                            rows R*R+s hold s1[s]*sum_j t0[j]*W[k,j,s]
                            (bn0/bn1 scales + bn0 shift pre-folded; resident)
    t1_ref  : [R, 1]        bn1 eval-mode shift (resident)
    out_ref : [1, Bt]       sigmoid(score), lane-dense
    """
    R = ere_ref.shape[1]

    e1T = ere_ref[0]                                   # [R, Bt]
    rT = ere_ref[1]                                    # [R, Bt]
    e2T = ere_ref[2]                                   # [R, Bt]

    # One MXU matmul per tile (default precision: bf16 pass, f32 accumulate).
    #   vT[j*R + s, b] = sum_k s1[s]*s0[j]*W[k,j,s] * r[b,k]
    #   vT[R*R + s, b] = sum_k s1[s]*(sum_j t0[j]*W[k,j,s]) * r[b,k]
    # i.e. the per-example W_mat of the PyTorch path (transposed layout) with
    # both BatchNorm scales and the bn0 shift contribution already applied.
    vT = jnp.dot(w3_ref[...], rT, preferred_element_type=jnp.float32)   # [R*R+R, Bt]

    # z[s, b] = bn0_shift_term[s, b] + sum_j e1[b, j] * W_mat'[b, j, s]:
    # unrolled VPU fold over j — each step is a vreg-aligned static sublane
    # slice of vT and a single-row broadcast of e1T.
    zT = vT[R * R:R * R + R, :]                        # [R, Bt]
    for j in range(R):
        zT = zT + e1T[j:j + 1, :] * vT[j * R:(j + 1) * R, :]

    # bn1 shift, per-example dot with the tail embedding, sigmoid.  Batch stays
    # on lanes so the store is a single unmasked lane-dense [1, Bt] row.
    score = jnp.sum((zT + t1_ref[...]) * e2T, axis=0, keepdims=True)    # [1, Bt]
    out_ref[...] = jax.nn.sigmoid(score)


def tucker_forward(idxs, params, block_b=None):
    emb0, emb1, emb2, W, (g0, b0, m0, v0), (g1, b1, m1, v1) = params
    R = W.shape[0]
    B = idxs.shape[0]

    # --- glue (XLA): embedding row gathers ----------------------------------
    # TODO(synk): the per-row gathers stay in XLA; an arbitrary-index block
    # gather is not expressible as a rectangular BlockSpec without a per-row
    # DMA loop, which costs more than XLA's fused gather at these sizes.
    e1 = jnp.take(emb0, idxs[:, 0], axis=0)            # [B, R]
    r = jnp.take(emb1, idxs[:, 1], axis=0)             # [B, R]
    e2 = jnp.take(emb2, idxs[:, 2], axis=0)            # [B, R]

    # Single stacked, transposed per-example operand: [3, R, B] with batch on
    # the 128-lane axis -> one input DMA stream and a lane-dense [1, B] output
    # with no in-kernel transposes.
    ere = jnp.transpose(jnp.stack([e1, r, e2], axis=0), (0, 2, 1))      # [3, R, B]

    # Adaptive batch tile: big enough to amortize per-grid-step overhead, but
    # never wider than the lane-padded batch.
    if block_b is None:
        block_b = min(512, 128 * pl.cdiv(B, 128))
    b_pad = block_b * pl.cdiv(B, block_b)
    if b_pad != B:
        ere = jnp.pad(ere, ((0, 0), (0, 0), (0, b_pad - B)))

    # Constants prepared once in the wrapper (constant-folded by XLA):
    # eval-mode BatchNorm running stats folded to per-feature scale/shift, then
    # folded directly into the core-tensor operand of the MXU matmul.
    s0 = g0 / jnp.sqrt(v0 + EPS)
    t0 = b0 - m0 * s0
    s1 = g1 / jnp.sqrt(v1 + EPS)
    t1 = b1 - m1 * s1

    Wt = jnp.transpose(W, (1, 2, 0))                                    # [j, s, k]
    w3_main = (s0[:, None, None] * s1[None, :, None] * Wt).reshape(R * R, R)
    w3_shift = s1[:, None] * jnp.einsum('j,jsk->sk', t0, Wt)           # [R, R]
    w3aug = jnp.concatenate([w3_main, w3_shift], axis=0)               # [R*R+R, R]
    t1c = t1[:, None]                                                  # [R, 1]

    grid = (b_pad // block_b,)
    out = pl.pallas_call(
        tucker_kernel,
        out_shape=jax.ShapeDtypeStruct((1, b_pad), jnp.float32),
        grid=grid,
        in_specs=[
            pl.BlockSpec((3, R, block_b), lambda i: (0, 0, i)),
            pl.BlockSpec((R * R + R, R), lambda i: (0, 0)),   # constant -> resident
            pl.BlockSpec((R, 1), lambda i: (0, 0)),           # constant -> resident
        ],
        out_specs=pl.BlockSpec((1, block_b), lambda i: (0, i)),
        compiler_params=pltpu.CompilerParams(
            dimension_semantics=("parallel",)),  # batch tiles split across v7x TCs
    )(ere, w3aug, t1c)
    return out[0, :B]


def tucker_reference(idxs, params):
    """Pure-JAX mirror of the PyTorch forward (eval mode), f32 ground truth."""
    emb0, emb1, emb2, W, (g0, b0, m0, v0), (g1, b1, m1, v1) = params
    R = W.shape[0]
    hi = jax.lax.Precision.HIGHEST

    e1 = emb0[idxs[:, 0]]
    x = (e1 - m0) / jnp.sqrt(v0 + EPS) * g0 + b0                   # bn0
    r = emb1[idxs[:, 1]]
    W_mat = jnp.dot(r, W.reshape(R, R * R), precision=hi).reshape(-1, R, R)
    x = jnp.einsum('bj,bjs->bs', x, W_mat, precision=hi)
    x = (x - m1) / jnp.sqrt(v1 + EPS) * g1 + b1                    # bn1
    e2 = emb2[idxs[:, 2]]
    return jax.nn.sigmoid(jnp.sum(x * e2, axis=-1))


if __name__ == "__main__":
    rank = 32
    sizes = (50, 20, 50)       # (head entities, relations, tail entities)
    batch = 200                # deliberately not a multiple of the 128-lane tile

    key = jax.random.PRNGKey(0)
    ks = jax.random.split(key, 12)

    def xavier_normal(rng, shape):
        std = (2.0 / (shape[0] + shape[1])) ** 0.5
        return std * jax.random.normal(rng, shape, dtype=jnp.float32)

    emb0 = xavier_normal(ks[0], (sizes[0], rank))
    emb1 = xavier_normal(ks[1], (sizes[1], rank))
    emb2 = xavier_normal(ks[2], (sizes[2], rank))
    # Module uses torch.randn for W; scaled down here only to keep the synthetic
    # scores out of the sigmoid's saturated region for a meaningful check.
    W = 0.1 * jax.random.normal(ks[3], (rank, rank, rank), dtype=jnp.float32)

    def bn_params(r1, r2, r3, r4):
        gamma = 1.0 + 0.1 * jax.random.normal(r1, (rank,), dtype=jnp.float32)
        beta = 0.1 * jax.random.normal(r2, (rank,), dtype=jnp.float32)
        mean = 0.1 * jax.random.normal(r3, (rank,), dtype=jnp.float32)
        var = jax.random.uniform(r4, (rank,), dtype=jnp.float32,
                                 minval=0.5, maxval=1.5)
        return gamma, beta, mean, var

    bn0 = bn_params(ks[4], ks[5], ks[6], ks[7])
    bn1 = bn_params(ks[8], ks[9], ks[10], ks[11])
    params = (emb0, emb1, emb2, W, bn0, bn1)

    ki = jax.random.split(jax.random.PRNGKey(1), 3)
    idxs = jnp.stack(
        [jax.random.randint(ki[0], (batch,), 0, sizes[0]),
         jax.random.randint(ki[1], (batch,), 0, sizes[1]),
         jax.random.randint(ki[2], (batch,), 0, sizes[2])],
        axis=1).astype(jnp.int32)                                  # [B, 3]

    pred = jax.block_until_ready(jax.jit(tucker_forward)(idxs, params))
    ref = jax.block_until_ready(tucker_reference(idxs, params))

    assert pred.shape == (batch,), pred.shape
    if not jnp.allclose(pred, ref, atol=2e-3, rtol=2e-3):
        err = float(jnp.max(jnp.abs(pred - ref)))
        raise AssertionError(
            f"mismatch: max abs err {err}\nkernel={pred[:8]}\nref   ={ref[:8]}")
    print("KERNEL_OK")
</pallas_src>

<mosaic_0001>
module attributes {stable_mosaic.version = 11 : i64} {
  func.func @tucker_kernel(%arg0: i32, %arg1: memref<3x32x256xf32, #tpu.memory_space<vmem>>, %arg2: memref<1056x32xf32, #tpu.memory_space<vmem>>, %arg3: memref<32x1xf32, #tpu.memory_space<vmem>>, %arg4: memref<1x256xf32, #tpu.memory_space<vmem>>) attributes {dimension_semantics = [#tpu.dimension_semantics<parallel>], iteration_bounds = array<i64: 1>, scalar_prefetch = 0 : i64, scratch_operands = 0 : i64, tpu.core_type = #tpu.core_type<tc>, window_params = [{transform_indices = @transform_0, window_bounds = array<i64: 3, 32, 256>}, {pipeline_mode = #tpu.pipeline_mode<synchronous>, transform_indices = @transform_1, window_bounds = array<i64: 1056, 32>}, {pipeline_mode = #tpu.pipeline_mode<synchronous>, transform_indices = @transform_2, window_bounds = array<i64: 32, 1>}, {transform_indices = @transform_3, window_bounds = array<i64: 1, 256>}]} {
    %c0 = arith.constant 0 : index
    %c0_0 = arith.constant 0 : index
    %c0_1 = arith.constant 0 : index
    %0 = vector.load %arg1[%c0, %c0_0, %c0_1] : memref<3x32x256xf32, #tpu.memory_space<vmem>>, vector<1x32x256xf32>
    %1 = vector.shape_cast %0 : vector<1x32x256xf32> to vector<32x256xf32>
    %c1 = arith.constant 1 : index
    %c0_2 = arith.constant 0 : index
    %c0_3 = arith.constant 0 : index
    %2 = vector.load %arg1[%c1, %c0_2, %c0_3] : memref<3x32x256xf32, #tpu.memory_space<vmem>>, vector<1x32x256xf32>
    %3 = vector.shape_cast %2 : vector<1x32x256xf32> to vector<32x256xf32>
    %c2 = arith.constant 2 : index
    %c0_4 = arith.constant 0 : index
    %c0_5 = arith.constant 0 : index
    %4 = vector.load %arg1[%c2, %c0_4, %c0_5] : memref<3x32x256xf32, #tpu.memory_space<vmem>>, vector<1x32x256xf32>
    %5 = vector.shape_cast %4 : vector<1x32x256xf32> to vector<32x256xf32>
    %c0_6 = arith.constant 0 : index
    %c0_7 = arith.constant 0 : index
    %6 = vector.load %arg2[%c0_6, %c0_7] : memref<1056x32xf32, #tpu.memory_space<vmem>>, vector<1056x32xf32>
    %cst = arith.constant dense<0.000000e+00> : vector<1056x256xf32>
    %7 = tpu.matmul %6, %3, %cst {dimension_numbers = #tpu.dot_dimension_numbers<[1], [0], [0], [1], [0, 0, 1, 1], [], []>} : vector<1056x32xf32>, vector<32x256xf32>, vector<1056x256xf32> -> vector<1056x256xf32>
    %8 = vector.extract_strided_slice %7 {offsets = [1024, 0], sizes = [32, 256], strides = [1, 1]} : vector<1056x256xf32> to vector<32x256xf32>
    %9 = vector.extract_strided_slice %1 {offsets = [0, 0], sizes = [1, 256], strides = [1, 1]} : vector<32x256xf32> to vector<1x256xf32>
    %10 = vector.extract_strided_slice %7 {offsets = [0, 0], sizes = [32, 256], strides = [1, 1]} : vector<1056x256xf32> to vector<32x256xf32>
    %11 = vector.broadcast %9 : vector<1x256xf32> to vector<32x256xf32>
    %12 = arith.mulf %11, %10 : vector<32x256xf32>
    %13 = arith.addf %8, %12 : vector<32x256xf32>
    %14 = vector.extract_strided_slice %1 {offsets = [1, 0], sizes = [1, 256], strides = [1, 1]} : vector<32x256xf32> to vector<1x256xf32>
    %15 = vector.extract_strided_slice %7 {offsets = [32, 0], sizes = [32, 256], strides = [1, 1]} : vector<1056x256xf32> to vector<32x256xf32>
    %16 = vector.broadcast %14 : vector<1x256xf32> to vector<32x256xf32>
    %17 = arith.mulf %16, %15 : vector<32x256xf32>
    %18 = arith.addf %13, %17 : vector<32x256xf32>
    %19 = vector.extract_strided_slice %1 {offsets = [2, 0], sizes = [1, 256], strides = [1, 1]} : vector<32x256xf32> to vector<1x256xf32>
    %20 = vector.extract_strided_slice %7 {offsets = [64, 0], sizes = [32, 256], strides = [1, 1]} : vector<1056x256xf32> to vector<32x256xf32>
    %21 = vector.broadcast %19 : vector<1x256xf32> to vector<32x256xf32>
    %22 = arith.mulf %21, %20 : vector<32x256xf32>
    %23 = arith.addf %18, %22 : vector<32x256xf32>
    %24 = vector.extract_strided_slice %1 {offsets = [3, 0], sizes = [1, 256], strides = [1, 1]} : vector<32x256xf32> to vector<1x256xf32>
    %25 = vector.extract_strided_slice %7 {offsets = [96, 0], sizes = [32, 256], strides = [1, 1]} : vector<1056x256xf32> to vector<32x256xf32>
    %26 = vector.broadcast %24 : vector<1x256xf32> to vector<32x256xf32>
    %27 = arith.mulf %26, %25 : vector<32x256xf32>
    %28 = arith.addf %23, %27 : vector<32x256xf32>
    %29 = vector.extract_strided_slice %1 {offsets = [4, 0], sizes = [1, 256], strides = [1, 1]} : vector<32x256xf32> to vector<1x256xf32>
    %30 = vector.extract_strided_slice %7 {offsets = [128, 0], sizes = [32, 256], strides = [1, 1]} : vector<1056x256xf32> to vector<32x256xf32>
    %31 = vector.broadcast %29 : vector<1x256xf32> to vector<32x256xf32>
    %32 = arith.mulf %31, %30 : vector<32x256xf32>
    %33 = arith.addf %28, %32 : vector<32x256xf32>
    %34 = vector.extract_strided_slice %1 {offsets = [5, 0], sizes = [1, 256], strides = [1, 1]} : vector<32x256xf32> to vector<1x256xf32>
    %35 = vector.extract_strided_slice %7 {offsets = [160, 0], sizes = [32, 256], strides = [1, 1]} : vector<1056x256xf32> to vector<32x256xf32>
    %36 = vector.broadcast %34 : vector<1x256xf32> to vector<32x256xf32>
    %37 = arith.mulf %36, %35 : vector<32x256xf32>
    %38 = arith.addf %33, %37 : vector<32x256xf32>
    %39 = vector.extract_strided_slice %1 {offsets = [6, 0], sizes = [1, 256], strides = [1, 1]} : vector<32x256xf32> to vector<1x256xf32>
    %40 = vector.extract_strided_slice %7 {offsets = [192, 0], sizes = [32, 256], strides = [1, 1]} : vector<1056x256xf32> to vector<32x256xf32>
    %41 = vector.broadcast %39 : vector<1x256xf32> to vector<32x256xf32>
    %42 = arith.mulf %41, %40 : vector<32x256xf32>
    %43 = arith.addf %38, %42 : vector<32x256xf32>
    %44 = vector.extract_strided_slice %1 {offsets = [7, 0], sizes = [1, 256], strides = [1, 1]} : vector<32x256xf32> to vector<1x256xf32>
    %45 = vector.extract_strided_slice %7 {offsets = [224, 0], sizes = [32, 256], strides = [1, 1]} : vector<1056x256xf32> to vector<32x256xf32>
    %46 = vector.broadcast %44 : vector<1x256xf32> to vector<32x256xf32>
    %47 = arith.mulf %46, %45 : vector<32x256xf32>
    %48 = arith.addf %43, %47 : vector<32x256xf32>
    %49 = vector.extract_strided_slice %1 {offsets = [8, 0], sizes = [1, 256], strides = [1, 1]} : vector<32x256xf32> to vector<1x256xf32>
    %50 = vector.extract_strided_slice %7 {offsets = [256, 0], sizes = [32, 256], strides = [1, 1]} : vector<1056x256xf32> to vector<32x256xf32>
    %51 = vector.broadcast %49 : vector<1x256xf32> to vector<32x256xf32>
    %52 = arith.mulf %51, %50 : vector<32x256xf32>
    %53 = arith.addf %48, %52 : vector<32x256xf32>
    %54 = vector.extract_strided_slice %1 {offsets = [9, 0], sizes = [1, 256], strides = [1, 1]} : vector<32x256xf32> to vector<1x256xf32>
    %55 = vector.extract_strided_slice %7 {offsets = [288, 0], sizes = [32, 256], strides = [1, 1]} : vector<1056x256xf32> to vector<32x256xf32>
    %56 = vector.broadcast %54 : vector<1x256xf32> to vector<32x256xf32>
    %57 = arith.mulf %56, %55 : vector<32x256xf32>
    %58 = arith.addf %53, %57 : vector<32x256xf32>
    %59 = vector.extract_strided_slice %1 {offsets = [10, 0], sizes = [1, 256], strides = [1, 1]} : vector<32x256xf32> to vector<1x256xf32>
    %60 = vector.extract_strided_slice %7 {offsets = [320, 0], sizes = [32, 256], strides = [1, 1]} : vector<1056x256xf32> to vector<32x256xf32>
    %61 = vector.broadcast %59 : vector<1x256xf32> to vector<32x256xf32>
    %62 = arith.mulf %61, %60 : vector<32x256xf32>
    %63 = arith.addf %58, %62 : vector<32x256xf32>
    %64 = vector.extract_strided_slice %1 {offsets = [11, 0], sizes = [1, 256], strides = [1, 1]} : vector<32x256xf32> to vector<1x256xf32>
    %65 = vector.extract_strided_slice %7 {offsets = [352, 0], sizes = [32, 256], strides = [1, 1]} : vector<1056x256xf32> to vector<32x256xf32>
    %66 = vector.broadcast %64 : vector<1x256xf32> to vector<32x256xf32>
    %67 = arith.mulf %66, %65 : vector<32x256xf32>
    %68 = arith.addf %63, %67 : vector<32x256xf32>
    %69 = vector.extract_strided_slice %1 {offsets = [12, 0], sizes = [1, 256], strides = [1, 1]} : vector<32x256xf32> to vector<1x256xf32>
    %70 = vector.extract_strided_slice %7 {offsets = [384, 0], sizes = [32, 256], strides = [1, 1]} : vector<1056x256xf32> to vector<32x256xf32>
    %71 = vector.broadcast %69 : vector<1x256xf32> to vector<32x256xf32>
    %72 = arith.mulf %71, %70 : vector<32x256xf32>
    %73 = arith.addf %68, %72 : vector<32x256xf32>
    %74 = vector.extract_strided_slice %1 {offsets = [13, 0], sizes = [1, 256], strides = [1, 1]} : vector<32x256xf32> to vector<1x256xf32>
    %75 = vector.extract_strided_slice %7 {offsets = [416, 0], sizes = [32, 256], strides = [1, 1]} : vector<1056x256xf32> to vector<32x256xf32>
    %76 = vector.broadcast %74 : vector<1x256xf32> to vector<32x256xf32>
    %77 = arith.mulf %76, %75 : vector<32x256xf32>
    %78 = arith.addf %73, %77 : vector<32x256xf32>
    %79 = vector.extract_strided_slice %1 {offsets = [14, 0], sizes = [1, 256], strides = [1, 1]} : vector<32x256xf32> to vector<1x256xf32>
    %80 = vector.extract_strided_slice %7 {offsets = [448, 0], sizes = [32, 256], strides = [1, 1]} : vector<1056x256xf32> to vector<32x256xf32>
    %81 = vector.broadcast %79 : vector<1x256xf32> to vector<32x256xf32>
    %82 = arith.mulf %81, %80 : vector<32x256xf32>
    %83 = arith.addf %78, %82 : vector<32x256xf32>
    %84 = vector.extract_strided_slice %1 {offsets = [15, 0], sizes = [1, 256], strides = [1, 1]} : vector<32x256xf32> to vector<1x256xf32>
    %85 = vector.extract_strided_slice %7 {offsets = [480, 0], sizes = [32, 256], strides = [1, 1]} : vector<1056x256xf32> to vector<32x256xf32>
    %86 = vector.broadcast %84 : vector<1x256xf32> to vector<32x256xf32>
    %87 = arith.mulf %86, %85 : vector<32x256xf32>
    %88 = arith.addf %83, %87 : vector<32x256xf32>
    %89 = vector.extract_strided_slice %1 {offsets = [16, 0], sizes = [1, 256], strides = [1, 1]} : vector<32x256xf32> to vector<1x256xf32>
    %90 = vector.extract_strided_slice %7 {offsets = [512, 0], sizes = [32, 256], strides = [1, 1]} : vector<1056x256xf32> to vector<32x256xf32>
    %91 = vector.broadcast %89 : vector<1x256xf32> to vector<32x256xf32>
    %92 = arith.mulf %91, %90 : vector<32x256xf32>
    %93 = arith.addf %88, %92 : vector<32x256xf32>
    %94 = vector.extract_strided_slice %1 {offsets = [17, 0], sizes = [1, 256], strides = [1, 1]} : vector<32x256xf32> to vector<1x256xf32>
    %95 = vector.extract_strided_slice %7 {offsets = [544, 0], sizes = [32, 256], strides = [1, 1]} : vector<1056x256xf32> to vector<32x256xf32>
    %96 = vector.broadcast %94 : vector<1x256xf32> to vector<32x256xf32>
    %97 = arith.mulf %96, %95 : vector<32x256xf32>
    %98 = arith.addf %93, %97 : vector<32x256xf32>
    %99 = vector.extract_strided_slice %1 {offsets = [18, 0], sizes = [1, 256], strides = [1, 1]} : vector<32x256xf32> to vector<1x256xf32>
    %100 = vector.extract_strided_slice %7 {offsets = [576, 0], sizes = [32, 256], strides = [1, 1]} : vector<1056x256xf32> to vector<32x256xf32>
    %101 = vector.broadcast %99 : vector<1x256xf32> to vector<32x256xf32>
    %102 = arith.mulf %101, %100 : vector<32x256xf32>
    %103 = arith.addf %98, %102 : vector<32x256xf32>
    %104 = vector.extract_strided_slice %1 {offsets = [19, 0], sizes = [1, 256], strides = [1, 1]} : vector<32x256xf32> to vector<1x256xf32>
    %105 = vector.extract_strided_slice %7 {offsets = [608, 0], sizes = [32, 256], strides = [1, 1]} : vector<1056x256xf32> to vector<32x256xf32>
    %106 = vector.broadcast %104 : vector<1x256xf32> to vector<32x256xf32>
    %107 = arith.mulf %106, %105 : vector<32x256xf32>
    %108 = arith.addf %103, %107 : vector<32x256xf32>
    %109 = vector.extract_strided_slice %1 {offsets = [20, 0], sizes = [1, 256], strides = [1, 1]} : vector<32x256xf32> to vector<1x256xf32>
    %110 = vector.extract_strided_slice %7 {offsets = [640, 0], sizes = [32, 256], strides = [1, 1]} : vector<1056x256xf32> to vector<32x256xf32>
    %111 = vector.broadcast %109 : vector<1x256xf32> to vector<32x256xf32>
    %112 = arith.mulf %111, %110 : vector<32x256xf32>
    %113 = arith.addf %108, %112 : vector<32x256xf32>
    %114 = vector.extract_strided_slice %1 {offsets = [21, 0], sizes = [1, 256], strides = [1, 1]} : vector<32x256xf32> to vector<1x256xf32>
    %115 = vector.extract_strided_slice %7 {offsets = [672, 0], sizes = [32, 256], strides = [1, 1]} : vector<1056x256xf32> to vector<32x256xf32>
    %116 = vector.broadcast %114 : vector<1x256xf32> to vector<32x256xf32>
    %117 = arith.mulf %116, %115 : vector<32x256xf32>
    %118 = arith.addf %113, %117 : vector<32x256xf32>
    %119 = vector.extract_strided_slice %1 {offsets = [22, 0], sizes = [1, 256], strides = [1, 1]} : vector<32x256xf32> to vector<1x256xf32>
    %120 = vector.extract_strided_slice %7 {offsets = [704, 0], sizes = [32, 256], strides = [1, 1]} : vector<1056x256xf32> to vector<32x256xf32>
    %121 = vector.broadcast %119 : vector<1x256xf32> to vector<32x256xf32>
    %122 = arith.mulf %121, %120 : vector<32x256xf32>
    %123 = arith.addf %118, %122 : vector<32x256xf32>
    %124 = vector.extract_strided_slice %1 {offsets = [23, 0], sizes = [1, 256], strides = [1, 1]} : vector<32x256xf32> to vector<1x256xf32>
    %125 = vector.extract_strided_slice %7 {offsets = [736, 0], sizes = [32, 256], strides = [1, 1]} : vector<1056x256xf32> to vector<32x256xf32>
    %126 = vector.broadcast %124 : vector<1x256xf32> to vector<32x256xf32>
    %127 = arith.mulf %126, %125 : vector<32x256xf32>
    %128 = arith.addf %123, %127 : vector<32x256xf32>
    %129 = vector.extract_strided_slice %1 {offsets = [24, 0], sizes = [1, 256], strides = [1, 1]} : vector<32x256xf32> to vector<1x256xf32>
    %130 = vector.extract_strided_slice %7 {offsets = [768, 0], sizes = [32, 256], strides = [1, 1]} : vector<1056x256xf32> to vector<32x256xf32>
    %131 = vector.broadcast %129 : vector<1x256xf32> to vector<32x256xf32>
    %132 = arith.mulf %131, %130 : vector<32x256xf32>
    %133 = arith.addf %128, %132 : vector<32x256xf32>
    %134 = vector.extract_strided_slice %1 {offsets = [25, 0], sizes = [1, 256], strides = [1, 1]} : vector<32x256xf32> to vector<1x256xf32>
    %135 = vector.extract_strided_slice %7 {offsets = [800, 0], sizes = [32, 256], strides = [1, 1]} : vector<1056x256xf32> to vector<32x256xf32>
    %136 = vector.broadcast %134 : vector<1x256xf32> to vector<32x256xf32>
    %137 = arith.mulf %136, %135 : vector<32x256xf32>
    %138 = arith.addf %133, %137 : vector<32x256xf32>
    %139 = vector.extract_strided_slice %1 {offsets = [26, 0], sizes = [1, 256], strides = [1, 1]} : vector<32x256xf32> to vector<1x256xf32>
    %140 = vector.extract_strided_slice %7 {offsets = [832, 0], sizes = [32, 256], strides = [1, 1]} : vector<1056x256xf32> to vector<32x256xf32>
    %141 = vector.broadcast %139 : vector<1x256xf32> to vector<32x256xf32>
    %142 = arith.mulf %141, %140 : vector<32x256xf32>
    %143 = arith.addf %138, %142 : vector<32x256xf32>
    %144 = vector.extract_strided_slice %1 {offsets = [27, 0], sizes = [1, 256], strides = [1, 1]} : vector<32x256xf32> to vector<1x256xf32>
    %145 = vector.extract_strided_slice %7 {offsets = [864, 0], sizes = [32, 256], strides = [1, 1]} : vector<1056x256xf32> to vector<32x256xf32>
    %146 = vector.broadcast %144 : vector<1x256xf32> to vector<32x256xf32>
    %147 = arith.mulf %146, %145 : vector<32x256xf32>
    %148 = arith.addf %143, %147 : vector<32x256xf32>
    %149 = vector.extract_strided_slice %1 {offsets = [28, 0], sizes = [1, 256], strides = [1, 1]} : vector<32x256xf32> to vector<1x256xf32>
    %150 = vector.extract_strided_slice %7 {offsets = [896, 0], sizes = [32, 256], strides = [1, 1]} : vector<1056x256xf32> to vector<32x256xf32>
    %151 = vector.broadcast %149 : vector<1x256xf32> to vector<32x256xf32>
    %152 = arith.mulf %151, %150 : vector<32x256xf32>
    %153 = arith.addf %148, %152 : vector<32x256xf32>
    %154 = vector.extract_strided_slice %1 {offsets = [29, 0], sizes = [1, 256], strides = [1, 1]} : vector<32x256xf32> to vector<1x256xf32>
    %155 = vector.extract_strided_slice %7 {offsets = [928, 0], sizes = [32, 256], strides = [1, 1]} : vector<1056x256xf32> to vector<32x256xf32>
    %156 = vector.broadcast %154 : vector<1x256xf32> to vector<32x256xf32>
    %157 = arith.mulf %156, %155 : vector<32x256xf32>
    %158 = arith.addf %153, %157 : vector<32x256xf32>
    %159 = vector.extract_strided_slice %1 {offsets = [30, 0], sizes = [1, 256], strides = [1, 1]} : vector<32x256xf32> to vector<1x256xf32>
    %160 = vector.extract_strided_slice %7 {offsets = [960, 0], sizes = [32, 256], strides = [1, 1]} : vector<1056x256xf32> to vector<32x256xf32>
    %161 = vector.broadcast %159 : vector<1x256xf32> to vector<32x256xf32>
    %162 = arith.mulf %161, %160 : vector<32x256xf32>
    %163 = arith.addf %158, %162 : vector<32x256xf32>
    %164 = vector.extract_strided_slice %1 {offsets = [31, 0], sizes = [1, 256], strides = [1, 1]} : vector<32x256xf32> to vector<1x256xf32>
    %165 = vector.extract_strided_slice %7 {offsets = [992, 0], sizes = [32, 256], strides = [1, 1]} : vector<1056x256xf32> to vector<32x256xf32>
    %166 = vector.broadcast %164 : vector<1x256xf32> to vector<32x256xf32>
    %167 = arith.mulf %166, %165 : vector<32x256xf32>
    %168 = arith.addf %163, %167 : vector<32x256xf32>
    %c0_8 = arith.constant 0 : index
    %c0_9 = arith.constant 0 : index
    %169 = vector.load %arg3[%c0_8, %c0_9] : memref<32x1xf32, #tpu.memory_space<vmem>>, vector<32x1xf32>
    %170 = vector.broadcast %169 : vector<32x1xf32> to vector<32x256xf32>
    %171 = arith.addf %168, %170 : vector<32x256xf32>
    %172 = arith.mulf %171, %5 : vector<32x256xf32>
    %cst_10 = arith.constant dense<0.000000e+00> : vector<256xf32>
    %173 = vector.multi_reduction <add>, %172, %cst_10 [0] : vector<32x256xf32> to vector<256xf32>
    %174 = vector.shape_cast %173 : vector<256xf32> to vector<1x256xf32>
    %175 = arith.negf %174 : vector<1x256xf32>
    %176 = math.exp %175 : vector<1x256xf32>
    %cst_11 = arith.constant 1.000000e+00 : f32
    %177 = vector.broadcast %cst_11 : f32 to vector<1x256xf32>
    %178 = arith.addf %177, %176 : vector<1x256xf32>
    %179 = arith.divf %177, %178 : vector<1x256xf32>
    %c0_12 = arith.constant 0 : index
    %c0_13 = arith.constant 0 : index
    %180 = vector.load %arg4[%c0_12, %c0_13] : memref<1x256xf32, #tpu.memory_space<vmem>>, vector<1x256xf32>
    tpu.vector_store %arg4[%c0_12, %c0_13], %179 {strides = array<i32>} : memref<1x256xf32, #tpu.memory_space<vmem>>, vector<1x256xf32>,
    return
  }
  func.func @transform_0(%arg0: i32) -> (i32, i32, i32) {
    %c0_i32 = arith.constant 0 : i32
    %c0_i32_0 = arith.constant 0 : i32
    %c0_i32_1 = arith.constant 0 : i32
    return %c0_i32, %c0_i32_0, %arg0 : i32, i32, i32
  }
  func.func @transform_1(%arg0: i32) -> (i32, i32) {
    %c0_i32 = arith.constant 0 : i32
    %c0_i32_0 = arith.constant 0 : i32
    %c0_i32_1 = arith.constant 0 : i32
    return %c0_i32, %c0_i32_0 : i32, i32
  }
  func.func @transform_2(%arg0: i32) -> (i32, i32) {
    %c0_i32 = arith.constant 0 : i32
    %c0_i32_0 = arith.constant 0 : i32
    %c0_i32_1 = arith.constant 0 : i32
    return %c0_i32, %c0_i32_0 : i32, i32
  }
  func.func @transform_3(%arg0: i32) -> (i32, i32) {
    %c0_i32 = arith.constant 0 : i32
    %c0_i32_0 = arith.constant 0 : i32
    return %c0_i32, %arg0 : i32, i32
  }
}

</mosaic_0001>

<bundles_post_ra>
// kernel: tucker_forward.1
= control target key start
LH: loop header
LB: loop body
LE: loop exit
PB: predicated region body
PF: predicated region fallthrough
CT: control target
= control target key end

     0   :  { %v2502_v7 = vmov 0.0   ;;  %vm173_vm0 = vcmask 261120   ;;  %s5295_s0 = inlined_call_operand.vmem [shape: f32[3,32,256], index: 0, kind: input, shape index: {}]   ;;  %s5296_s1 = inlined_call_operand.vmem [shape: f32[1056,32], index: 1, kind: input, shape index: {}]   ;;  %s5297_s2 = inlined_call_operand.vmem [shape: f32[32,1], index: 2, kind: input, shape index: {}]   ;;  %s5298_s3 = inlined_call_operand.hbm [shape: f32[1,256], index: 3, kind: output, shape index: {}]  }
   0x1   :  { %v2303_v0 = vld [vmem:[%s5295_s0 + $0x48] sm:$0xff]  ;;  %v2305_v1 = vld [vmem:[%s5295_s0 + $0x58] sm:$0xff]  ;;  %v2302_v2 = vld [vmem:[%s5295_s0 + $0x40] sm:$0xff]  ;;  %1030 = vmatprep.mubr.f32.mxu1 %v2502_v7  ;;  %634 = vmatprep.mubr.f32.mxu0 %v2502_v7 }
   0x2   :  { %v2452_v3 = vpack.c.bf16 %v2305_v1, %v2303_v0  ;;  %v2304_v4 = vld [vmem:[%s5295_s0 + $0x50] sm:$0xff]  ;;  %v2307_v5 = vld [vmem:[%s5295_s0 + $0x68] sm:$0xff]  ;;  %v2309_v6 = vld [vmem:[%s5295_s0 + $0x78] sm:$0xff] }
   0x3   :  { %v2454_v8 = vpack.c.bf16 %v2304_v4, %v2302_v2  ;;  %v2456_v9 = vpack.c.bf16 %v2309_v6, %v2307_v5  ;;  %v2306_v10 = vld [vmem:[%s5295_s0 + $0x60] sm:$0xff]  ;;  %v2308_v11 = vld [vmem:[%s5295_s0 + $0x70] sm:$0xff]  ;;  %v108_v15 = vld [vmem:[%s5296_s1 + $0x218] sm:$0xff] }
   0x4   :  { %2460 = vmatprep.subr.bf16.mxu1 %v2452_v3  ;;  %2453 = vmatprep.subr.bf16.mxu0 %v2452_v3  ;;  %v2458_v12 = vpack.c.bf16 %v2308_v11, %v2306_v10  ;;  %v107_v13 = vld [vmem:[%s5296_s1 + $0x210] sm:$0xff]  ;;  %v41_v14 = vld [vmem:[%s5296_s1] sm:$0xff]  ;;  %v42_v16 = vld [vmem:[%s5296_s1 + $0x8] sm:$0xff] }
   0x5   :  { %2462 = vmatpush1.bf16.msra.mxu1 %v2454_v8  ;;  %2455 = vmatpush1.bf16.msra.mxu0 %v2454_v8  ;;  %v109_v17 = vld [vmem:[%s5296_s1 + $0x220] sm:$0xff]  ;;  %v43_v18 = vld [vmem:[%s5296_s1 + $0x10] sm:$0xff]  ;;  %v110_v19 = vld [vmem:[%s5296_s1 + $0x228] sm:$0xff] }
   0x6   :  { %2461 = vmatprep.subr.bf16.mxu1 %v2456_v9  ;;  %2457 = vmatprep.subr.bf16.mxu0 %v2456_v9  ;;  %v44_v20 = vld [vmem:[%s5296_s1 + $0x18] sm:$0xff]  ;;  %v111_v21 = vld [vmem:[%s5296_s1 + $0x230] sm:$0xff]  ;;  %v45_v22 = vld [vmem:[%s5296_s1 + $0x20] sm:$0xff] }
   0x9   :  { %2463 = vmatpush1.bf16.msra.mxu1 %v2458_v12  ;;  %2459 = vmatpush1.bf16.msra.mxu0 %v2458_v12 }
   0xc   :  { %2384 = vmatmul.mubr.msk.f32.vlgmr.msra.gmra.mrb[0].mxu1 %vm173_vm0, %v107_v13  ;;  %2318 = vmatmul.mubr.msk.f32.vlgmr.msra.gmra.mrb[0].mxu0 %vm173_vm0, %v41_v14 }
   0xd   :  { %1036 = vmatprep.mubr.f32.mxu1 %v2502_v7  ;;  %640 = vmatprep.mubr.f32.mxu0 %v2502_v7 }
  0x10   :  { %2385 = vmatmul.mubr.msk.f32.gmra.mrb[2].mxu1 %vm173_vm0, %v108_v15  ;;  %2319 = vmatmul.mubr.msk.f32.gmra.mrb[2].mxu0 %vm173_vm0, %v42_v16 }
  0x11   :  { %1042 = vmatprep.mubr.f32.mxu1 %v2502_v7  ;;  %646 = vmatprep.mubr.f32.mxu0 %v2502_v7 }
  0x14   :  { %2386 = vmatmul.mubr.msk.f32.gmra.mrb[4].mxu1 %vm173_vm0, %v109_v17  ;;  %2320 = vmatmul.mubr.msk.f32.gmra.mrb[4].mxu0 %vm173_vm0, %v43_v18 }
  0x15   :  { %1048 = vmatprep.mubr.f32.mxu1 %v2502_v7  ;;  %652 = vmatprep.mubr.f32.mxu0 %v2502_v7 }
  0x18   :  { %2387 = vmatmul.mubr.msk.f32.gmra.mrb[6].mxu1 %vm173_vm0, %v110_v19  ;;  %2321 = vmatmul.mubr.msk.f32.gmra.mrb[6].mxu0 %vm173_vm0, %v44_v20 }
  0x19   :  { %1054 = vmatprep.mubr.f32.mxu1 %v2502_v7  ;;  %658 = vmatprep.mubr.f32.mxu0 %v2502_v7 }
  0x1a   :  { %8 = vsyncpa [#allocation3], 0  ;;  %v112_v23 = vld [vmem:[%s5296_s1 + $0x238] sm:$0xff]  ;;  %v46_v24 = vld [vmem:[%s5296_s1 + $0x28] sm:$0xff] }
  0x1b   :  { %v113_v25 = vld [vmem:[%s5296_s1 + $0x240] sm:$0xff]  ;;  %v47_v26 = vld [vmem:[%s5296_s1 + $0x30] sm:$0xff]  ;;  %v114_v27 = vld [vmem:[%s5296_s1 + $0x248] sm:$0xff] }
  0x1c   :  { %2388 = vmatmul.mubr.msk.f32.gmra.mrb[8].mxu1 %vm173_vm0, %v111_v21  ;;  %2322 = vmatmul.mubr.msk.f32.gmra.mrb[8].mxu0 %vm173_vm0, %v45_v22  ;;  %v48_v28 = vld [vmem:[%s5296_s1 + $0x38] sm:$0xff]  ;;  %v115_v29 = vld [vmem:[%s5296_s1 + $0x250] sm:$0xff]  ;;  %v49_v30 = vld [vmem:[%s5296_s1 + $0x40] sm:$0xff] }
  0x1d   :  { %1060 = vmatprep.mubr.f32.mxu1 %v2502_v7  ;;  %664 = vmatprep.mubr.f32.mxu0 %v2502_v7  ;;  %v116_v31 = vld [vmem:[%s5296_s1 + $0x258] sm:$0xff]  ;;  %v50_v32 = vld [vmem:[%s5296_s1 + $0x48] sm:$0xff]  ;;  %v117_v33 = vld [vmem:[%s5296_s1 + $0x260] sm:$0xff] }
  0x1e   :  { %v51_v34 = vld [vmem:[%s5296_s1 + $0x50] sm:$0xff]  ;;  %v118_v35 = vld [vmem:[%s5296_s1 + $0x268] sm:$0xff]  ;;  %v52_v36 = vld [vmem:[%s5296_s1 + $0x58] sm:$0xff] }
  0x1f   :  { %v119_v37 = vld [vmem:[%s5296_s1 + $0x270] sm:$0xff]  ;;  %v53_v38 = vld [vmem:[%s5296_s1 + $0x60] sm:$0xff]  ;;  %v120_v39 = vld [vmem:[%s5296_s1 + $0x278] sm:$0xff] }
  0x20   :  { %2389 = vmatmul.mubr.msk.f32.gmra.mrb[10].mxu1 %vm173_vm0, %v112_v23  ;;  %2323 = vmatmul.mubr.msk.f32.gmra.mrb[10].mxu0 %vm173_vm0, %v46_v24  ;;  %v54_v40 = vld [vmem:[%s5296_s1 + $0x68] sm:$0xff]  ;;  %v121_v41 = vld [vmem:[%s5296_s1 + $0x280] sm:$0xff]  ;;  %v55_v42 = vld [vmem:[%s5296_s1 + $0x70] sm:$0xff] }
  0x21   :  { %1066 = vmatprep.mubr.f32.mxu1 %v2502_v7  ;;  %670 = vmatprep.mubr.f32.mxu0 %v2502_v7  ;;  %v122_v43 = vld [vmem:[%s5296_s1 + $0x288] sm:$0xff]  ;;  %v56_v44 = vld [vmem:[%s5296_s1 + $0x78] sm:$0xff]  ;;  %v123_v45 = vld [vmem:[%s5296_s1 + $0x290] sm:$0xff] }
  0x22   :  { %v57_v46 = vld [vmem:[%s5296_s1 + $0x80] sm:$0xff]  ;;  %v124_v47 = vld [vmem:[%s5296_s1 + $0x298] sm:$0xff]  ;;  %v58_v48 = vld [vmem:[%s5296_s1 + $0x88] sm:$0xff] }
  0x23   :  { %v125_v49 = vld [vmem:[%s5296_s1 + $0x2a0] sm:$0xff]  ;;  %v59_v50 = vld [vmem:[%s5296_s1 + $0x90] sm:$0xff]  ;;  %v126_v51 = vld [vmem:[%s5296_s1 + $0x2a8] sm:$0xff] }
  0x24   :  { %2390 = vmatmul.mubr.msk.f32.gmra.mrb[12].mxu1 %vm173_vm0, %v113_v25  ;;  %2324 = vmatmul.mubr.msk.f32.gmra.mrb[12].mxu0 %vm173_vm0, %v47_v26  ;;  %v60_v52 = vld [vmem:[%s5296_s1 + $0x98] sm:$0xff]  ;;  %v127_v53 = vld [vmem:[%s5296_s1 + $0x2b0] sm:$0xff]  ;;  %v61_v54 = vld [vmem:[%s5296_s1 + $0xa0] sm:$0xff] }
  0x25   :  { %1072 = vmatprep.mubr.f32.mxu1 %v2502_v7  ;;  %676 = vmatprep.mubr.f32.mxu0 %v2502_v7  ;;  %v128_v55 = vld [vmem:[%s5296_s1 + $0x2b8] sm:$0xff]  ;;  %v62_v56 = vld [vmem:[%s5296_s1 + $0xa8] sm:$0xff]  ;;  %v129_v57 = vld [vmem:[%s5296_s1 + $0x2c0] sm:$0xff] }
  0x26   :  { %v63_v58 = vld [vmem:[%s5296_s1 + $0xb0] sm:$0xff]  ;;  %v130_v59 = vld [vmem:[%s5296_s1 + $0x2c8] sm:$0xff]  ;;  %v64_v60 = vld [vmem:[%s5296_s1 + $0xb8] sm:$0xff] }
  0x27   :  { %v131_v61 = vld [vmem:[%s5296_s1 + $0x2d0] sm:$0xff]  ;;  %v65_v62 = vld [vmem:[%s5296_s1 + $0xc0] sm:$0xff]  ;;  %v132_v63 = vld [vmem:[%s5296_s1 + $0x2d8] sm:$0xff] }
  0x28   :  { %2391 = vmatmul.mubr.msk.f32.gmra.mrb[14].mxu1 %vm173_vm0, %v114_v27  ;;  %2325 = vmatmul.mubr.msk.f32.gmra.mrb[14].mxu0 %vm173_vm0, %v48_v28  ;;  %v66_v0 = vld [vmem:[%s5296_s1 + $0xc8] sm:$0xff]  ;;  %v133_v1 = vld [vmem:[%s5296_s1 + $0x2e0] sm:$0xff]  ;;  %v67_v2 = vld [vmem:[%s5296_s1 + $0xd0] sm:$0xff] }
  0x29   :  { %1078 = vmatprep.mubr.f32.mxu1 %v2502_v7  ;;  %682 = vmatprep.mubr.f32.mxu0 %v2502_v7  ;;  %v134_v3 = vld [vmem:[%s5296_s1 + $0x2e8] sm:$0xff]  ;;  %v68_v4 = vld [vmem:[%s5296_s1 + $0xd8] sm:$0xff]  ;;  %v135_v5 = vld [vmem:[%s5296_s1 + $0x2f0] sm:$0xff] }
  0x2a   :  { %v69_v6 = vld [vmem:[%s5296_s1 + $0xe0] sm:$0xff]  ;;  %v136_v8 = vld [vmem:[%s5296_s1 + $0x2f8] sm:$0xff]  ;;  %v70_v9 = vld [vmem:[%s5296_s1 + $0xe8] sm:$0xff] }
  0x2b   :  { %v137_v10 = vld [vmem:[%s5296_s1 + $0x300] sm:$0xff]  ;;  %v71_v11 = vld [vmem:[%s5296_s1 + $0xf0] sm:$0xff]  ;;  %v138_v12 = vld [vmem:[%s5296_s1 + $0x308] sm:$0xff] }
  0x2c   :  { %2392 = vmatmul.mubr.msk.f32.gmra.mrb[16].mxu1 %vm173_vm0, %v115_v29  ;;  %2326 = vmatmul.mubr.msk.f32.gmra.mrb[16].mxu0 %vm173_vm0, %v49_v30  ;;  %v72_v13 = vld [vmem:[%s5296_s1 + $0xf8] sm:$0xff]  ;;  %v139_v14 = vld [vmem:[%s5296_s1 + $0x310] sm:$0xff]  ;;  %v73_v15 = vld [vmem:[%s5296_s1 + $0x100] sm:$0xff] }
  0x2d   :  { %1084 = vmatprep.mubr.f32.mxu1 %v2502_v7  ;;  %688 = vmatprep.mubr.f32.mxu0 %v2502_v7  ;;  %v140_v16 = vld [vmem:[%s5296_s1 + $0x318] sm:$0xff]  ;;  %v74_v17 = vld [vmem:[%s5296_s1 + $0x108] sm:$0xff]  ;;  %v141_v18 = vld [vmem:[%s5296_s1 + $0x320] sm:$0xff] }
  0x2e   :  { %v75_v19 = vld [vmem:[%s5296_s1 + $0x110] sm:$0xff]  ;;  %v142_v20 = vld [vmem:[%s5296_s1 + $0x328] sm:$0xff]  ;;  %v76_v21 = vld [vmem:[%s5296_s1 + $0x118] sm:$0xff] }
  0x2f   :  { %v143_v22 = vld [vmem:[%s5296_s1 + $0x330] sm:$0xff]  ;;  %v77_v23 = vld [vmem:[%s5296_s1 + $0x120] sm:$0xff]  ;;  %v144_v24 = vld [vmem:[%s5296_s1 + $0x338] sm:$0xff] }
  0x30   :  { %2393 = vmatmul.mubr.msk.f32.gmra.mrb[18].mxu1 %vm173_vm0, %v116_v31  ;;  %2327 = vmatmul.mubr.msk.f32.gmra.mrb[18].mxu0 %vm173_vm0, %v50_v32  ;;  %v78_v25 = vld [vmem:[%s5296_s1 + $0x128] sm:$0xff]  ;;  %v145_v26 = vld [vmem:[%s5296_s1 + $0x340] sm:$0xff]  ;;  %v79_v27 = vld [vmem:[%s5296_s1 + $0x130] sm:$0xff] }
  0x31   :  { %1090 = vmatprep.mubr.f32.mxu1 %v2502_v7  ;;  %694 = vmatprep.mubr.f32.mxu0 %v2502_v7  ;;  %v146_v28 = vld [vmem:[%s5296_s1 + $0x348] sm:$0xff]  ;;  %v80_v29 = vld [vmem:[%s5296_s1 + $0x138] sm:$0xff]  ;;  %v147_v30 = vld [vmem:[%s5296_s1 + $0x350] sm:$0xff] }
  0x32   :  { %v81_v31 = vld [vmem:[%s5296_s1 + $0x140] sm:$0xff]  ;;  %v148_v32 = vld [vmem:[%s5296_s1 + $0x358] sm:$0xff] }
  0x34   :  { %2394 = vmatmul.mubr.msk.f32.gmra.mrb[20].mxu1 %vm173_vm0, %v117_v33  ;;  %2328 = vmatmul.mubr.msk.f32.gmra.mrb[20].mxu0 %vm173_vm0, %v51_v34  ;;  %v82_v33 = vld [vmem:[%s5296_s1 + $0x148] sm:$0xff]  ;;  %v149_v34 = vld [vmem:[%s5296_s1 + $0x360] sm:$0xff] }
  0x35   :  { %1096 = vmatprep.mubr.f32.mxu1 %v2502_v7  ;;  %700 = vmatprep.mubr.f32.mxu0 %v2502_v7 }
  0x38   :  { %2395 = vmatmul.mubr.msk.f32.gmra.mrb[22].mxu1 %vm173_vm0, %v118_v35  ;;  %2329 = vmatmul.mubr.msk.f32.gmra.mrb[22].mxu0 %vm173_vm0, %v52_v36  ;;  %v83_v35 = vld [vmem:[%s5296_s1 + $0x150] sm:$0xff]  ;;  %v150_v36 = vld [vmem:[%s5296_s1 + $0x368] sm:$0xff] }
  0x39   :  { %1102 = vmatprep.mubr.f32.mxu1 %v2502_v7  ;;  %706 = vmatprep.mubr.f32.mxu0 %v2502_v7 }
  0x3c   :  { %2396 = vmatmul.mubr.msk.f32.gmra.mrb[24].mxu1 %vm173_vm0, %v119_v37  ;;  %2330 = vmatmul.mubr.msk.f32.gmra.mrb[24].mxu0 %vm173_vm0, %v53_v38  ;;  %v84_v37 = vld [vmem:[%s5296_s1 + $0x158] sm:$0xff]  ;;  %v151_v38 = vld [vmem:[%s5296_s1 + $0x370] sm:$0xff] }
  0x3d   :  { %1108 = vmatprep.mubr.f32.mxu1 %v2502_v7  ;;  %712 = vmatprep.mubr.f32.mxu0 %v2502_v7 }
  0x40   :  { %2397 = vmatmul.mubr.msk.f32.gmra.mrb[26].mxu1 %vm173_vm0, %v120_v39  ;;  %2331 = vmatmul.mubr.msk.f32.gmra.mrb[26].mxu0 %vm173_vm0, %v54_v40  ;;  %v85_v39 = vld [vmem:[%s5296_s1 + $0x160] sm:$0xff]  ;;  %v152_v40 = vld [vmem:[%s5296_s1 + $0x378] sm:$0xff] }
  0x41   :  { %1114 = vmatprep.mubr.f32.mxu1 %v2502_v7  ;;  %718 = vmatprep.mubr.f32.mxu0 %v2502_v7 }
  0x44   :  { %2398 = vmatmul.mubr.msk.f32.gmra.mrb[28].mxu1 %vm173_vm0, %v121_v41  ;;  %2332 = vmatmul.mubr.msk.f32.gmra.mrb[28].mxu0 %vm173_vm0, %v55_v42  ;;  %v86_v41 = vld [vmem:[%s5296_s1 + $0x168] sm:$0xff]  ;;  %v153_v42 = vld [vmem:[%s5296_s1 + $0x380] sm:$0xff] }
  0x45   :  { %1120 = vmatprep.mubr.f32.mxu1 %v2502_v7  ;;  %724 = vmatprep.mubr.f32.mxu0 %v2502_v7 }
  0x48   :  { %2399 = vmatmul.mubr.msk.f32.gmra.mrb[30].mxu1 %vm173_vm0, %v122_v43  ;;  %2333 = vmatmul.mubr.msk.f32.gmra.mrb[30].mxu0 %vm173_vm0, %v56_v44  ;;  %v87_v43 = vld [vmem:[%s5296_s1 + $0x170] sm:$0xff]  ;;  %v154_v44 = vld [vmem:[%s5296_s1 + $0x388] sm:$0xff] }
  0x49   :  { %1126 = vmatprep.mubr.f32.mxu1 %v2502_v7  ;;  %730 = vmatprep.mubr.f32.mxu0 %v2502_v7 }
  0x4c   :  { %2400 = vmatmul.mubr.msk.f32.gmra.mrb[32].mxu1 %vm173_vm0, %v123_v45  ;;  %2334 = vmatmul.mubr.msk.f32.gmra.mrb[32].mxu0 %vm173_vm0, %v57_v46  ;;  %v88_v45 = vld [vmem:[%s5296_s1 + $0x178] sm:$0xff]  ;;  %v155_v46 = vld [vmem:[%s5296_s1 + $0x390] sm:$0xff] }
  0x4d   :  { %1132 = vmatprep.mubr.f32.mxu1 %v2502_v7  ;;  %736 = vmatprep.mubr.f32.mxu0 %v2502_v7 }
  0x50   :  { %2401 = vmatmul.mubr.msk.f32.gmra.mrb[34].mxu1 %vm173_vm0, %v124_v47  ;;  %2335 = vmatmul.mubr.msk.f32.gmra.mrb[34].mxu0 %vm173_vm0, %v58_v48  ;;  %v89_v47 = vld [vmem:[%s5296_s1 + $0x180] sm:$0xff]  ;;  %v156_v48 = vld [vmem:[%s5296_s1 + $0x398] sm:$0xff] }
  0x51   :  { %1138 = vmatprep.mubr.f32.mxu1 %v2502_v7  ;;  %742 = vmatprep.mubr.f32.mxu0 %v2502_v7 }
  0x54   :  { %2402 = vmatmul.mubr.msk.f32.gmra.mrb[36].mxu1 %vm173_vm0, %v125_v49  ;;  %2336 = vmatmul.mubr.msk.f32.gmra.mrb[36].mxu0 %vm173_vm0, %v59_v50  ;;  %v90_v49 = vld [vmem:[%s5296_s1 + $0x188] sm:$0xff]  ;;  %v157_v50 = vld [vmem:[%s5296_s1 + $0x3a0] sm:$0xff] }
  0x55   :  { %1144 = vmatprep.mubr.f32.mxu1 %v2502_v7  ;;  %748 = vmatprep.mubr.f32.mxu0 %v2502_v7 }
  0x58   :  { %2403 = vmatmul.mubr.msk.f32.gmra.mrb[38].mxu1 %vm173_vm0, %v126_v51  ;;  %2337 = vmatmul.mubr.msk.f32.gmra.mrb[38].mxu0 %vm173_vm0, %v60_v52  ;;  %v91_v51 = vld [vmem:[%s5296_s1 + $0x190] sm:$0xff]  ;;  %v158_v52 = vld [vmem:[%s5296_s1 + $0x3a8] sm:$0xff] }
  0x59   :  { %1150 = vmatprep.mubr.f32.mxu1 %v2502_v7  ;;  %754 = vmatprep.mubr.f32.mxu0 %v2502_v7 }
  0x5c   :  { %2404 = vmatmul.mubr.msk.f32.gmra.mrb[40].mxu1 %vm173_vm0, %v127_v53  ;;  %2338 = vmatmul.mubr.msk.f32.gmra.mrb[40].mxu0 %vm173_vm0, %v61_v54  ;;  %v92_v53 = vld [vmem:[%s5296_s1 + $0x198] sm:$0xff]  ;;  %v159_v54 = vld [vmem:[%s5296_s1 + $0x3b0] sm:$0xff] }
  0x5d   :  { %1156 = vmatprep.mubr.f32.mxu1 %v2502_v7  ;;  %760 = vmatprep.mubr.f32.mxu0 %v2502_v7 }
  0x60   :  { %2405 = vmatmul.mubr.msk.f32.gmra.mrb[42].mxu1 %vm173_vm0, %v128_v55  ;;  %2339 = vmatmul.mubr.msk.f32.gmra.mrb[42].mxu0 %vm173_vm0, %v62_v56  ;;  %v93_v55 = vld [vmem:[%s5296_s1 + $0x1a0] sm:$0xff]  ;;  %v160_v56 = vld [vmem:[%s5296_s1 + $0x3b8] sm:$0xff] }
  0x61   :  { %1162 = vmatprep.mubr.f32.mxu1 %v2502_v7  ;;  %766 = vmatprep.mubr.f32.mxu0 %v2502_v7 }
  0x64   :  { %2406 = vmatmul.mubr.msk.f32.gmra.mrb[44].mxu1 %vm173_vm0, %v129_v57  ;;  %2340 = vmatmul.mubr.msk.f32.gmra.mrb[44].mxu0 %vm173_vm0, %v63_v58  ;;  %v94_v57 = vld [vmem:[%s5296_s1 + $0x1a8] sm:$0xff] }
  0x65   :  { %1168 = vmatprep.mubr.f32.mxu1 %v2502_v7  ;;  %772 = vmatprep.mubr.f32.mxu0 %v2502_v7 }
  0x68   :  { %2407 = vmatmul.mubr.msk.f32.gmra.mrb[46].mxu1 %vm173_vm0, %v130_v59  ;;  %2341 = vmatmul.mubr.msk.f32.gmra.mrb[46].mxu0 %vm173_vm0, %v64_v60 }
  0x69   :  { %1174 = vmatprep.mubr.f32.mxu1 %v2502_v7  ;;  %778 = vmatprep.mubr.f32.mxu0 %v2502_v7 }
  0x6c   :  { %2408 = vmatmul.mubr.msk.f32.gmra.mrb[48].mxu1 %vm173_vm0, %v131_v61  ;;  %2342 = vmatmul.mubr.msk.f32.gmra.mrb[48].mxu0 %vm173_vm0, %v65_v62  ;;  %v161_v62 = vld [vmem:[%s5296_s1 + $0x3c0] sm:$0xff] }
  0x6d   :  { %1180 = vmatprep.mubr.f32.mxu1 %v2502_v7  ;;  %784 = vmatprep.mubr.f32.mxu0 %v2502_v7 }
  0x70   :  { %2409 = vmatmul.mubr.msk.f32.gmra.mrb[50].mxu1 %vm173_vm0, %v132_v63  ;;  %2343 = vmatmul.mubr.msk.f32.gmra.mrb[50].mxu0 %vm173_vm0, %v66_v0  ;;  %v95_v63 = vld [vmem:[%s5296_s1 + $0x1b0] sm:$0xff] }
  0x71   :  { %1186 = vmatprep.mubr.f32.mxu1 %v2502_v7  ;;  %790 = vmatprep.mubr.f32.mxu0 %v2502_v7 }
  0x74   :  { %2410 = vmatmul.mubr.msk.f32.gmra.mrb[52].mxu1 %vm173_vm0, %v133_v1  ;;  %2344 = vmatmul.mubr.msk.f32.gmra.mrb[52].mxu0 %vm173_vm0, %v67_v2 }
  0x75   :  { %1192 = vmatprep.mubr.f32.mxu1 %v2502_v7  ;;  %796 = vmatprep.mubr.f32.mxu0 %v2502_v7 }
  0x78   :  { %2411 = vmatmul.mubr.msk.f32.gmra.mrb[54].mxu1 %vm173_vm0, %v134_v3  ;;  %2345 = vmatmul.mubr.msk.f32.gmra.mrb[54].mxu0 %vm173_vm0, %v68_v4  ;;  %v162_v4 = vld [vmem:[%s5296_s1 + $0x3c8] sm:$0xff] }
  0x79   :  { %1198 = vmatprep.mubr.f32.mxu1 %v2502_v7  ;;  %802 = vmatprep.mubr.f32.mxu0 %v2502_v7 }
  0x7c   :  { %2412 = vmatmul.mubr.msk.f32.gmra.mrb[56].mxu1 %vm173_vm0, %v135_v5  ;;  %2346 = vmatmul.mubr.msk.f32.gmra.mrb[56].mxu0 %vm173_vm0, %v69_v6  ;;  %v96_v5 = vld [vmem:[%s5296_s1 + $0x1b8] sm:$0xff] }
  0x7d   :  { %1204 = vmatprep.mubr.f32.mxu1 %v2502_v7  ;;  %808 = vmatprep.mubr.f32.mxu0 %v2502_v7 }
  0x80   :  { %2413 = vmatmul.mubr.msk.f32.gmra.mrb[58].mxu1 %vm173_vm0, %v136_v8  ;;  %2347 = vmatmul.mubr.msk.f32.gmra.mrb[58].mxu0 %vm173_vm0, %v70_v9 }
  0x81   :  { %1210 = vmatprep.mubr.f32.mxu1 %v2502_v7  ;;  %814 = vmatprep.mubr.f32.mxu0 %v2502_v7 }
  0x84   :  { %2414 = vmatmul.mubr.msk.f32.gmra.mrb[60].mxu1 %vm173_vm0, %v137_v10  ;;  %2348 = vmatmul.mubr.msk.f32.gmra.mrb[60].mxu0 %vm173_vm0, %v71_v11  ;;  %v163_v11 = vld [vmem:[%s5296_s1 + $0x3d0] sm:$0xff] }
  0x85   :  { %1216 = vmatprep.mubr.f32.mxu1 %v2502_v7  ;;  %820 = vmatprep.mubr.f32.mxu0 %v2502_v7 }
  0x88   :  { %2415 = vmatmul.mubr.msk.f32.gmra.mrb[62].mxu1 %vm173_vm0, %v138_v12  ;;  %2349 = vmatmul.mubr.msk.f32.gmra.mrb[62].mxu0 %vm173_vm0, %v72_v13  ;;  %v97_v12 = vld [vmem:[%s5296_s1 + $0x1c0] sm:$0xff] }
  0x89   :  { %1222 = vmatprep.mubr.f32.mxu1 %v2502_v7  ;;  %826 = vmatprep.mubr.f32.mxu0 %v2502_v7 }
  0x8c   :  { %2416 = vmatmul.mubr.msk.f32.gmra.mrb[64].mxu1 %vm173_vm0, %v139_v14  ;;  %2350 = vmatmul.mubr.msk.f32.gmra.mrb[64].mxu0 %vm173_vm0, %v73_v15 }
  0x8d   :  { %1228 = vmatprep.mubr.f32.mxu1 %v2502_v7  ;;  %832 = vmatprep.mubr.f32.mxu0 %v2502_v7 }
  0x90   :  { %2417 = vmatmul.mubr.msk.f32.gmra.mrb[66].mxu1 %vm173_vm0, %v140_v16  ;;  %2351 = vmatmul.mubr.msk.f32.gmra.mrb[66].mxu0 %vm173_vm0, %v74_v17  ;;  %v164_v17 = vld [vmem:[%s5296_s1 + $0x3d8] sm:$0xff] }
  0x91   :  { %1234 = vmatprep.mubr.f32.mxu1 %v2502_v7  ;;  %838 = vmatprep.mubr.f32.mxu0 %v2502_v7 }
  0x94   :  { %2418 = vmatmul.mubr.msk.f32.gmra.mrb[68].mxu1 %vm173_vm0, %v141_v18  ;;  %2352 = vmatmul.mubr.msk.f32.gmra.mrb[68].mxu0 %vm173_vm0, %v75_v19  ;;  %v98_v18 = vld [vmem:[%s5296_s1 + $0x1c8] sm:$0xff] }
  0x95   :  { %1240 = vmatprep.mubr.f32.mxu1 %v2502_v7  ;;  %844 = vmatprep.mubr.f32.mxu0 %v2502_v7 }
  0x98   :  { %2419 = vmatmul.mubr.msk.f32.gmra.mrb[70].mxu1 %vm173_vm0, %v142_v20  ;;  %2353 = vmatmul.mubr.msk.f32.gmra.mrb[70].mxu0 %vm173_vm0, %v76_v21 }
  0x99   :  { %1246 = vmatprep.mubr.f32.mxu1 %v2502_v7  ;;  %850 = vmatprep.mubr.f32.mxu0 %v2502_v7 }
  0x9c   :  { %2420 = vmatmul.mubr.msk.f32.gmra.mrb[72].mxu1 %vm173_vm0, %v143_v22  ;;  %2354 = vmatmul.mubr.msk.f32.gmra.mrb[72].mxu0 %vm173_vm0, %v77_v23  ;;  %v165_v23 = vld [vmem:[%s5296_s1 + $0x3e0] sm:$0xff] }
  0x9d   :  { %1252 = vmatprep.mubr.f32.mxu1 %v2502_v7  ;;  %856 = vmatprep.mubr.f32.mxu0 %v2502_v7 }
  0xa0   :  { %2421 = vmatmul.mubr.msk.f32.gmra.mrb[74].mxu1 %vm173_vm0, %v144_v24  ;;  %2355 = vmatmul.mubr.msk.f32.gmra.mrb[74].mxu0 %vm173_vm0, %v78_v25  ;;  %v99_v24 = vld [vmem:[%s5296_s1 + $0x1d0] sm:$0xff] }
  0xa1   :  { %1258 = vmatprep.mubr.f32.mxu1 %v2502_v7  ;;  %862 = vmatprep.mubr.f32.mxu0 %v2502_v7 }
  0xa4   :  { %2422 = vmatmul.mubr.msk.f32.gmra.mrb[76].mxu1 %vm173_vm0, %v145_v26  ;;  %2356 = vmatmul.mubr.msk.f32.gmra.mrb[76].mxu0 %vm173_vm0, %v79_v27 }
  0xa5   :  { %1264 = vmatprep.mubr.f32.mxu1 %v2502_v7  ;;  %868 = vmatprep.mubr.f32.mxu0 %v2502_v7 }
  0xa8   :  { %2423 = vmatmul.mubr.msk.f32.gmra.mrb[78].mxu1 %vm173_vm0, %v146_v28  ;;  %2357 = vmatmul.mubr.msk.f32.gmra.mrb[78].mxu0 %vm173_vm0, %v80_v29  ;;  %v166_v29 = vld [vmem:[%s5296_s1 + $0x3e8] sm:$0xff] }
  0xa9   :  { %1270 = vmatprep.mubr.f32.mxu1 %v2502_v7  ;;  %874 = vmatprep.mubr.f32.mxu0 %v2502_v7 }
  0xac   :  { %2424 = vmatmul.mubr.msk.f32.gmra.mrb[80].mxu1 %vm173_vm0, %v147_v30  ;;  %2358 = vmatmul.mubr.msk.f32.gmra.mrb[80].mxu0 %vm173_vm0, %v81_v31  ;;  %v100_v30 = vld [vmem:[%s5296_s1 + $0x1d8] sm:$0xff] }
  0xad   :  { %1276 = vmatprep.mubr.f32.mxu1 %v2502_v7  ;;  %880 = vmatprep.mubr.f32.mxu0 %v2502_v7 }
  0xb0   :  { %2425 = vmatmul.mubr.msk.f32.gmra.mrb[82].mxu1 %vm173_vm0, %v148_v32  ;;  %2359 = vmatmul.mubr.msk.f32.gmra.mrb[82].mxu0 %vm173_vm0, %v82_v33 }
  0xb1   :  { %1282 = vmatprep.mubr.f32.mxu1 %v2502_v7  ;;  %886 = vmatprep.mubr.f32.mxu0 %v2502_v7 }
  0xb4   :  { %2426 = vmatmul.mubr.msk.f32.gmra.mrb[84].mxu1 %vm173_vm0, %v149_v34  ;;  %2360 = vmatmul.mubr.msk.f32.gmra.mrb[84].mxu0 %vm173_vm0, %v83_v35  ;;  %v167_v35 = vld [vmem:[%s5296_s1 + $0x3f0] sm:$0xff] }
  0xb5   :  { %1288 = vmatprep.mubr.f32.mxu1 %v2502_v7  ;;  %892 = vmatprep.mubr.f32.mxu0 %v2502_v7 }
  0xb8   :  { %2427 = vmatmul.mubr.msk.f32.gmra.mrb[86].mxu1 %vm173_vm0, %v150_v36  ;;  %2361 = vmatmul.mubr.msk.f32.gmra.mrb[86].mxu0 %vm173_vm0, %v84_v37  ;;  %v101_v36 = vld [vmem:[%s5296_s1 + $0x1e0] sm:$0xff] }
  0xb9   :  { %1294 = vmatprep.mubr.f32.mxu1 %v2502_v7  ;;  %898 = vmatprep.mubr.f32.mxu0 %v2502_v7 }
  0xbc   :  { %2428 = vmatmul.mubr.msk.f32.gmra.mrb[88].mxu1 %vm173_vm0, %v151_v38  ;;  %2362 = vmatmul.mubr.msk.f32.gmra.mrb[88].mxu0 %vm173_vm0, %v85_v39 }
  0xbd   :  { %1300 = vmatprep.mubr.f32.mxu1 %v2502_v7  ;;  %904 = vmatprep.mubr.f32.mxu0 %v2502_v7 }
  0xc0   :  { %2429 = vmatmul.mubr.msk.f32.gmra.mrb[90].mxu1 %vm173_vm0, %v152_v40  ;;  %2363 = vmatmul.mubr.msk.f32.gmra.mrb[90].mxu0 %vm173_vm0, %v86_v41  ;;  %v168_v41 = vld [vmem:[%s5296_s1 + $0x3f8] sm:$0xff] }
  0xc1   :  { %1306 = vmatprep.mubr.f32.mxu1 %v2502_v7  ;;  %910 = vmatprep.mubr.f32.mxu0 %v2502_v7 }
  0xc4   :  { %2430 = vmatmul.mubr.msk.f32.gmra.mrb[92].mxu1 %vm173_vm0, %v153_v42  ;;  %2364 = vmatmul.mubr.msk.f32.gmra.mrb[92].mxu0 %vm173_vm0, %v87_v43  ;;  %v102_v42 = vld [vmem:[%s5296_s1 + $0x1e8] sm:$0xff] }
  0xc5   :  { %1312 = vmatprep.mubr.f32.mxu1 %v2502_v7  ;;  %916 = vmatprep.mubr.f32.mxu0 %v2502_v7 }
  0xc8   :  { %2431 = vmatmul.mubr.msk.f32.gmra.mrb[94].mxu1 %vm173_vm0, %v154_v44  ;;  %2365 = vmatmul.mubr.msk.f32.gmra.mrb[94].mxu0 %vm173_vm0, %v88_v45 }
  0xc9   :  { %1318 = vmatprep.mubr.f32.mxu1 %v2502_v7  ;;  %922 = vmatprep.mubr.f32.mxu0 %v2502_v7 }
  0xcc   :  { %2432 = vmatmul.mubr.msk.f32.gmra.mrb[96].mxu1 %vm173_vm0, %v155_v46  ;;  %2366 = vmatmul.mubr.msk.f32.gmra.mrb[96].mxu0 %vm173_vm0, %v89_v47  ;;  %v169_v47 = vld [vmem:[%s5296_s1 + $0x400] sm:$0xff] }
  0xcd   :  { %1324 = vmatprep.mubr.f32.mxu1 %v2502_v7  ;;  %928 = vmatprep.mubr.f32.mxu0 %v2502_v7 }
  0xd0   :  { %2433 = vmatmul.mubr.msk.f32.gmra.mrb[98].mxu1 %vm173_vm0, %v156_v48  ;;  %2367 = vmatmul.mubr.msk.f32.gmra.mrb[98].mxu0 %vm173_vm0, %v90_v49  ;;  %v103_v48 = vld [vmem:[%s5296_s1 + $0x1f0] sm:$0xff] }
  0xd1   :  { %1330 = vmatprep.mubr.f32.mxu1 %v2502_v7  ;;  %934 = vmatprep.mubr.f32.mxu0 %v2502_v7 }
  0xd4   :  { %2434 = vmatmul.mubr.msk.f32.gmra.mrb[100].mxu1 %vm173_vm0, %v157_v50  ;;  %2368 = vmatmul.mubr.msk.f32.gmra.mrb[100].mxu0 %vm173_vm0, %v91_v51 }
  0xd5   :  { %1336 = vmatprep.mubr.f32.mxu1 %v2502_v7  ;;  %940 = vmatprep.mubr.f32.mxu0 %v2502_v7 }
  0xd8   :  { %2435 = vmatmul.mubr.msk.f32.gmra.mrb[102].mxu1 %vm173_vm0, %v158_v52  ;;  %2369 = vmatmul.mubr.msk.f32.gmra.mrb[102].mxu0 %vm173_vm0, %v92_v53  ;;  %v170_v53 = vld [vmem:[%s5296_s1 + $0x408] sm:$0xff] }
  0xd9   :  { %1342 = vmatprep.mubr.f32.mxu1 %v2502_v7  ;;  %946 = vmatprep.mubr.f32.mxu0 %v2502_v7 }
  0xdc   :  { %2436 = vmatmul.mubr.msk.f32.gmra.mrb[104].mxu1 %vm173_vm0, %v159_v54  ;;  %2370 = vmatmul.mubr.msk.f32.gmra.mrb[104].mxu0 %vm173_vm0, %v93_v55  ;;  %v104_v54 = vld [vmem:[%s5296_s1 + $0x1f8] sm:$0xff] }
  0xdd   :  { %1348 = vmatprep.mubr.f32.mxu1 %v2502_v7  ;;  %952 = vmatprep.mubr.f32.mxu0 %v2502_v7 }
  0xdf   :  { %v3088_v58 = vpop.f32.mrb[0].mxu1  ;;  %v3090_v59 = vpop.f32.mrb[0].mxu0 }
  0xe0   :  { %v3092_v60 = vpop.f32.mrb[1].mxu1  ;;  %2437 = vmatmul.mubr.msk.f32.gmra.mrb[106].mxu1 %vm173_vm0, %v160_v56  ;;  %2371 = vmatmul.mubr.msk.f32.gmra.mrb[106].mxu0 %vm173_vm0, %v94_v57  ;;  %v3096_v61 = vpop.f32.mrb[1].mxu0 }
  0xe1   :  { %1354 = vmatprep.mubr.f32.mxu1 %v2502_v7  ;;  %958 = vmatprep.mubr.f32.mxu0 %v2502_v7 }
  0xe3   :  { %v3106_v0 = vpop.f32.mrb[2].mxu1  ;;  %v3108_v1 = vpop.f32.mrb[2].mxu0 }
  0xe4   :  { %v3110_v2 = vpop.f32.mrb[3].mxu1  ;;  %2438 = vmatmul.mubr.msk.f32.gmra.mrb[108].mxu1 %vm173_vm0, %v161_v62  ;;  %2372 = vmatmul.mubr.msk.f32.gmra.mrb[108].mxu0 %vm173_vm0, %v95_v63  ;;  %v3114_v3 = vpop.f32.mrb[3].mxu0  ;;  %v171_v63 = vld [vmem:[%s5296_s1 + $0x410] sm:$0xff] }
  0xe5   :  { %1360 = vmatprep.mubr.f32.mxu1 %v2502_v7  ;;  %964 = vmatprep.mubr.f32.mxu0 %v2502_v7 }
  0xe7   :  { %v3124_v6 = vpop.f32.mrb[4].mxu1  ;;  %v3126_v8 = vpop.f32.mrb[4].mxu0 }
  0xe8   :  { %v3128_v9 = vpop.f32.mrb[5].mxu1  ;;  %2439 = vmatmul.mubr.msk.f32.gmra.mrb[110].mxu1 %vm173_vm0, %v162_v4  ;;  %2373 = vmatmul.mubr.msk.f32.gmra.mrb[110].mxu0 %vm173_vm0, %v96_v5  ;;  %v3132_v10 = vpop.f32.mrb[5].mxu0  ;;  %v105_v4 = vld [vmem:[%s5296_s1 + $0x200] sm:$0xff] }
  0xe9   :  { %1366 = vmatprep.mubr.f32.mxu1 %v2502_v7  ;;  %970 = vmatprep.mubr.f32.mxu0 %v2502_v7 }
  0xeb   :  { %v3142_v13 = vpop.f32.mrb[6].mxu1  ;;  %v3144_v14 = vpop.f32.mrb[6].mxu0 }
  0xec   :  { %v3146_v15 = vpop.f32.mrb[7].mxu1  ;;  %2440 = vmatmul.mubr.msk.f32.gmra.mrb[112].mxu1 %vm173_vm0, %v163_v11  ;;  %2374 = vmatmul.mubr.msk.f32.gmra.mrb[112].mxu0 %vm173_vm0, %v97_v12  ;;  %v3150_v16 = vpop.f32.mrb[7].mxu0 }
  0xed   :  { %1372 = vmatprep.mubr.f32.mxu1 %v2502_v7  ;;  %976 = vmatprep.mubr.f32.mxu0 %v2502_v7 }
  0xef   :  { %v3160_v19 = vpop.f32.mrb[8].mxu1  ;;  %v3162_v20 = vpop.f32.mrb[8].mxu0 }
  0xf0   :  { %v3164_v21 = vpop.f32.mrb[9].mxu1  ;;  %2441 = vmatmul.mubr.msk.f32.gmra.mrb[114].mxu1 %vm173_vm0, %v164_v17  ;;  %2375 = vmatmul.mubr.msk.f32.gmra.mrb[114].mxu0 %vm173_vm0, %v98_v18  ;;  %v3168_v22 = vpop.f32.mrb[9].mxu0  ;;  %v172_v18 = vld [vmem:[%s5296_s1 + $0x418] sm:$0xff] }
  0xf1   :  { %1378 = vmatprep.mubr.f32.mxu1 %v2502_v7  ;;  %982 = vmatprep.mubr.f32.mxu0 %v2502_v7 }
  0xf3   :  { %v3178_v25 = vpop.f32.mrb[10].mxu1  ;;  %v3180_v26 = vpop.f32.mrb[10].mxu0 }
  0xf4   :  { %v3182_v27 = vpop.f32.mrb[11].mxu1  ;;  %2442 = vmatmul.mubr.msk.f32.gmra.mrb[116].mxu1 %vm173_vm0, %v165_v23  ;;  %2376 = vmatmul.mubr.msk.f32.gmra.mrb[116].mxu0 %vm173_vm0, %v99_v24  ;;  %v3186_v28 = vpop.f32.mrb[11].mxu0  ;;  %v106_v23 = vld [vmem:[%s5296_s1 + $0x208] sm:$0xff] }
  0xf5   :  { %1384 = vmatprep.mubr.f32.mxu1 %v2502_v7  ;;  %988 = vmatprep.mubr.f32.mxu0 %v2502_v7 }
  0xf7   :  { %v3196_v31 = vpop.f32.mrb[12].mxu1  ;;  %v3198_v32 = vpop.f32.mrb[12].mxu0 }
  0xf8   :  { %v3200_v33 = vpop.f32.mrb[13].mxu1  ;;  %2443 = vmatmul.mubr.msk.f32.gmra.mrb[118].mxu1 %vm173_vm0, %v166_v29  ;;  %2377 = vmatmul.mubr.msk.f32.gmra.mrb[118].mxu0 %vm173_vm0, %v100_v30  ;;  %v3204_v34 = vpop.f32.mrb[13].mxu0 }
  0xf9   :  { %1390 = vmatprep.mubr.f32.mxu1 %v2502_v7  ;;  %994 = vmatprep.mubr.f32.mxu0 %v2502_v7 }
  0xfb   :  { %v3214_v37 = vpop.f32.mrb[14].mxu1  ;;  %v3216_v38 = vpop.f32.mrb[14].mxu0 }
  0xfc   :  { %v3218_v39 = vpop.f32.mrb[15].mxu1  ;;  %2444 = vmatmul.mubr.msk.f32.gmra.mrb[120].mxu1 %vm173_vm0, %v167_v35  ;;  %2378 = vmatmul.mubr.msk.f32.gmra.mrb[120].mxu0 %vm173_vm0, %v101_v36  ;;  %v3222_v40 = vpop.f32.mrb[15].mxu0 }
  0xfd   :  { %1396 = vmatprep.mubr.f32.mxu1 %v2502_v7  ;;  %1000 = vmatprep.mubr.f32.mxu0 %v2502_v7 }
  0xff   :  { %v3232_v43 = vpop.f32.mrb[16].mxu1  ;;  %v3234_v44 = vpop.f32.mrb[16].mxu0 }
 0x100   :  { %5335 = vst [vmem:[#allocation5_spill] sm:$0xff] %v3234_v44  ;;  %v3236_v45 = vpop.f32.mrb[17].mxu1  ;;  %2445 = vmatmul.mubr.msk.f32.gmra.mrb[122].mxu1 %vm173_vm0, %v168_v41  ;;  %2379 = vmatmul.mubr.msk.f32.gmra.mrb[122].mxu0 %vm173_vm0, %v102_v42  ;;  %v3240_v46 = vpop.f32.mrb[17].mxu0 }
 0x101   :  { %5336 = vst [vmem:[#allocation6_spill] sm:$0xff] %v3240_v46  ;;  %1402 = vmatprep.mubr.f32.mxu1 %v2502_v7  ;;  %1006 = vmatprep.mubr.f32.mxu0 %v2502_v7 }
 0x103   :  { %v3250_v49 = vpop.f32.mrb[18].mxu1  ;;  %v3252_v50 = vpop.f32.mrb[18].mxu0 }
 0x104   :  { %5337 = vst [vmem:[#allocation7_spill] sm:$0xff] %v3250_v49  ;;  %5338 = vst [vmem:[#allocation8_spill] sm:$0xff] %v3252_v50  ;;  %v3254_v51 = vpop.f32.mrb[19].mxu1  ;;  %2446 = vmatmul.mubr.msk.f32.gmra.mrb[124].mxu1 %vm173_vm0, %v169_v47  ;;  %2380 = vmatmul.mubr.msk.f32.gmra.mrb[124].mxu0 %vm173_vm0, %v103_v48  ;;  %v3258_v52 = vpop.f32.mrb[19].mxu0  ;;  %v2503_v47 = vmov 0  }
 0x105   :  { %5339 = vst [vmem:[#allocation9_spill] sm:$0xff] %v3254_v51  ;;  %5340 = vst [vmem:[#allocation10_spill] sm:$0xff] %v3258_v52  ;;  %1408 = vmatprep.mubr.f32.mxu1 %v2502_v7  ;;  %1012 = vmatprep.mubr.f32.mxu0 %v2502_v7 }
 0x106   :  { %2468 = vset.pattern.permute.xlu0 %v2503_v47  ;;  %2469 = vset.pattern.permute.xlu1 %v2503_v47  ;;  %v2196_v47 = vld [vmem:[%s5297_s2 + $0x8] sm:$0xff] }
 0x107   :  { %v3268_v55 = vpop.f32.mrb[20].mxu1  ;;  %v3270_v56 = vpop.f32.mrb[20].mxu0 }
 0x108   :  { %5341 = vst [vmem:[#allocation11_spill] sm:$0xff] %v3268_v55  ;;  %5342 = vst [vmem:[#allocation12_spill] sm:$0xff] %v3270_v56  ;;  %v3272_v57 = vpop.f32.mrb[21].mxu1  ;;  %2447 = vmatmul.mubr.msk.f32.gmra.mrb[126].mxu1 %vm173_vm0, %v170_v53  ;;  %2381 = vmatmul.mubr.msk.f32.gmra.mrb[126].mxu0 %vm173_vm0, %v104_v54  ;;  %v3276_v62 = vpop.f32.mrb[21].mxu0  ;;  %v2195_v54 = vld [vmem:[%s5297_s2] sm:$0xff] }
 0x109   :  { %5343 = vst [vmem:[#allocation13_spill] sm:$0xff] %v3272_v57  ;;  %5344 = vst [vmem:[#allocation14_spill] sm:$0xff] %v3276_v62  ;;  %1414 = vmatprep.mubr.f32.mxu1 %v2502_v7  ;;  %1018 = vmatprep.mubr.f32.mxu0 %v2502_v7 }
 0x10a   :  { %2201 = vperm.xlu0 %2468, %v2195_v54  }
 0x10b   :  { %v3286_v5 = vpop.f32.mrb[22].mxu1  ;;  %v3288_v11 = vpop.f32.mrb[22].mxu0 }
 0x10c   :  { %5345 = vst [vmem:[#allocation15_spill] sm:$0xff] %v3286_v5  ;;  %5346 = vst [vmem:[#allocation16_spill] sm:$0xff] %v3288_v11  ;;  %v3290_v12 = vpop.f32.mrb[23].mxu1  ;;  %2448 = vmatmul.mubr.msk.f32.gmra.mrb[128].mxu1 %vm173_vm0, %v171_v63  ;;  %2382 = vmatmul.mubr.msk.f32.gmra.mrb[128].mxu0 %vm173_vm0, %v105_v4  ;;  %v3294_v17 = vpop.f32.mrb[23].mxu0 }
 0x10d   :  { %5347 = vst [vmem:[#allocation17_spill] sm:$0xff] %v3290_v12  ;;  %5348 = vst [vmem:[#allocation18_spill] sm:$0xff] %v3294_v17  ;;  %1420 = vmatprep.mubr.f32.mxu1 %v2502_v7  ;;  %1024 = vmatprep.mubr.f32.mxu0 %v2502_v7 }
 0x10e   :  { %2206 = vperm.xlu0 %2468, %v2196_v47  }
 0x10f   :  { %v3304_v24 = vpop.f32.mrb[24].mxu1  ;;  %v3306_v29 = vpop.f32.mrb[24].mxu0 }
 0x110   :  { %5349 = vst [vmem:[#allocation19_spill] sm:$0xff] %v3304_v24  ;;  %5350 = vst [vmem:[#allocation20_spill] sm:$0xff] %v3306_v29  ;;  %v3308_v30 = vpop.f32.mrb[25].mxu1  ;;  %2449 = vmatmul.mubr.msk.f32.gmra.mrb[130].mxu1 %vm173_vm0, %v172_v18  ;;  %2383 = vmatmul.mubr.msk.f32.gmra.mrb[130].mxu0 %vm173_vm0, %v106_v23  ;;  %v3312_v35 = vpop.f32.mrb[25].mxu0 }
 0x111   :  { %5351 = vst [vmem:[#allocation21_spill] sm:$0xff] %v3308_v30  ;;  %5352 = vst [vmem:[#allocation22_spill] sm:$0xff] %v3312_v35 }
 0x113   :  { %v3314_v36 = vpop.f32.mrb[26].mxu1  ;;  %v3316_v41 = vpop.f32.mrb[26].mxu0 }
 0x114   :  { %5353 = vst [vmem:[#allocation23_spill] sm:$0xff] %v3314_v36  ;;  %5354 = vst [vmem:[#allocation24_spill] sm:$0xff] %v3316_v41  ;;  %v3318_v7 = vpop.f32.mrb[27].mxu1  ;;  %v3320_v42 = vpop.f32.mrb[27].mxu0 }
 0x115   :  { %5355 = vst [vmem:[#allocation25_spill] sm:$0xff] %v3318_v7  ;;  %5356 = vst [vmem:[#allocation26_spill] sm:$0xff] %v3320_v42 }
 0x117   :  { %v3322_v48 = vpop.f32.mrb[28].mxu1  ;;  %v3324_v53 = vpop.f32.mrb[28].mxu0 }
 0x118   :  { %5357 = vst [vmem:[#allocation27_spill] sm:$0xff] %v3322_v48  ;;  %5358 = vst [vmem:[#allocation28_spill] sm:$0xff] %v3324_v53  ;;  %v3329_v63 = vpop.f32.mrb[29].mxu1  ;;  %v3331_v4 = vpop.f32.mrb[29].mxu0 }
 0x119   :  { %5359 = vst [vmem:[#allocation29_spill] sm:$0xff] %v3329_v63  ;;  %5360 = vst [vmem:[#allocation30_spill] sm:$0xff] %v3331_v4  ;;  %v2197_v63 = vld [vmem:[%s5297_s2 + $0x10] sm:$0xff] }
 0x11a   :  { %2211 = vperm.xlu1 %2469, %v2197_v63  }
 0x11b   :  { %v3333_v18 = vpop.f32.mrb[30].mxu1  ;;  %v3335_v23 = vpop.f32.mrb[30].mxu0 }
 0x11c   :  { %5361 = vst [vmem:[#allocation31_spill] sm:$0xff] %v3333_v18  ;;  %5362 = vst [vmem:[#allocation32_spill] sm:$0xff] %v3335_v23  ;;  %v3340_v48 = vpop.f32.mrb[31].mxu1  ;;  %v3342_v53 = vpop.f32.mrb[31].mxu0 }
 0x11d   :  { %5363 = vst [vmem:[#allocation33_spill] sm:$0xff] %v3340_v48  ;;  %5364 = vst [vmem:[#allocation34_spill] sm:$0xff] %v3342_v53  ;;  %v2198_v48 = vld [vmem:[%s5297_s2 + $0x18] sm:$0xff] }
 0x11e   :  { %2216 = vperm.xlu1 %2469, %v2198_v48  }
 0x11f   :  { %v3347_v4 = vpop.f32.mrb[32].mxu1  ;;  %v3349_v54 = vpop.f32.mrb[32].mxu0 }
 0x120   :  { %5365 = vst [vmem:[#allocation35_spill] sm:$0xff] %v3347_v4  ;;  %5366 = vst [vmem:[#allocation36_spill] sm:$0xff] %v3349_v54  ;;  %v3351_v18 = vpop.f32.mrb[33].mxu1  ;;  %v3353_v23 = vpop.f32.mrb[33].mxu0 }
 0x121   :  { %5367 = vst [vmem:[#allocation37_spill] sm:$0xff] %v3351_v18  ;;  %5368 = vst [vmem:[#allocation38_spill] sm:$0xff] %v3353_v23 }
 0x123   :  { %v3358_v53 = vpop.f32.mrb[34].mxu1  ;;  %v3360_v47 = vpop.f32.mrb[34].mxu0 }
 0x124   :  { %5369 = vst [vmem:[#allocation39_spill] sm:$0xff] %v3358_v53  ;;  %5370 = vst [vmem:[#allocation40_spill] sm:$0xff] %v3360_v47  ;;  %v3362_v42 = vpop.f32.mrb[35].mxu1  ;;  %v3364_v63 = vpop.f32.mrb[35].mxu0 }
 0x125   :  { %5371 = vst [vmem:[#allocation41_spill] sm:$0xff] %v3362_v42  ;;  %5372 = vst [vmem:[#allocation42_spill] sm:$0xff] %v3364_v63 }
 0x127   :  { %v3366_v4 = vpop.f32.mrb[36].mxu1  ;;  %v3368_v54 = vpop.f32.mrb[36].mxu0 }
 0x128   :  { %5373 = vst [vmem:[#allocation43_spill] sm:$0xff] %v3366_v4  ;;  %5374 = vst [vmem:[#allocation44_spill] sm:$0xff] %v3368_v54  ;;  %v3370_v18 = vpop.f32.mrb[37].mxu1  ;;  %v3372_v23 = vpop.f32.mrb[37].mxu0 }
 0x129   :  { %5375 = vst [vmem:[#allocation45_spill] sm:$0xff] %v3370_v18  ;;  %5376 = vst [vmem:[#allocation46_spill] sm:$0xff] %v3372_v23 }
 0x12b   :  { %v3374_v41 = vpop.f32.mrb[38].mxu1  ;;  %v3376_v7 = vpop.f32.mrb[38].mxu0 }
 0x12c   :  { %5377 = vst [vmem:[#allocation47_spill] sm:$0xff] %v3374_v41  ;;  %5378 = vst [vmem:[#allocation48_spill] sm:$0xff] %v3376_v7  ;;  %v3378_v48 = vpop.f32.mrb[39].mxu1  ;;  %v3380_v53 = vpop.f32.mrb[39].mxu0 }
 0x12d   :  { %5379 = vst [vmem:[#allocation49_spill] sm:$0xff] %v3378_v48  ;;  %5380 = vst [vmem:[#allocation50_spill] sm:$0xff] %v3380_v53 }
 0x12f   :  { %v3382_v47 = vpop.f32.mrb[40].mxu1  ;;  %v3384_v42 = vpop.f32.mrb[40].mxu0 }
 0x130   :  { %5381 = vst [vmem:[#allocation51_spill] sm:$0xff] %v3382_v47  ;;  %5382 = vst [vmem:[#allocation52_spill] sm:$0xff] %v3384_v42  ;;  %v3386_v63 = vpop.f32.mrb[41].mxu1  ;;  %v3388_v4 = vpop.f32.mrb[41].mxu0 }
 0x131   :  { %5383 = vst [vmem:[#allocation53_spill] sm:$0xff] %v3386_v63  ;;  %5384 = vst [vmem:[#allocation54_spill] sm:$0xff] %v3388_v4 }
 0x133   :  { %v3390_v54 = vpop.f32.mrb[42].mxu1  ;;  %v3392_v18 = vpop.f32.mrb[42].mxu0 }
 0x134   :  { %5385 = vst [vmem:[#allocation55_spill] sm:$0xff] %v3390_v54  ;;  %5386 = vst [vmem:[#allocation56_spill] sm:$0xff] %v3392_v18  ;;  %v3394_v23 = vpop.f32.mrb[43].mxu1  ;;  %v3396_v41 = vpop.f32.mrb[43].mxu0 }
 0x135   :  { %5387 = vst [vmem:[#allocation57_spill] sm:$0xff] %v3394_v23  ;;  %5388 = vst [vmem:[#allocation58_spill] sm:$0xff] %v3396_v41 }
 0x137   :  { %v3398_v7 = vpop.f32.mrb[44].mxu1  ;;  %v3400_v48 = vpop.f32.mrb[44].mxu0 }
 0x138   :  { %5389 = vst [vmem:[#allocation59_spill] sm:$0xff] %v3398_v7  ;;  %5390 = vst [vmem:[#allocation60_spill] sm:$0xff] %v3400_v48  ;;  %v3402_v53 = vpop.f32.mrb[45].mxu1  ;;  %v3404_v47 = vpop.f32.mrb[45].mxu0 }
 0x139   :  { %5391 = vst [vmem:[#allocation61_spill] sm:$0xff] %v3402_v53  ;;  %5392 = vst [vmem:[#allocation62_spill] sm:$0xff] %v3404_v47 }
 0x13b   :  { %v3406_v42 = vpop.f32.mrb[46].mxu1  ;;  %v3408_v63 = vpop.f32.mrb[46].mxu0 }
 0x13c   :  { %5393 = vst [vmem:[#allocation63_spill] sm:$0xff] %v3406_v42  ;;  %5394 = vst [vmem:[#allocation64_spill] sm:$0xff] %v3408_v63  ;;  %v3410_v4 = vpop.f32.mrb[47].mxu1  ;;  %v3412_v54 = vpop.f32.mrb[47].mxu0 }
 0x13d   :  { %5395 = vst [vmem:[#allocation65_spill] sm:$0xff] %v3410_v4  ;;  %5396 = vst [vmem:[#allocation66_spill] sm:$0xff] %v3412_v54 }
 0x13f   :  { %v3414_v18 = vpop.f32.mrb[48].mxu1  ;;  %v3416_v23 = vpop.f32.mrb[48].mxu0 }
 0x140   :  { %5397 = vst [vmem:[#allocation67_spill] sm:$0xff] %v3414_v18  ;;  %5398 = vst [vmem:[#allocation68_spill] sm:$0xff] %v3416_v23  ;;  %v3418_v41 = vpop.f32.mrb[49].mxu1  ;;  %v3420_v7 = vpop.f32.mrb[49].mxu0 }
 0x141   :  { %5399 = vst [vmem:[#allocation69_spill] sm:$0xff] %v3418_v41  ;;  %5400 = vst [vmem:[#allocation70_spill] sm:$0xff] %v3420_v7 }
 0x143   :  { %v3422_v48 = vpop.f32.mrb[50].mxu1  ;;  %v3424_v53 = vpop.f32.mrb[50].mxu0 }
 0x144   :  { %5401 = vst [vmem:[#allocation71_spill] sm:$0xff] %v3422_v48  ;;  %5402 = vst [vmem:[#allocation72_spill] sm:$0xff] %v3424_v53  ;;  %v3426_v47 = vpop.f32.mrb[51].mxu1  ;;  %v3428_v42 = vpop.f32.mrb[51].mxu0 }
 0x145   :  { %5403 = vst [vmem:[#allocation73_spill] sm:$0xff] %v3426_v47  ;;  %5404 = vst [vmem:[#allocation74_spill] sm:$0xff] %v3428_v42 }
 0x147   :  { %v3430_v63 = vpop.f32.mrb[52].mxu1  ;;  %v3432_v4 = vpop.f32.mrb[52].mxu0 }
 0x148   :  { %5405 = vst [vmem:[#allocation75_spill] sm:$0xff] %v3430_v63  ;;  %5406 = vst [vmem:[#allocation76_spill] sm:$0xff] %v3432_v4  ;;  %v3434_v54 = vpop.f32.mrb[53].mxu1  ;;  %v3436_v18 = vpop.f32.mrb[53].mxu0 }
 0x149   :  { %5407 = vst [vmem:[#allocation77_spill] sm:$0xff] %v3434_v54  ;;  %5408 = vst [vmem:[#allocation78_spill] sm:$0xff] %v3436_v18 }
 0x14b   :  { %v3438_v23 = vpop.f32.mrb[54].mxu1  ;;  %v3440_v41 = vpop.f32.mrb[54].mxu0 }
 0x14c   :  { %5409 = vst [vmem:[#allocation79_spill] sm:$0xff] %v3438_v23  ;;  %5410 = vst [vmem:[#allocation80_spill] sm:$0xff] %v3440_v41  ;;  %v3442_v7 = vpop.f32.mrb[55].mxu1  ;;  %v3444_v48 = vpop.f32.mrb[55].mxu0 }
 0x14d   :  { %5411 = vst [vmem:[#allocation81_spill] sm:$0xff] %v3442_v7  ;;  %5412 = vst [vmem:[#allocation82_spill] sm:$0xff] %v3444_v48 }
 0x14f   :  { %v3446_v53 = vpop.f32.mrb[56].mxu1  ;;  %v3448_v47 = vpop.f32.mrb[56].mxu0 }
 0x150   :  { %5413 = vst [vmem:[#allocation83_spill] sm:$0xff] %v3446_v53  ;;  %5414 = vst [vmem:[#allocation84_spill] sm:$0xff] %v3448_v47  ;;  %v3450_v42 = vpop.f32.mrb[57].mxu1  ;;  %v3452_v63 = vpop.f32.mrb[57].mxu0 }
 0x151   :  { %5415 = vst [vmem:[#allocation85_spill] sm:$0xff] %v3450_v42  ;;  %5416 = vst [vmem:[#allocation86_spill] sm:$0xff] %v3452_v63 }
 0x153   :  { %v3454_v4 = vpop.f32.mrb[58].mxu1  ;;  %v3456_v54 = vpop.f32.mrb[58].mxu0 }
 0x154   :  { %5417 = vst [vmem:[#allocation87_spill] sm:$0xff] %v3454_v4  ;;  %5418 = vst [vmem:[#allocation88_spill] sm:$0xff] %v3456_v54  ;;  %v3458_v18 = vpop.f32.mrb[59].mxu1  ;;  %v3460_v23 = vpop.f32.mrb[59].mxu0 }
 0x155   :  { %5419 = vst [vmem:[#allocation89_spill] sm:$0xff] %v3458_v18  ;;  %5420 = vst [vmem:[#allocation90_spill] sm:$0xff] %v3460_v23 }
 0x157   :  { %v3462_v41 = vpop.f32.mrb[60].mxu1  ;;  %v3464_v7 = vpop.f32.mrb[60].mxu0 }
 0x158   :  { %5421 = vst [vmem:[#allocation91_spill] sm:$0xff] %v3462_v41  ;;  %5422 = vst [vmem:[#allocation92_spill] sm:$0xff] %v3464_v7  ;;  %v3466_v48 = vpop.f32.mrb[61].mxu1  ;;  %v3468_v53 = vpop.f32.mrb[61].mxu0 }
 0x159   :  { %5423 = vst [vmem:[#allocation93_spill] sm:$0xff] %v3466_v48  ;;  %5424 = vst [vmem:[#allocation94_spill] sm:$0xff] %v3468_v53 }
 0x15b   :  { %v3470_v47 = vpop.f32.mrb[62].mxu1  ;;  %v3472_v42 = vpop.f32.mrb[62].mxu0 }
 0x15c   :  { %5425 = vst [vmem:[#allocation95_spill] sm:$0xff] %v3470_v47  ;;  %5426 = vst [vmem:[#allocation96_spill] sm:$0xff] %v3472_v42  ;;  %v3474_v63 = vpop.f32.mrb[63].mxu1  ;;  %v3476_v4 = vpop.f32.mrb[63].mxu0 }
 0x15d   :  { %5427 = vst [vmem:[#allocation97_spill] sm:$0xff] %v3474_v63  ;;  %5428 = vst [vmem:[#allocation98_spill] sm:$0xff] %v3476_v4 }
 0x15f   :  { %v3478_v54 = vpop.f32.mrb[64].mxu1  ;;  %v3480_v18 = vpop.f32.mrb[64].mxu0 }
 0x160   :  { %5429 = vst [vmem:[#allocation99_spill] sm:$0xff] %v3478_v54  ;;  %5430 = vst [vmem:[#allocation100_spill] sm:$0xff] %v3480_v18  ;;  %v3482_v23 = vpop.f32.mrb[65].mxu1  ;;  %v3484_v41 = vpop.f32.mrb[65].mxu0 }
 0x161   :  { %5431 = vst [vmem:[#allocation101_spill] sm:$0xff] %v3482_v23  ;;  %5432 = vst [vmem:[#allocation102_spill] sm:$0xff] %v3484_v41 }
 0x163   :  { %v3486_v7 = vpop.f32.mrb[66].mxu1  ;;  %v3488_v48 = vpop.f32.mrb[66].mxu0 }
 0x164   :  { %5433 = vst [vmem:[#allocation103_spill] sm:$0xff] %v3486_v7  ;;  %5434 = vst [vmem:[#allocation104_spill] sm:$0xff] %v3488_v48  ;;  %v3490_v53 = vpop.f32.mrb[67].mxu1  ;;  %v3492_v47 = vpop.f32.mrb[67].mxu0 }
 0x165   :  { %5435 = vst [vmem:[#allocation105_spill] sm:$0xff] %v3490_v53  ;;  %5436 = vst [vmem:[#allocation106_spill] sm:$0xff] %v3492_v47 }
 0x167   :  { %v3494_v42 = vpop.f32.mrb[68].mxu1  ;;  %v3496_v63 = vpop.f32.mrb[68].mxu0 }
 0x168   :  { %5437 = vst [vmem:[#allocation107_spill] sm:$0xff] %v3494_v42  ;;  %5438 = vst [vmem:[#allocation108_spill] sm:$0xff] %v3496_v63  ;;  %v3498_v4 = vpop.f32.mrb[69].mxu1  ;;  %v3500_v54 = vpop.f32.mrb[69].mxu0 }
 0x169   :  { %5439 = vst [vmem:[#allocation109_spill] sm:$0xff] %v3498_v4  ;;  %5440 = vst [vmem:[#allocation110_spill] sm:$0xff] %v3500_v54 }
 0x16b   :  { %v3502_v18 = vpop.f32.mrb[70].mxu1  ;;  %v3504_v23 = vpop.f32.mrb[70].mxu0 }
 0x16c   :  { %5441 = vst [vmem:[#allocation111_spill] sm:$0xff] %v3502_v18  ;;  %5442 = vst [vmem:[#allocation112_spill] sm:$0xff] %v3504_v23  ;;  %v3506_v41 = vpop.f32.mrb[71].mxu1  ;;  %v3508_v7 = vpop.f32.mrb[71].mxu0 }
 0x16d   :  { %5443 = vst [vmem:[#allocation113_spill] sm:$0xff] %v3506_v41  ;;  %5444 = vst [vmem:[#allocation114_spill] sm:$0xff] %v3508_v7 }
 0x16f   :  { %v3510_v48 = vpop.f32.mrb[72].mxu1  ;;  %v3512_v53 = vpop.f32.mrb[72].mxu0 }
 0x170   :  { %5445 = vst [vmem:[#allocation115_spill] sm:$0xff] %v3510_v48  ;;  %5446 = vst [vmem:[#allocation116_spill] sm:$0xff] %v3512_v53  ;;  %v3514_v47 = vpop.f32.mrb[73].mxu1  ;;  %v3516_v42 = vpop.f32.mrb[73].mxu0 }
 0x171   :  { %5447 = vst [vmem:[#allocation117_spill] sm:$0xff] %v3514_v47  ;;  %5448 = vst [vmem:[#allocation118_spill] sm:$0xff] %v3516_v42 }
 0x173   :  { %v3518_v63 = vpop.f32.mrb[74].mxu1  ;;  %v3520_v4 = vpop.f32.mrb[74].mxu0 }
 0x174   :  { %5449 = vst [vmem:[#allocation119_spill] sm:$0xff] %v3518_v63  ;;  %5450 = vst [vmem:[#allocation120_spill] sm:$0xff] %v3520_v4  ;;  %v3522_v54 = vpop.f32.mrb[75].mxu1  ;;  %v3524_v18 = vpop.f32.mrb[75].mxu0 }
 0x175   :  { %5451 = vst [vmem:[#allocation121_spill] sm:$0xff] %v3522_v54  ;;  %5452 = vst [vmem:[#allocation122_spill] sm:$0xff] %v3524_v18 }
 0x177   :  { %v3526_v23 = vpop.f32.mrb[76].mxu1  ;;  %v3528_v41 = vpop.f32.mrb[76].mxu0 }
 0x178   :  { %5453 = vst [vmem:[#allocation123_spill] sm:$0xff] %v3526_v23  ;;  %5454 = vst [vmem:[#allocation124_spill] sm:$0xff] %v3528_v41  ;;  %v3530_v7 = vpop.f32.mrb[77].mxu1  ;;  %v3532_v48 = vpop.f32.mrb[77].mxu0  ;;  %v5299_v41 = vlaneseq }
 0x179   :  { %5455 = vst [vmem:[#allocation125_spill] sm:$0xff] %v3530_v7  ;;  %5456 = vst [vmem:[#allocation126_spill] sm:$0xff] %v3532_v48 }
 0x17b   :  { %v3534_v53 = vpop.f32.mrb[78].mxu1  ;;  %v3536_v47 = vpop.f32.mrb[78].mxu0 }
 0x17c   :  { %5457 = vst [vmem:[#allocation127_spill] sm:$0xff] %v3534_v53  ;;  %5458 = vst [vmem:[#allocation128_spill] sm:$0xff] %v3536_v47  ;;  %v3538_v42 = vpop.f32.mrb[79].mxu1  ;;  %v3540_v63 = vpop.f32.mrb[79].mxu0 }
 0x17d   :  { %5459 = vst [vmem:[#allocation129_spill] sm:$0xff] %v3538_v42  ;;  %5460 = vst [vmem:[#allocation130_spill] sm:$0xff] %v3540_v63  ;;  %v3559_v42 = vshrl.u32 %v5299_v41, 7  ;;  %v19_v41 = vld [vmem:[%s5295_s0 + $0x20] sm:$0xff] }
 0x17f   :  { %v3542_v4 = vpop.f32.mrb[80].mxu1  ;;  %v3544_v54 = vpop.f32.mrb[80].mxu0  ;;  %5469 = vst [vmem:[#allocation139_spill] sm:$0xff] %v3559_v42  ;;  %v3615_v35 = vsub.s32 4, %v3559_v42  ;;  %v3631_v12 = vsub.s32 5, %v3559_v42  ;;  %v3645_v56 = vsub.s32 6, %v3559_v42 }
 0x180   :  { %5461 = vst [vmem:[#allocation131_spill] sm:$0xff] %v3542_v4  ;;  %5462 = vst [vmem:[#allocation132_spill] sm:$0xff] %v3544_v54  ;;  %v3546_v18 = vpop.f32.mrb[81].mxu1  ;;  %v3548_v23 = vpop.f32.mrb[81].mxu0  ;;  %v3659_v52 = vsub.s32 7, %v3559_v42 }
 0x181   :  { %5463 = vst [vmem:[#allocation133_spill] sm:$0xff] %v3546_v18  ;;  %5464 = vst [vmem:[#allocation134_spill] sm:$0xff] %v3548_v23  ;;  %v3570_v23 = vsub.s32 0, %v3559_v42  ;;  %v3662_v50 = vrot.slane %v19_v41, %v3615_v35 }
 0x182   :  { %5486 = vst [vmem:[#allocation156_spill] sm:$0xff] %v3645_v56  ;;  %v3722_v44 = vrot.slane %v19_v41, %v3659_v52 }
 0x183   :  { %v3550_v7 = vpop.f32.mrb[82].mxu1  ;;  %v3552_v48 = vpop.f32.mrb[82].mxu0  ;;  %v3606_v36 = vrot.slane %v19_v41, %v3570_v23  ;;  %5488 = vst [vmem:[#allocation158_spill] sm:$0xff] %v3662_v50 }
 0x184   :  { %5465 = vst [vmem:[#allocation135_spill] sm:$0xff] %v3550_v7  ;;  %5466 = vst [vmem:[#allocation136_spill] sm:$0xff] %v3552_v48  ;;  %v3554_v53 = vpop.f32.mrb[83].mxu1  ;;  %v3556_v47 = vpop.f32.mrb[83].mxu0  ;;  %v3573_v48 = vsub.s32 1, %v3559_v42  ;;  %v3593_v7 = vsub.s32 3, %v3559_v42 }
 0x185   :  { %5467 = vst [vmem:[#allocation137_spill] sm:$0xff] %v3554_v53  ;;  %5468 = vst [vmem:[#allocation138_spill] sm:$0xff] %v3556_v47 }
 0x186   :  { %5478 = vst [vmem:[#allocation148_spill] sm:$0xff] %v3593_v7  ;;  %5479 = vst [vmem:[#allocation149_spill] sm:$0xff] %v3606_v36  ;;  %v3642_v57 = vrot.slane %v19_v41, %v3593_v7 }
 0x187   :  { %v3561_v63 = vpop.f32.mrb[84].mxu1  ;;  %v3563_v4 = vpop.f32.mrb[84].mxu0  ;;  %5503 = vst [vmem:[#allocation173_spill] sm:$0xff] %v3722_v44 }
 0x188   :  { %5470 = vst [vmem:[#allocation140_spill] sm:$0xff] %v3561_v63  ;;  %5471 = vst [vmem:[#allocation141_spill] sm:$0xff] %v3563_v4  ;;  %v3565_v54 = vpop.f32.mrb[85].mxu1  ;;  %v3567_v18 = vpop.f32.mrb[85].mxu0  ;;  %v20_v4 = vld [vmem:[%s5295_s0 + $0x28] sm:$0xff] }
 0x189   :  { %5472 = vst [vmem:[#allocation142_spill] sm:$0xff] %v3565_v54  ;;  %5473 = vst [vmem:[#allocation143_spill] sm:$0xff] %v3567_v18  ;;  %v3586_v18 = vsub.s32 2, %v3559_v42  ;;  %v3622_v24 = vrot.slane %v20_v4, %v3573_v48  ;;  %v3669_v51 = vrot.slane %v20_v4, %v3615_v35  ;;  %v3680_v42 = vrot.slane %v19_v41, %v3631_v12 }
 0x18a   :  { %5485 = vst [vmem:[#allocation155_spill] sm:$0xff] %v3642_v57 }
 0x18b   :  { %v3575_v53 = vpop.f32.mrb[86].mxu1  ;;  %v3577_v47 = vpop.f32.mrb[86].mxu0  ;;  %v3625_v17 = vrot.slane %v19_v41, %v3586_v18  ;;  %v3628_v11 = vrot.slane %v20_v4, %v3586_v18  ;;  %5490 = vst [vmem:[#allocation160_spill] sm:$0xff] %v3669_v51  ;;  %5494 = vst [vmem:[#allocation164_spill] sm:$0xff] %v3680_v42 }
 0x18c   :  { %5474 = vst [vmem:[#allocation144_spill] sm:$0xff] %v3575_v53  ;;  %5475 = vst [vmem:[#allocation145_spill] sm:$0xff] %v3577_v47  ;;  %v3588_v54 = vpop.f32.mrb[87].mxu1  ;;  %v3590_v63 = vpop.f32.mrb[87].mxu0  ;;  %v3598_v47 = vld [vmem:[%s5295_s0] sm:$0xff]  ;;  %v3603_v53 = vld [vmem:[%s5295_s0 + $0x8] sm:$0xff] }
 0x18d   :  { %5476 = vst [vmem:[#allocation146_spill] sm:$0xff] %v3588_v54  ;;  %5477 = vst [vmem:[#allocation147_spill] sm:$0xff] %v3590_v63  ;;  %v3609_v54 = vrot.slane %v20_v4, %v3570_v23  ;;  %v3612_v63 = vrot.slane %v19_v41, %v3573_v48  ;;  %v3649_v55 = vrot.slane %v3598_v47, %v3573_v48 }
 0x18e   :  { %v3666_v57 = vrot.slane %v3598_v47, %v3586_v18  ;;  %v3684_v50 = vrot.slane %v3598_v47, %v3593_v7  ;;  %v3691_v51 = vrot.slane %v3603_v53, %v3593_v7 }
 0x18f   :  { %5480 = vst [vmem:[#allocation150_spill] sm:$0xff] %v3609_v54  ;;  %v3617_v29 = vpop.f32.mrb[88].mxu1  ;;  %v3619_v30 = vpop.f32.mrb[88].mxu0 }
 0x190   :  { %5481 = vst [vmem:[#allocation151_spill] sm:$0xff] %v3617_v29  ;;  %5482 = vst [vmem:[#allocation152_spill] sm:$0xff] %v3619_v30  ;;  %v3633_v5 = vpop.f32.mrb[89].mxu1  ;;  %v3635_v62 = vpop.f32.mrb[89].mxu0  ;;  %v1430_v29 = vrot.slane %v3598_v47, %v3570_v23  ;;  %v1434_v30 = vrot.slane %v3603_v53, %v3570_v23 }
 0x191   :  { %5483 = vst [vmem:[#allocation153_spill] sm:$0xff] %v3633_v5  ;;  %5484 = vst [vmem:[#allocation154_spill] sm:$0xff] %v3635_v62  ;;  %v3652_v5 = vrot.slane %v20_v4, %v3593_v7  ;;  %v3656_v62 = vrot.slane %v3603_v53, %v3573_v48  ;;  %v3715_v7 = vrot.slane %v20_v4, %v3645_v56 }
 0x192   :  { %5489 = vst [vmem:[#allocation159_spill] sm:$0xff] %v3666_v57  ;;  %5495 = vst [vmem:[#allocation165_spill] sm:$0xff] %v3684_v50  ;;  %v3687_v57 = vrot.slane %v20_v4, %v3631_v12 }
 0x193   :  { %5487 = vst [vmem:[#allocation157_spill] sm:$0xff] %v3652_v5  ;;  %v3673_v5 = vrot.slane %v3603_v53, %v3586_v18  ;;  %v3675_v49 = vpop.f32.mrb[90].mxu1  ;;  %v3677_v46 = vpop.f32.mrb[90].mxu0  ;;  %5497 = vst [vmem:[#allocation167_spill] sm:$0xff] %v3691_v51  ;;  %v3712_v51 = vrot.slane %v3598_v47, %v3615_v35 }
 0x194   :  { %5492 = vst [vmem:[#allocation162_spill] sm:$0xff] %v3675_v49  ;;  %5493 = vst [vmem:[#allocation163_spill] sm:$0xff] %v3677_v46  ;;  %v3696_v49 = vld [vmem:[%s5295_s0 + $0x30] sm:$0xff]  ;;  %v3701_v46 = vld [vmem:[%s5295_s0 + $0x38] sm:$0xff]  ;;  %v3703_v42 = vpop.f32.mrb[91].mxu1  ;;  %v3705_v50 = vpop.f32.mrb[91].mxu0 }
 0x195   :  { %5491 = vst [vmem:[#allocation161_spill] sm:$0xff] %v3673_v5  ;;  %5496 = vst [vmem:[#allocation166_spill] sm:$0xff] %v3687_v57  ;;  %v3708_v57 = vrot.slane %v19_v41, %v3645_v56  ;;  %v3719_v5 = vrot.slane %v3603_v53, %v3615_v35  ;;  %v3745_v41 = vrot.slane %v3701_v46, %v3570_v23 }
 0x196   :  { %5498 = vst [vmem:[#allocation168_spill] sm:$0xff] %v3703_v42  ;;  %5499 = vst [vmem:[#allocation169_spill] sm:$0xff] %v3705_v50  ;;  %v3726_v50 = vrot.slane %v3598_v47, %v3631_v12  ;;  %v3729_v42 = vrot.slane %v20_v4, %v3659_v52  ;;  %v3749_v4 = vrot.slane %v3603_v53, %v3645_v56 }
 0x197   :  { %5500 = vst [vmem:[#allocation170_spill] sm:$0xff] %v3708_v57  ;;  %5501 = vst [vmem:[#allocation171_spill] sm:$0xff] %v3715_v7  ;;  %v3733_v57 = vrot.slane %v3603_v53, %v3631_v12  ;;  %v3737_v7 = vrot.slane %v3696_v49, %v3570_v23  ;;  %v3753_v44 = vpop.f32.mrb[92].mxu0 }
 0x198   :  { %5502 = vst [vmem:[#allocation172_spill] sm:$0xff] %v3719_v5  ;;  %5504 = vst [vmem:[#allocation174_spill] sm:$0xff] %v3729_v42  ;;  %v3741_v5 = vrot.slane %v3598_v47, %v3645_v56  ;;  %v3751_v42 = vpop.f32.mrb[92].mxu1 }
 0x199   :  { %5505 = vst [vmem:[#allocation175_spill] sm:$0xff] %v3733_v57  ;;  %5506 = vst [vmem:[#allocation176_spill] sm:$0xff] %v3737_v7  ;;  %v3757_v57 = vmul.f32 %v3606_v36, %v3088_v58  ;;  %v3761_v7 = vmul.f32 %v3609_v54, %v3092_v60  ;;  %v3769_v56 = vpop.f32.mrb[93].mxu1  ;;  %v3779_v58 = vmul.f32 %v3609_v54, %v3110_v2 }
 0x19a   :  { %5507 = vst [vmem:[#allocation177_spill] sm:$0xff] %v3741_v5  ;;  %5508 = vst [vmem:[#allocation178_spill] sm:$0xff] %v3745_v41  ;;  %v3764_v5 = vmul.f32 %v1430_v29, %v3090_v59  ;;  %v3767_v41 = vmul.f32 %v1434_v30, %v3096_v61  ;;  %v3782_v60 = vmul.f32 %v1430_v29, %v3108_v1 }
 0x19b   :  { %5509 = vst [vmem:[#allocation179_spill] sm:$0xff] %v3749_v4  ;;  %5510 = vst [vmem:[#allocation180_spill] sm:$0xff] %v3753_v44  ;;  %v3771_v4 = vpop.f32.mrb[93].mxu0  ;;  %v3775_v44 = vmul.f32 %v3606_v36, %v3106_v0  ;;  %v3785_v59 = vmul.f32 %v1434_v30, %v3114_v3  ;;  %v3789_v61 = vmul.f32 %v3612_v63, %v3124_v6 }
 0x19c   :  { %5511 = vst [vmem:[#allocation181_spill] sm:$0xff] %v3757_v57  ;;  %5512 = vst [vmem:[#allocation182_spill] sm:$0xff] %v3761_v7  ;;  %v3792_v7 = vmul.f32 %v1430_v29, %v3126_v8  ;;  %v3796_v0 = vrot.slane %v3696_v49, %v3573_v48  ;;  %v3800_v2 = vrot.slane %v3701_v46, %v3573_v48 }
 0x19d   :  { %5513 = vst [vmem:[#allocation183_spill] sm:$0xff] %v3764_v5  ;;  %5514 = vst [vmem:[#allocation184_spill] sm:$0xff] %v3767_v41  ;;  %v3804_v1 = vmul.f32 %v3622_v24, %v3128_v9  ;;  %v3807_v3 = vmul.f32 %v1434_v30, %v3132_v10  ;;  %v3811_v6 = vrot.slane %v3598_v47, %v3659_v52  ;;  %v5639_v5 = vld [vmem:[#allocation44_spill] sm:$0xff] }
 0x19e   :  { %5515 = vst [vmem:[#allocation185_spill] sm:$0xff] %v3775_v44  ;;  %5516 = vst [vmem:[#allocation186_spill] sm:$0xff] %v3779_v58  ;;  %v3815_v8 = vrot.slane %v3603_v53, %v3659_v52  ;;  %v3817_v58 = vpop.f32.mrb[94].mxu1  ;;  %v3819_v44 = vpop.f32.mrb[94].mxu0  ;;  %v3823_v57 = vmul.f32 %v3612_v63, %v3142_v13  ;;  %v3827_v9 = vmul.f32 %v3622_v24, %v3146_v15 }
 0x19f   :  { %5517 = vst [vmem:[#allocation187_spill] sm:$0xff] %v3782_v60  ;;  %5518 = vst [vmem:[#allocation188_spill] sm:$0xff] %v3785_v59  ;;  %v3830_v10 = vmul.f32 %v1430_v29, %v3144_v14  ;;  %v3833_v47 = vmul.f32 %v1434_v30, %v3150_v16  ;;  %v3835_v53 = vpop.f32.mrb[95].mxu1  ;;  %v3845_v13 = vmul.f32 %v3622_v24, %v3164_v21  ;;  %v3858_v16 = vld [vmem:[%s5295_s0 + $0x10] sm:$0xff]  ;;  %v5609_v59 = vld [vmem:[#allocation33_spill] sm:$0xff] }
 0x1a0   :  { %5519 = vst [vmem:[#allocation189_spill] sm:$0xff] %v3789_v61  ;;  %5520 = vst [vmem:[#allocation190_spill] sm:$0xff] %v3792_v7  ;;  %v3841_v61 = vmul.f32 %v3612_v63, %v3160_v19  ;;  %v3849_v15 = vmul.f32 %v3649_v55, %v3162_v20  ;;  %v3853_v14 = vmul.f32 %v3656_v62, %v3168_v22  ;;  %v3863_v19 = vld [vmem:[%s5295_s0 + $0x18] sm:$0xff]  ;;  %v5580_v7 = vld [vmem:[#allocation21_spill] sm:$0xff] }
 0x1a1   :  { %5521 = vst [vmem:[#allocation191_spill] sm:$0xff] %v3804_v1  ;;  %5522 = vst [vmem:[#allocation192_spill] sm:$0xff] %v3807_v3  ;;  %v3837_v1 = vpop.f32.mrb[95].mxu0  ;;  %v3867_v21 = vmul.f32 %v3612_v63, %v3178_v25  ;;  %v3871_v20 = vmul.f32 %v3622_v24, %v3182_v27  ;;  %v3875_v22 = vmul.f32 %v3649_v55, %v3180_v26  ;;  %v3897_v24 = vpop.f32.mrb[96].mxu1 }
 0x1a2   :  { %5523 = vst [vmem:[#allocation193_spill] sm:$0xff] %v3823_v57  ;;  %5524 = vst [vmem:[#allocation194_spill] sm:$0xff] %v3827_v9  ;;  %v3879_v29 = vmul.f32 %v3656_v62, %v3186_v28  ;;  %v3883_v30 = vmul.f32 %v3625_v17, %v3196_v31  ;;  %v3887_v25 = vmul.f32 %v3649_v55, %v3198_v32  ;;  %v3899_v28 = vpop.f32.mrb[96].mxu0  ;;  %v5546_v57 = vld [vmem:[#allocation159_spill] sm:$0xff] }
 0x1a3   :  { %5525 = vst [vmem:[#allocation195_spill] sm:$0xff] %v3830_v10  ;;  %5526 = vst [vmem:[#allocation196_spill] sm:$0xff] %v3833_v47  ;;  %v3891_v27 = vrot.slane %v3696_v49, %v3586_v18  ;;  %v3895_v26 = vrot.slane %v3701_v46, %v3586_v18  ;;  %v3903_v31 = vmul.f32 %v3628_v11, %v3200_v33  ;;  %v5565_v47 = vld [vmem:[#allocation13_spill] sm:$0xff] }
 0x1a4   :  { %5527 = vst [vmem:[#allocation197_spill] sm:$0xff] %v3841_v61  ;;  %5528 = vst [vmem:[#allocation198_spill] sm:$0xff] %v3845_v13  ;;  %v3907_v32 = vmul.f32 %v3656_v62, %v3204_v34  ;;  %v3911_v63 = vrot.slane %v3858_v16, %v3570_v23  ;;  %v3919_v13 = vpop.f32.mrb[97].mxu0  ;;  %v3923_v33 = vmul.f32 %v3625_v17, %v3214_v37  ;;  %v5566_v10 = vld [vmem:[#allocation157_spill] sm:$0xff] }
 0x1a5   :  { %5529 = vst [vmem:[#allocation199_spill] sm:$0xff] %v3849_v15  ;;  %5530 = vst [vmem:[#allocation200_spill] sm:$0xff] %v3853_v14  ;;  %v3927_v34 = vmul.f32 %v3628_v11, %v3218_v39  ;;  %v3931_v61 = vmul.f32 %v3649_v55, %v3216_v38  ;;  %v3939_v9 = vmul.f32 %v3625_v17, %v3232_v43  ;;  %v5551_v55 = vld [vmem:[#allocation7_spill] sm:$0xff]  ;;  %v5637_v15 = vld [vmem:[#allocation164_spill] sm:$0xff] }
 0x1a6   :  { %5531 = vst [vmem:[#allocation201_spill] sm:$0xff] %v3867_v21  ;;  %5532 = vst [vmem:[#allocation202_spill] sm:$0xff] %v3871_v20  ;;  %v3915_v20 = vrot.slane %v3863_v19, %v3570_v23  ;;  %v3917_v21 = vpop.f32.mrb[97].mxu1  ;;  %v3935_v23 = vmul.f32 %v3656_v62, %v3222_v40  ;;  %v3943_v37 = vmul.f32 %v3628_v11, %v3236_v45  ;;  %v5553_v62 = vld [vmem:[#allocation9_spill] sm:$0xff]  ;;  %v5628_v14 = vld [vmem:[#allocation39_spill] sm:$0xff] }
 0x1a7   :  { %5533 = vst [vmem:[#allocation203_spill] sm:$0xff] %v3875_v22  ;;  %5534 = vst [vmem:[#allocation204_spill] sm:$0xff] %v3879_v29  ;;  %v3955_v40 = vmul.f32 %v3625_v17, %v5551_v55  ;;  %v3959_v43 = vmul.f32 %v3628_v11, %v5553_v62  ;;  %v5562_v55 = vld [vmem:[#allocation12_spill] sm:$0xff]  ;;  %v4007_v54 = vrot.slane %v3863_v19, %v3573_v48  ;;  %v5586_v29 = vld [vmem:[#allocation167_spill] sm:$0xff] }
 0x1a8   :  { %5535 = vst [vmem:[#allocation205_spill] sm:$0xff] %v3883_v30  ;;  %5536 = vst [vmem:[#allocation206_spill] sm:$0xff] %v3887_v25  ;;  %v3969_v30 = vpop.f32.mrb[98].mxu1  ;;  %v3979_v11 = vmul.f32 %v5546_v57, %v5562_v55  ;;  %v5564_v62 = vld [vmem:[#allocation148_spill] sm:$0xff]  ;;  %v5572_v25 = vld [vmem:[#allocation17_spill] sm:$0xff] }
 0x1a9   :  { %5537 = vst [vmem:[#allocation207_spill] sm:$0xff] %v3903_v31  ;;  %5538 = vst [vmem:[#allocation208_spill] sm:$0xff] %v3907_v32  ;;  %v5549_v31 = vld [vmem:[#allocation161_spill] sm:$0xff]  ;;  %v5570_v32 = vld [vmem:[#allocation15_spill] sm:$0xff] }
 0x1aa   :  { %5539 = vst [vmem:[#allocation209_spill] sm:$0xff] %v3923_v33  ;;  %5540 = vst [vmem:[#allocation210_spill] sm:$0xff] %v3927_v34  ;;  %v5545_v33 = vld [vmem:[#allocation5_spill] sm:$0xff]  ;;  %v5548_v34 = vld [vmem:[#allocation6_spill] sm:$0xff] }
 0x1ab   :  { %5541 = vst [vmem:[#allocation211_spill] sm:$0xff] %v3931_v61  ;;  %5542 = vst [vmem:[#allocation212_spill] sm:$0xff] %v3935_v23  ;;  %v3947_v39 = vmul.f32 %v5546_v57, %v5545_v33  ;;  %v3951_v38 = vmul.f32 %v5549_v31, %v5548_v34  ;;  %v3971_v34 = vpop.f32.mrb[98].mxu0  ;;  %v5559_v23 = vld [vmem:[#allocation11_spill] sm:$0xff] }
 0x1ac   :  { %5543 = vst [vmem:[#allocation213_spill] sm:$0xff] %v3939_v9  ;;  %5544 = vst [vmem:[#allocation214_spill] sm:$0xff] %v3943_v37  ;;  %v5555_v9 = vld [vmem:[#allocation8_spill] sm:$0xff]  ;;  %v5557_v37 = vld [vmem:[#allocation10_spill] sm:$0xff] }
 0x1ad   :  { %5547 = vst [vmem:[#allocation5_spill] sm:$0xff] %v3947_v39  ;;  %5550 = vst [vmem:[#allocation159_spill] sm:$0xff] %v3951_v38  ;;  %v3963_v45 = vmul.f32 %v5546_v57, %v5555_v9  ;;  %v3967_v33 = vmul.f32 %v5549_v31, %v5557_v37  ;;  %v5560_v61 = vld [vmem:[#allocation155_spill] sm:$0xff]  ;;  %v3983_v9 = vrot.slane %v3696_v49, %v5564_v62 }
 0x1ae   :  { %5552 = vst [vmem:[#allocation6_spill] sm:$0xff] %v3955_v40  ;;  %5554 = vst [vmem:[#allocation161_spill] sm:$0xff] %v3959_v43  ;;  %v3975_v17 = vmul.f32 %v5560_v61, %v5559_v23  ;;  %v3987_v37 = vrot.slane %v3701_v46, %v5564_v62  ;;  %v3989_v43 = vpop.f32.mrb[99].mxu1  ;;  %v3991_v40 = vpop.f32.mrb[99].mxu0  ;;  %v3995_v23 = vmul.f32 %v5566_v10, %v5565_v47  ;;  %v5597_v22 = vld [vmem:[#allocation27_spill] sm:$0xff] }
 0x1af   :  { %5556 = vst [vmem:[#allocation7_spill] sm:$0xff] %v3963_v45  ;;  %5558 = vst [vmem:[#allocation9_spill] sm:$0xff] %v3967_v33  ;;  %v4011_v36 = vmul.f32 %v5560_v61, %v5570_v32  ;;  %v4015_v47 = vmul.f32 %v5566_v10, %v5572_v25  ;;  %v5578_v33 = vld [vmem:[#allocation19_spill] sm:$0xff]  ;;  %v4031_v32 = vmul.f32 %v5566_v10, %v5580_v7  ;;  %v5583_v45 = vld [vmem:[#allocation165_spill] sm:$0xff] }
 0x1b0   :  { %5561 = vst [vmem:[#allocation8_spill] sm:$0xff] %v3975_v17  ;;  %5563 = vst [vmem:[#allocation10_spill] sm:$0xff] %v3979_v11  ;;  %v5568_v17 = vld [vmem:[#allocation14_spill] sm:$0xff]  ;;  %v4003_v11 = vrot.slane %v3858_v16, %v3573_v48  ;;  %v4027_v48 = vmul.f32 %v5560_v61, %v5578_v33  ;;  %v5617_v39 = vld [vmem:[#allocation35_spill] sm:$0xff] }
 0x1b1   :  { %5567 = vst [vmem:[#allocation11_spill] sm:$0xff] %v3995_v23  ;;  %v3999_v55 = vmul.f32 %v5549_v31, %v5568_v17  ;;  %5571 = vst [vmem:[#allocation12_spill] sm:$0xff] %v4011_v36  ;;  %v5574_v23 = vld [vmem:[#allocation16_spill] sm:$0xff] }
 0x1b2   :  { %5573 = vst [vmem:[#allocation148_spill] sm:$0xff] %v4015_v47  ;;  %v4019_v17 = vmul.f32 %v5546_v57, %v5574_v23  ;;  %5579 = vst [vmem:[#allocation14_spill] sm:$0xff] %v4027_v48  ;;  %v5582_v36 = vld [vmem:[#allocation20_spill] sm:$0xff]  ;;  %v5585_v47 = vld [vmem:[#allocation22_spill] sm:$0xff]  ;;  %v4041_v23 = vpop.f32.mrb[100].mxu1 }
 0x1b3   :  { %5569 = vst [vmem:[#allocation155_spill] sm:$0xff] %v3999_v55  ;;  %v5576_v55 = vld [vmem:[#allocation18_spill] sm:$0xff]  ;;  %5581 = vst [vmem:[#allocation15_spill] sm:$0xff] %v4031_v32  ;;  %v4035_v25 = vmul.f32 %v5583_v45, %v5582_v36  ;;  %v4039_v57 = vmul.f32 %v5586_v29, %v5585_v47  ;;  %v5590_v48 = vld [vmem:[#allocation25_spill] sm:$0xff] }
 0x1b4   :  { %5575 = vst [vmem:[#allocation13_spill] sm:$0xff] %v4019_v17  ;;  %v4023_v3 = vmul.f32 %v5549_v31, %v5576_v55  ;;  %v4043_v31 = vpop.f32.mrb[100].mxu0  ;;  %v5588_v55 = vld [vmem:[#allocation23_spill] sm:$0xff]  ;;  %v4051_v7 = vmul.f32 %v5566_v10, %v5590_v48  ;;  %v5592_v32 = vld [vmem:[#allocation24_spill] sm:$0xff]  ;;  %v4061_v17 = vpop.f32.mrb[101].mxu1  ;;  %v4075_v48 = vrot.slane %v3696_v49, %v3615_v35 }
 0x1b5   :  { %5584 = vst [vmem:[#allocation17_spill] sm:$0xff] %v4035_v25  ;;  %5587 = vst [vmem:[#allocation16_spill] sm:$0xff] %v4039_v57  ;;  %v4047_v33 = vmul.f32 %v5560_v61, %v5588_v55  ;;  %v4055_v36 = vmul.f32 %v5583_v45, %v5592_v32  ;;  %v4063_v57 = vpop.f32.mrb[101].mxu0  ;;  %v5598_v25 = vld [vmem:[#allocation158_spill] sm:$0xff]  ;;  %v5600_v55 = vld [vmem:[#allocation28_spill] sm:$0xff]  ;;  %v4113_v60 = vpop.f32.mrb[102].mxu1 }
 0x1b6   :  { %5577 = vst [vmem:[#allocation157_spill] sm:$0xff] %v4023_v3  ;;  %5591 = vst [vmem:[#allocation19_spill] sm:$0xff] %v4051_v7  ;;  %v5594_v3 = vld [vmem:[#allocation26_spill] sm:$0xff]  ;;  %v4067_v61 = vmul.f32 %v5598_v25, %v5597_v22  ;;  %v4071_v10 = vmul.f32 %v5583_v45, %v5600_v55  ;;  %v5602_v32 = vld [vmem:[#allocation29_spill] sm:$0xff]  ;;  %v4091_v55 = vrot.slane %v3858_v16, %v3586_v18 }
 0x1b7   :  { %5589 = vst [vmem:[#allocation18_spill] sm:$0xff] %v4047_v33  ;;  %5593 = vst [vmem:[#allocation21_spill] sm:$0xff] %v4055_v36  ;;  %v4059_v47 = vmul.f32 %v5586_v29, %v5594_v3  ;;  %v4079_v3 = vrot.slane %v3701_v46, %v3615_v35  ;;  %v5603_v7 = vld [vmem:[#allocation160_spill] sm:$0xff] }
 0x1b8   :  { %5596 = vst [vmem:[#allocation165_spill] sm:$0xff] %v4063_v57  ;;  %5599 = vst [vmem:[#allocation22_spill] sm:$0xff] %v4067_v61  ;;  %v4083_v33 = vmul.f32 %v5603_v7, %v5602_v32  ;;  %v4095_v61 = vrot.slane %v3863_v19, %v3586_v18  ;;  %v4103_v32 = vmul.f32 %v5603_v7, %v5609_v59  ;;  %v4115_v18 = vpop.f32.mrb[102].mxu0  ;;  %v5708_v57 = vld [vmem:[#allocation179_spill] sm:$0xff] }
 0x1b9   :  { %5595 = vst [vmem:[#allocation20_spill] sm:$0xff] %v4059_v47  ;;  %5601 = vst [vmem:[#allocation167_spill] sm:$0xff] %v4071_v10  ;;  %v5605_v47 = vld [vmem:[#allocation30_spill] sm:$0xff]  ;;  %v5607_v10 = vld [vmem:[#allocation31_spill] sm:$0xff] }
 0x1ba   :  { %5604 = vst [vmem:[#allocation23_spill] sm:$0xff] %v4083_v33  ;;  %v4087_v22 = vmul.f32 %v5586_v29, %v5605_v47  ;;  %v4099_v36 = vmul.f32 %v5598_v25, %v5607_v10  ;;  %5610 = vst [vmem:[#allocation26_spill] sm:$0xff] %v4103_v32  ;;  %v5611_v33 = vld [vmem:[#allocation32_spill] sm:$0xff]  ;;  %v4119_v10 = vmul.f32 %v5598_v25, %v5617_v39 }
 0x1bb   :  { %v4107_v47 = vmul.f32 %v5583_v45, %v5611_v33  ;;  %5615 = vst [vmem:[#allocation28_spill] sm:$0xff] %v4113_v60  ;;  %5616 = vst [vmem:[#allocation29_spill] sm:$0xff] %v4115_v18  ;;  %v5621_v32 = vld [vmem:[#allocation36_spill] sm:$0xff]  ;;  %v5623_v33 = vld [vmem:[#allocation38_spill] sm:$0xff]  ;;  %v4139_v39 = vmul.f32 %v5598_v25, %v5628_v14  ;;  %v4159_v14 = vmul.f32 %v3712_v51, %v5639_v5 }
 0x1bc   :  { %5606 = vst [vmem:[#allocation25_spill] sm:$0xff] %v4087_v22  ;;  %5608 = vst [vmem:[#allocation24_spill] sm:$0xff] %v4099_v36  ;;  %v5613_v22 = vld [vmem:[#allocation34_spill] sm:$0xff]  ;;  %v5619_v36 = vld [vmem:[#allocation37_spill] sm:$0xff]  ;;  %v4127_v45 = vmul.f32 %v3712_v51, %v5621_v32  ;;  %v4163_v25 = vrot.slane %v3696_v49, %v3631_v12  ;;  %v4179_v5 = vrot.slane %v3858_v16, %v5564_v62 }
 0x1bd   :  { %5612 = vst [vmem:[#allocation27_spill] sm:$0xff] %v4107_v47  ;;  %v4111_v38 = vmul.f32 %v5586_v29, %v5613_v22  ;;  %5618 = vst [vmem:[#allocation160_spill] sm:$0xff] %v4119_v10  ;;  %v4123_v59 = vmul.f32 %v5603_v7, %v5619_v36  ;;  %v5624_v47 = vld [vmem:[#allocation172_spill] sm:$0xff]  ;;  %v4133_v22 = vpop.f32.mrb[103].mxu1  ;;  %v5630_v10 = vld [vmem:[#allocation41_spill] sm:$0xff] }
 0x1be   :  { %5622 = vst [vmem:[#allocation31_spill] sm:$0xff] %v4127_v45  ;;  %v4131_v29 = vmul.f32 %v5624_v47, %v5623_v33  ;;  %5626 = vst [vmem:[#allocation32_spill] sm:$0xff] %v4133_v22  ;;  %v4143_v36 = vmul.f32 %v5603_v7, %v5630_v10  ;;  %v5634_v45 = vld [vmem:[#allocation42_spill] sm:$0xff]  ;;  %v4167_v7 = vrot.slane %v3701_v46, %v3631_v12  ;;  %v5641_v10 = vld [vmem:[#allocation45_spill] sm:$0xff] }
 0x1bf   :  { %5614 = vst [vmem:[#allocation158_spill] sm:$0xff] %v4111_v38  ;;  %5620 = vst [vmem:[#allocation30_spill] sm:$0xff] %v4123_v59  ;;  %v4135_v38 = vpop.f32.mrb[103].mxu0  ;;  %v5632_v59 = vld [vmem:[#allocation40_spill] sm:$0xff]  ;;  %v4151_v33 = vmul.f32 %v5624_v47, %v5634_v45  ;;  %v5705_v60 = vld [vmem:[#allocation177_spill] sm:$0xff] }
 0x1c0   :  { %5625 = vst [vmem:[#allocation33_spill] sm:$0xff] %v4131_v29  ;;  %5627 = vst [vmem:[#allocation34_spill] sm:$0xff] %v4135_v38  ;;  %v4147_v32 = vmul.f32 %v3712_v51, %v5632_v59  ;;  %v5636_v29 = vld [vmem:[#allocation43_spill] sm:$0xff]  ;;  %v5642_v59 = vld [vmem:[#allocation166_spill] sm:$0xff] }
 0x1c1   :  { %5629 = vst [vmem:[#allocation35_spill] sm:$0xff] %v4139_v39  ;;  %5631 = vst [vmem:[#allocation37_spill] sm:$0xff] %v4143_v36  ;;  %v4155_v41 = vmul.f32 %v5637_v15, %v5636_v29  ;;  %v4171_v45 = vmul.f32 %v5642_v59, %v5641_v10  ;;  %v5644_v36 = vld [vmem:[#allocation46_spill] sm:$0xff]  ;;  %v4183_v39 = vrot.slane %v3863_v19, %v5564_v62 }
 0x1c2   :  { %5633 = vst [vmem:[#allocation36_spill] sm:$0xff] %v4147_v32  ;;  %5635 = vst [vmem:[#allocation38_spill] sm:$0xff] %v4151_v33  ;;  %v4175_v29 = vmul.f32 %v5624_v47, %v5644_v36  ;;  %v5648_v33 = vld [vmem:[#allocation47_spill] sm:$0xff]  ;;  %v5654_v38 = vld [vmem:[#allocation50_spill] sm:$0xff] }
 0x1c3   :  { %5638 = vst [vmem:[#allocation172_spill] sm:$0xff] %v4155_v41  ;;  %5640 = vst [vmem:[#allocation39_spill] sm:$0xff] %v4159_v14  ;;  %v4185_v41 = vpop.f32.mrb[104].mxu1  ;;  %v4187_v14 = vpop.f32.mrb[104].mxu0  ;;  %v4191_v10 = vmul.f32 %v5637_v15, %v5648_v33  ;;  %v4203_v62 = vmul.f32 %v5624_v47, %v5654_v38  ;;  %v5667_v47 = vld [vmem:[#allocation55_spill] sm:$0xff] }
 0x1c4   :  { %5643 = vst [vmem:[#allocation41_spill] sm:$0xff] %v4171_v45  ;;  %5645 = vst [vmem:[#allocation40_spill] sm:$0xff] %v4175_v29  ;;  %v5650_v45 = vld [vmem:[#allocation49_spill] sm:$0xff]  ;;  %v5652_v29 = vld [vmem:[#allocation48_spill] sm:$0xff]  ;;  %v4205_v18 = vpop.f32.mrb[105].mxu1 }
 0x1c5   :  { %5646 = vst [vmem:[#allocation42_spill] sm:$0xff] %v4185_v41  ;;  %5647 = vst [vmem:[#allocation43_spill] sm:$0xff] %v4187_v14  ;;  %v4195_v36 = vmul.f32 %v5642_v59, %v5650_v45  ;;  %v4199_v32 = vmul.f32 %v3712_v51, %v5652_v29  ;;  %v4207_v41 = vpop.f32.mrb[105].mxu0  ;;  %v5658_v14 = vld [vmem:[#allocation51_spill] sm:$0xff]  ;;  %v5664_v29 = vld [vmem:[#allocation54_spill] sm:$0xff] }
 0x1c6   :  { %5649 = vst [vmem:[#allocation164_spill] sm:$0xff] %v4191_v10  ;;  %5655 = vst [vmem:[#allocation166_spill] sm:$0xff] %v4203_v62  ;;  %v4211_v33 = vmul.f32 %v5637_v15, %v5658_v14  ;;  %v5660_v10 = vld [vmem:[#allocation53_spill] sm:$0xff]  ;;  %v4227_v62 = vmul.f32 %v5637_v15, %v5667_v47  ;;  %v4249_v47 = vpop.f32.mrb[106].mxu1 }
 0x1c7   :  { %5651 = vst [vmem:[#allocation44_spill] sm:$0xff] %v4195_v36  ;;  %5653 = vst [vmem:[#allocation45_spill] sm:$0xff] %v4199_v32  ;;  %v4215_v45 = vmul.f32 %v5642_v59, %v5660_v10  ;;  %v5662_v36 = vld [vmem:[#allocation52_spill] sm:$0xff]  ;;  %v5665_v32 = vld [vmem:[#allocation175_spill] sm:$0xff] }
 0x1c8   :  { %5656 = vst [vmem:[#allocation46_spill] sm:$0xff] %v4205_v18  ;;  %5657 = vst [vmem:[#allocation47_spill] sm:$0xff] %v4207_v41  ;;  %v4219_v51 = vmul.f32 %v3726_v50, %v5662_v36  ;;  %v4223_v38 = vmul.f32 %v5665_v32, %v5664_v29  ;;  %v5669_v41 = vld [vmem:[#allocation57_spill] sm:$0xff]  ;;  %v5676_v18 = vld [vmem:[#allocation170_spill] sm:$0xff] }
 0x1c9   :  { %5659 = vst [vmem:[#allocation49_spill] sm:$0xff] %v4211_v33  ;;  %5661 = vst [vmem:[#allocation48_spill] sm:$0xff] %v4215_v45  ;;  %v4231_v14 = vmul.f32 %v5642_v59, %v5669_v41  ;;  %v5671_v33 = vld [vmem:[#allocation56_spill] sm:$0xff]  ;;  %v5673_v45 = vld [vmem:[#allocation58_spill] sm:$0xff] }
 0x1ca   :  { %5663 = vst [vmem:[#allocation50_spill] sm:$0xff] %v4219_v51  ;;  %5666 = vst [vmem:[#allocation51_spill] sm:$0xff] %v4223_v38  ;;  %v4235_v10 = vmul.f32 %v3726_v50, %v5671_v33  ;;  %v4239_v36 = vmul.f32 %v5665_v32, %v5673_v45  ;;  %v5675_v51 = vld [vmem:[#allocation59_spill] sm:$0xff]  ;;  %v5678_v38 = vld [vmem:[#allocation60_spill] sm:$0xff]  ;;  %v4259_v45 = vpop.f32.mrb[106].mxu0 }
 0x1cb   :  { %5668 = vst [vmem:[#allocation53_spill] sm:$0xff] %v4227_v62  ;;  %5670 = vst [vmem:[#allocation52_spill] sm:$0xff] %v4231_v14  ;;  %v4243_v29 = vmul.f32 %v5676_v18, %v5675_v51  ;;  %v4247_v15 = vmul.f32 %v3726_v50, %v5678_v38  ;;  %v5681_v41 = vld [vmem:[#allocation156_spill] sm:$0xff]  ;;  %v5685_v14 = vld [vmem:[#allocation61_spill] sm:$0xff] }
 0x1cc   :  { %5672 = vst [vmem:[#allocation54_spill] sm:$0xff] %v4235_v10  ;;  %5674 = vst [vmem:[#allocation175_spill] sm:$0xff] %v4239_v36  ;;  %v4253_v59 = vrot.slane %v3696_v49, %v5681_v41  ;;  %v4257_v33 = vrot.slane %v3701_v46, %v5681_v41  ;;  %v5686_v62 = vld [vmem:[#allocation171_spill] sm:$0xff]  ;;  %v4273_v36 = vrot.slane %v3858_v16, %v3615_v35 }
 0x1cd   :  { %5677 = vst [vmem:[#allocation55_spill] sm:$0xff] %v4243_v29  ;;  %5679 = vst [vmem:[#allocation57_spill] sm:$0xff] %v4247_v15  ;;  %v4263_v51 = vmul.f32 %v5686_v62, %v5685_v14  ;;  %v5688_v29 = vld [vmem:[#allocation62_spill] sm:$0xff]  ;;  %v4269_v15 = vpop.f32.mrb[107].mxu1  ;;  %v4277_v10 = vrot.slane %v3863_v19, %v3615_v35  ;;  %v5700_v35 = vld [vmem:[#allocation67_spill] sm:$0xff] }
 0x1ce   :  { %5680 = vst [vmem:[#allocation56_spill] sm:$0xff] %v4249_v47  ;;  %5682 = vst [vmem:[#allocation58_spill] sm:$0xff] %v4253_v59  ;;  %v4267_v38 = vmul.f32 %v5665_v32, %v5688_v29  ;;  %v5692_v59 = vld [vmem:[#allocation63_spill] sm:$0xff]  ;;  %v4299_v22 = vmul.f32 %v5676_v18, %v5700_v35 }
 0x1cf   :  { %5683 = vst [vmem:[#allocation59_spill] sm:$0xff] %v4257_v33  ;;  %5684 = vst [vmem:[#allocation170_spill] sm:$0xff] %v4259_v45  ;;  %v4279_v33 = vpop.f32.mrb[107].mxu0  ;;  %v4283_v14 = vmul.f32 %v5676_v18, %v5692_v59 }
 0x1d0   :  { %5687 = vst [vmem:[#allocation60_spill] sm:$0xff] %v4263_v51  ;;  %5689 = vst [vmem:[#allocation156_spill] sm:$0xff] %v4267_v38  ;;  %v5694_v51 = vld [vmem:[#allocation65_spill] sm:$0xff]  ;;  %v5696_v38 = vld [vmem:[#allocation64_spill] sm:$0xff] }
 0x1d1   :  { %5690 = vst [vmem:[#allocation61_spill] sm:$0xff] %v4269_v15  ;;  %5691 = vst [vmem:[#allocation171_spill] sm:$0xff] %v4279_v33  ;;  %v4287_v29 = vmul.f32 %v5686_v62, %v5694_v51  ;;  %v4291_v45 = vmul.f32 %v3726_v50, %v5696_v38  ;;  %v5698_v15 = vld [vmem:[#allocation66_spill] sm:$0xff]  ;;  %v5702_v33 = vld [vmem:[#allocation69_spill] sm:$0xff] }
 0x1d2   :  { %5693 = vst [vmem:[#allocation62_spill] sm:$0xff] %v4283_v14  ;;  %v4295_v47 = vmul.f32 %v5665_v32, %v5698_v15  ;;  %5701 = vst [vmem:[#allocation66_spill] sm:$0xff] %v4299_v22  ;;  %v4303_v59 = vmul.f32 %v5686_v62, %v5702_v33  ;;  %v5704_v14 = vld [vmem:[#allocation68_spill] sm:$0xff]  ;;  %v5710_v38 = vld [vmem:[#allocation71_spill] sm:$0xff] }
 0x1d3   :  { %5695 = vst [vmem:[#allocation63_spill] sm:$0xff] %v4287_v29  ;;  %5697 = vst [vmem:[#allocation65_spill] sm:$0xff] %v4291_v45  ;;  %v4307_v51 = vmul.f32 %v5705_v60, %v5704_v14  ;;  %v5707_v29 = vld [vmem:[#allocation70_spill] sm:$0xff]  ;;  %v4315_v32 = vmul.f32 %v5676_v18, %v5710_v38  ;;  %v5712_v15 = vld [vmem:[#allocation73_spill] sm:$0xff] }
 0x1d4   :  { %5699 = vst [vmem:[#allocation64_spill] sm:$0xff] %v4295_v47  ;;  %5703 = vst [vmem:[#allocation67_spill] sm:$0xff] %v4303_v59  ;;  %v4311_v50 = vmul.f32 %v5708_v57, %v5707_v29  ;;  %v4319_v35 = vmul.f32 %v5686_v62, %v5712_v15  ;;  %v5714_v22 = vld [vmem:[#allocation72_spill] sm:$0xff]  ;;  %v5716_v59 = vld [vmem:[#allocation74_spill] sm:$0xff]  ;;  %v4329_v47 = vpop.f32.mrb[108].mxu1  ;;  %v4331_v29 = vpop.f32.mrb[108].mxu0 }
 0x1d5   :  { %5706 = vst [vmem:[#allocation69_spill] sm:$0xff] %v4307_v51  ;;  %5711 = vst [vmem:[#allocation177_spill] sm:$0xff] %v4315_v32  ;;  %v4323_v33 = vmul.f32 %v5705_v60, %v5714_v22  ;;  %v4327_v14 = vmul.f32 %v5708_v57, %v5716_v59  ;;  %v5718_v45 = vld [vmem:[#allocation75_spill] sm:$0xff]  ;;  %v5721_v38 = vld [vmem:[#allocation76_spill] sm:$0xff]  ;;  %v4341_v15 = vpop.f32.mrb[109].mxu1  ;;  %v4345_v22 = vrot.slane %v3696_v49, %v3659_v52 }
 0x1d6   :  { %5709 = vst [vmem:[#allocation68_spill] sm:$0xff] %v4311_v50  ;;  %5713 = vst [vmem:[#allocation70_spill] sm:$0xff] %v4319_v35  ;;  %v5719_v50 = vld [vmem:[#allocation173_spill] sm:$0xff]  ;;  %v4339_v62 = vmul.f32 %v5705_v60, %v5721_v38  ;;  %v4349_v59 = vrot.slane %v3701_v46, %v3659_v52  ;;  %v4351_v35 = vpop.f32.mrb[109].mxu0  ;;  %v4367_v49 = vrot.slane %v3863_v19, %v3631_v12  ;;  %v5731_v46 = vld [vmem:[#allocation79_spill] sm:$0xff] }
 0x1d7   :  { %5715 = vst [vmem:[#allocation179_spill] sm:$0xff] %v4323_v33  ;;  %5717 = vst [vmem:[#allocation71_spill] sm:$0xff] %v4327_v14  ;;  %v4335_v18 = vmul.f32 %v5719_v50, %v5718_v45  ;;  %v5726_v32 = vld [vmem:[#allocation77_spill] sm:$0xff]  ;;  %v5727_v14 = vld [vmem:[#allocation174_spill] sm:$0xff]  ;;  %v4371_v33 = vmul.f32 %v5719_v50, %v5731_v46 }
 0x1d8   :  { %5722 = vst [vmem:[#allocation72_spill] sm:$0xff] %v4339_v62  ;;  %5723 = vst [vmem:[#allocation74_spill] sm:$0xff] %v4345_v22  ;;  %v4355_v45 = vmul.f32 %v5727_v14, %v5726_v32  ;;  %v4363_v62 = vrot.slane %v3858_v16, %v3631_v12  ;;  %v5733_v51 = vld [vmem:[#allocation81_spill] sm:$0xff]  ;;  %v5739_v22 = vld [vmem:[#allocation83_spill] sm:$0xff] }
 0x1d9   :  { %5720 = vst [vmem:[#allocation73_spill] sm:$0xff] %v4335_v18  ;;  %5724 = vst [vmem:[#allocation75_spill] sm:$0xff] %v4349_v59  ;;  %v5729_v18 = vld [vmem:[#allocation78_spill] sm:$0xff]  ;;  %v4375_v32 = vmul.f32 %v5727_v14, %v5733_v51  ;;  %v4387_v12 = vmul.f32 %v5719_v50, %v5739_v22 }
 0x1da   :  { %5725 = vst [vmem:[#allocation173_spill] sm:$0xff] %v4351_v35  ;;  %5728 = vst [vmem:[#allocation76_spill] sm:$0xff] %v4355_v45  ;;  %v4359_v38 = vmul.f32 %v5708_v57, %v5729_v18  ;;  %v5735_v45 = vld [vmem:[#allocation80_spill] sm:$0xff]  ;;  %v5741_v35 = vld [vmem:[#allocation85_spill] sm:$0xff] }
 0x1db   :  { %5732 = vst [vmem:[#allocation174_spill] sm:$0xff] %v4371_v33  ;;  %5734 = vst [vmem:[#allocation78_spill] sm:$0xff] %v4375_v32  ;;  %v4379_v18 = vmul.f32 %v5705_v60, %v5735_v45  ;;  %v4391_v46 = vmul.f32 %v5727_v14, %v5741_v35  ;;  %v5743_v33 = vld [vmem:[#allocation84_spill] sm:$0xff]  ;;  %v5745_v32 = vld [vmem:[#allocation86_spill] sm:$0xff]  ;;  %v4401_v45 = vpop.f32.mrb[110].mxu1 }
 0x1dc   :  { %5730 = vst [vmem:[#allocation77_spill] sm:$0xff] %v4359_v38  ;;  %v5737_v38 = vld [vmem:[#allocation82_spill] sm:$0xff]  ;;  %5740 = vst [vmem:[#allocation80_spill] sm:$0xff] %v4387_v12  ;;  %v4395_v51 = vmul.f32 %v3811_v6, %v5743_v33  ;;  %v4399_v60 = vmul.f32 %v3815_v8, %v5745_v32  ;;  %v5750_v12 = vld [vmem:[#allocation89_spill] sm:$0xff] }
 0x1dd   :  { %5736 = vst [vmem:[#allocation79_spill] sm:$0xff] %v4379_v18  ;;  %v4383_v59 = vmul.f32 %v5708_v57, %v5737_v38  ;;  %5742 = vst [vmem:[#allocation82_spill] sm:$0xff] %v4391_v46  ;;  %v4403_v57 = vpop.f32.mrb[110].mxu0  ;;  %v5748_v38 = vld [vmem:[#allocation87_spill] sm:$0xff]  ;;  %v4411_v35 = vmul.f32 %v5727_v14, %v5750_v12  ;;  %v5752_v46 = vld [vmem:[#allocation88_spill] sm:$0xff]  ;;  %v4421_v18 = vpop.f32.mrb[111].mxu1  ;;  %v4435_v12 = vrot.slane %v3858_v16, %v5681_v41 }
 0x1de   :  { %5744 = vst [vmem:[#allocation83_spill] sm:$0xff] %v4395_v51  ;;  %5746 = vst [vmem:[#allocation85_spill] sm:$0xff] %v4399_v60  ;;  %v4407_v22 = vmul.f32 %v5719_v50, %v5748_v38  ;;  %v4415_v33 = vmul.f32 %v3811_v6, %v5752_v46  ;;  %v4423_v60 = vpop.f32.mrb[111].mxu0  ;;  %v5756_v51 = vld [vmem:[#allocation91_spill] sm:$0xff]  ;;  %v5759_v38 = vld [vmem:[#allocation92_spill] sm:$0xff] }
 0x1df   :  { %5738 = vst [vmem:[#allocation81_spill] sm:$0xff] %v4383_v59  ;;  %5747 = vst [vmem:[#allocation84_spill] sm:$0xff] %v4403_v57  ;;  %v5754_v59 = vld [vmem:[#allocation90_spill] sm:$0xff]  ;;  %v5757_v57 = vld [vmem:[#allocation176_spill] sm:$0xff]  ;;  %v4431_v14 = vmul.f32 %v3811_v6, %v5759_v38 }
 0x1e0   :  { %5749 = vst [vmem:[#allocation86_spill] sm:$0xff] %v4407_v22  ;;  %5751 = vst [vmem:[#allocation87_spill] sm:$0xff] %v4411_v35  ;;  %v4419_v32 = vmul.f32 %v3815_v8, %v5754_v59  ;;  %v4427_v50 = vmul.f32 %v5757_v57, %v5756_v51  ;;  %v4439_v59 = vrot.slane %v3863_v19, %v5681_v41  ;;  %v5763_v46 = vld [vmem:[#allocation93_spill] sm:$0xff]  ;;  %v5764_v35 = vld [vmem:[#allocation178_spill] sm:$0xff] }
 0x1e1   :  { %5753 = vst [vmem:[#allocation89_spill] sm:$0xff] %v4415_v33  ;;  %5760 = vst [vmem:[#allocation91_spill] sm:$0xff] %v4431_v14  ;;  %v4443_v22 = vmul.f32 %v5764_v35, %v5763_v46  ;;  %v5770_v14 = vld [vmem:[#allocation96_spill] sm:$0xff] }
 0x1e2   :  { %5755 = vst [vmem:[#allocation88_spill] sm:$0xff] %v4419_v32  ;;  %5758 = vst [vmem:[#allocation90_spill] sm:$0xff] %v4427_v50  ;;  %v5766_v32 = vld [vmem:[#allocation95_spill] sm:$0xff]  ;;  %v5768_v50 = vld [vmem:[#allocation94_spill] sm:$0xff]  ;;  %v4455_v33 = vmul.f32 %v3811_v6, %v5770_v14  ;;  %v4475_v6 = vpop.f32.mrb[112].mxu0 }
 0x1e3   :  { %5761 = vst [vmem:[#allocation176_spill] sm:$0xff] %v4435_v12  ;;  %5762 = vst [vmem:[#allocation92_spill] sm:$0xff] %v4439_v59  ;;  %v4447_v51 = vmul.f32 %v5757_v57, %v5766_v32  ;;  %v4451_v38 = vmul.f32 %v3815_v8, %v5768_v50  ;;  %v5772_v12 = vld [vmem:[#allocation97_spill] sm:$0xff]  ;;  %v5774_v59 = vld [vmem:[#allocation99_spill] sm:$0xff] }
 0x1e4   :  { %5765 = vst [vmem:[#allocation93_spill] sm:$0xff] %v4443_v22  ;;  %5771 = vst [vmem:[#allocation94_spill] sm:$0xff] %v4455_v33  ;;  %v4459_v41 = vmul.f32 %v5764_v35, %v5772_v12  ;;  %v4463_v46 = vmul.f32 %v5757_v57, %v5774_v59  ;;  %v5776_v22 = vld [vmem:[#allocation98_spill] sm:$0xff]  ;;  %v5780_v14 = vld [vmem:[#allocation101_spill] sm:$0xff]  ;;  %v4495_v33 = vpop.f32.mrb[113].mxu0 }
 0x1e5   :  { %5767 = vst [vmem:[#allocation178_spill] sm:$0xff] %v4447_v51  ;;  %5769 = vst [vmem:[#allocation95_spill] sm:$0xff] %v4451_v38  ;;  %v4467_v32 = vmul.f32 %v3815_v8, %v5776_v22  ;;  %v5778_v51 = vld [vmem:[#allocation100_spill] sm:$0xff]  ;;  %v4473_v38 = vpop.f32.mrb[112].mxu1  ;;  %v4479_v12 = vmul.f32 %v5764_v35, %v5780_v14 }
 0x1e6   :  { %5773 = vst [vmem:[#allocation96_spill] sm:$0xff] %v4459_v41  ;;  %5775 = vst [vmem:[#allocation97_spill] sm:$0xff] %v4463_v46  ;;  %v4471_v50 = vmul.f32 %v3911_v63, %v5778_v51  ;;  %v5782_v41 = vld [vmem:[#allocation103_spill] sm:$0xff]  ;;  %v5784_v46 = vld [vmem:[#allocation102_spill] sm:$0xff] }
 0x1e7   :  { %5777 = vst [vmem:[#allocation99_spill] sm:$0xff] %v4467_v32  ;;  %5781 = vst [vmem:[#allocation100_spill] sm:$0xff] %v4479_v12  ;;  %v4483_v59 = vmul.f32 %v5757_v57, %v5782_v41  ;;  %v4487_v8 = vmul.f32 %v3915_v20, %v5784_v46  ;;  %v5786_v22 = vld [vmem:[#allocation104_spill] sm:$0xff]  ;;  %v4493_v32 = vpop.f32.mrb[113].mxu1  ;;  %v5791_v12 = vld [vmem:[#allocation107_spill] sm:$0xff] }
 0x1e8   :  { %5779 = vst [vmem:[#allocation98_spill] sm:$0xff] %v4471_v50  ;;  %v4491_v51 = vmul.f32 %v3911_v63, %v5786_v22  ;;  %5788 = vst [vmem:[#allocation104_spill] sm:$0xff] %v4495_v33  ;;  %v5789_v50 = vld [vmem:[#allocation105_spill] sm:$0xff]  ;;  %v4503_v57 = vmul.f32 %v3796_v0, %v5791_v12  ;;  %v5793_v41 = vld [vmem:[#allocation106_spill] sm:$0xff]  ;;  %v4527_v12 = vrot.slane %v3863_v19, %v3659_v52 }
 0x1e9   :  { %5783 = vst [vmem:[#allocation101_spill] sm:$0xff] %v4483_v59  ;;  %5785 = vst [vmem:[#allocation103_spill] sm:$0xff] %v4487_v8  ;;  %v4499_v14 = vmul.f32 %v5764_v35, %v5789_v50  ;;  %v4507_v46 = vmul.f32 %v3915_v20, %v5793_v41  ;;  %v5795_v59 = vld [vmem:[#allocation108_spill] sm:$0xff]  ;;  %v5799_v33 = vld [vmem:[#allocation110_spill] sm:$0xff]  ;;  %v4523_v50 = vrot.slane %v3858_v16, %v3659_v52  ;;  %v4547_v52 = vpop.f32.mrb[114].mxu0 }
 0x1ea   :  { %5787 = vst [vmem:[#allocation102_spill] sm:$0xff] %v4491_v51  ;;  %5792 = vst [vmem:[#allocation107_spill] sm:$0xff] %v4503_v57  ;;  %v4511_v22 = vmul.f32 %v3911_v63, %v5795_v59  ;;  %v5797_v51 = vld [vmem:[#allocation109_spill] sm:$0xff]  ;;  %v4519_v35 = vmul.f32 %v3915_v20, %v5799_v33  ;;  %v5801_v41 = vld [vmem:[#allocation111_spill] sm:$0xff] }
 0x1eb   :  { %5790 = vst [vmem:[#allocation105_spill] sm:$0xff] %v4499_v14  ;;  %5794 = vst [vmem:[#allocation106_spill] sm:$0xff] %v4507_v46  ;;  %v4515_v8 = vmul.f32 %v3800_v2, %v5797_v51  ;;  %v4531_v59 = vmul.f32 %v3796_v0, %v5801_v41  ;;  %v5803_v14 = vld [vmem:[#allocation113_spill] sm:$0xff]  ;;  %v5807_v57 = vld [vmem:[#allocation114_spill] sm:$0xff] }
 0x1ec   :  { %5796 = vst [vmem:[#allocation108_spill] sm:$0xff] %v4511_v22  ;;  %5800 = vst [vmem:[#allocation110_spill] sm:$0xff] %v4519_v35  ;;  %v4535_v51 = vmul.f32 %v3800_v2, %v5803_v14  ;;  %v4543_v16 = vmul.f32 %v3915_v20, %v5807_v57  ;;  %v4545_v35 = vpop.f32.mrb[114].mxu1  ;;  %v5809_v19 = vld [vmem:[#allocation115_spill] sm:$0xff]  ;;  %v5823_v22 = vld [vmem:[#allocation122_spill] sm:$0xff] }
 0x1ed   :  { %5798 = vst [vmem:[#allocation109_spill] sm:$0xff] %v4515_v8  ;;  %5802 = vst [vmem:[#allocation111_spill] sm:$0xff] %v4531_v59  ;;  %v5805_v8 = vld [vmem:[#allocation112_spill] sm:$0xff]  ;;  %v4551_v41 = vmul.f32 %v3796_v0, %v5809_v19  ;;  %v5811_v59 = vld [vmem:[#allocation117_spill] sm:$0xff]  ;;  %v4565_v57 = vpop.f32.mrb[115].mxu1 }
 0x1ee   :  { %5804 = vst [vmem:[#allocation113_spill] sm:$0xff] %v4535_v51  ;;  %v4539_v33 = vmul.f32 %v3911_v63, %v5805_v8  ;;  %5808 = vst [vmem:[#allocation114_spill] sm:$0xff] %v4543_v16  ;;  %v4555_v14 = vmul.f32 %v3800_v2, %v5811_v59  ;;  %v5813_v51 = vld [vmem:[#allocation116_spill] sm:$0xff]  ;;  %v5815_v8 = vld [vmem:[#allocation118_spill] sm:$0xff]  ;;  %v4567_v16 = vpop.f32.mrb[115].mxu0 }
 0x1ef   :  { %5810 = vst [vmem:[#allocation115_spill] sm:$0xff] %v4551_v41  ;;  %v4559_v63 = vmul.f32 %v4003_v11, %v5813_v51  ;;  %v4563_v20 = vmul.f32 %v4007_v54, %v5815_v8  ;;  %v5819_v41 = vld [vmem:[#allocation121_spill] sm:$0xff]  ;;  %v4583_v8 = vmul.f32 %v4007_v54, %v5823_v22  ;;  %v5825_v46 = vld [vmem:[#allocation123_spill] sm:$0xff] }
 0x1f0   :  { %5806 = vst [vmem:[#allocation112_spill] sm:$0xff] %v4539_v33  ;;  %5812 = vst [vmem:[#allocation117_spill] sm:$0xff] %v4555_v14  ;;  %v5817_v33 = vld [vmem:[#allocation119_spill] sm:$0xff]  ;;  %v4575_v59 = vmul.f32 %v3800_v2, %v5819_v41  ;;  %v5821_v14 = vld [vmem:[#allocation120_spill] sm:$0xff] }
 0x1f1   :  { %5814 = vst [vmem:[#allocation116_spill] sm:$0xff] %v4559_v63  ;;  %5816 = vst [vmem:[#allocation118_spill] sm:$0xff] %v4563_v20  ;;  %v4571_v19 = vmul.f32 %v3796_v0, %v5817_v33  ;;  %v4579_v51 = vmul.f32 %v4003_v11, %v5821_v14  ;;  %v4587_v20 = vmul.f32 %v3891_v27, %v5825_v46  ;;  %v5827_v63 = vld [vmem:[#allocation125_spill] sm:$0xff]  ;;  %v5829_v33 = vld [vmem:[#allocation124_spill] sm:$0xff] }
 0x1f2   :  { %5820 = vst [vmem:[#allocation121_spill] sm:$0xff] %v4575_v59  ;;  %5824 = vst [vmem:[#allocation122_spill] sm:$0xff] %v4583_v8  ;;  %v4591_v0 = vmul.f32 %v3895_v26, %v5827_v63  ;;  %v4595_v2 = vmul.f32 %v4003_v11, %v5829_v33  ;;  %v5831_v41 = vld [vmem:[#allocation126_spill] sm:$0xff]  ;;  %v5833_v59 = vld [vmem:[#allocation127_spill] sm:$0xff] }
 0x1f3   :  { %5818 = vst [vmem:[#allocation119_spill] sm:$0xff] %v4571_v19  ;;  %5822 = vst [vmem:[#allocation120_spill] sm:$0xff] %v4579_v51  ;;  %v4599_v14 = vmul.f32 %v4007_v54, %v5831_v41  ;;  %v4603_v22 = vmul.f32 %v3891_v27, %v5833_v59  ;;  %v5835_v19 = vld [vmem:[#allocation129_spill] sm:$0xff]  ;;  %v4619_v41 = vpop.f32.mrb[116].mxu0  ;;  %v5854_v8 = vld [vmem:[#allocation138_spill] sm:$0xff] }
 0x1f4   :  { %5826 = vst [vmem:[#allocation123_spill] sm:$0xff] %v4587_v20  ;;  %5828 = vst [vmem:[#allocation125_spill] sm:$0xff] %v4591_v0  ;;  %v4607_v46 = vmul.f32 %v3895_v26, %v5835_v19  ;;  %v5837_v20 = vld [vmem:[#allocation128_spill] sm:$0xff]  ;;  %v5839_v0 = vld [vmem:[#allocation130_spill] sm:$0xff] }
 0x1f5   :  { %5830 = vst [vmem:[#allocation124_spill] sm:$0xff] %v4595_v2  ;;  %5832 = vst [vmem:[#allocation126_spill] sm:$0xff] %v4599_v14  ;;  %v4611_v63 = vmul.f32 %v4003_v11, %v5837_v20  ;;  %v4615_v33 = vmul.f32 %v4007_v54, %v5839_v0  ;;  %v4617_v2 = vpop.f32.mrb[116].mxu1  ;;  %v5841_v14 = vld [vmem:[#allocation131_spill] sm:$0xff]  ;;  %v5847_v20 = vld [vmem:[#allocation134_spill] sm:$0xff] }
 0x1f6   :  { %5834 = vst [vmem:[#allocation127_spill] sm:$0xff] %v4603_v22  ;;  %5836 = vst [vmem:[#allocation129_spill] sm:$0xff] %v4607_v46  ;;  %v4623_v59 = vmul.f32 %v3891_v27, %v5841_v14  ;;  %v5843_v22 = vld [vmem:[#allocation133_spill] sm:$0xff]  ;;  %v5845_v46 = vld [vmem:[#allocation132_spill] sm:$0xff]  ;;  %v4635_v54 = vmul.f32 %v4095_v61, %v5847_v20  ;;  %v4637_v0 = vpop.f32.mrb[117].mxu1  ;;  %v4655_v20 = vmul.f32 %v4095_v61, %v5854_v8 }
 0x1f7   :  { %5838 = vst [vmem:[#allocation128_spill] sm:$0xff] %v4611_v63  ;;  %5840 = vst [vmem:[#allocation130_spill] sm:$0xff] %v4615_v33  ;;  %v4627_v19 = vmul.f32 %v3895_v26, %v5843_v22  ;;  %v4631_v11 = vmul.f32 %v4091_v55, %v5845_v46  ;;  %v4639_v33 = vpop.f32.mrb[117].mxu0  ;;  %v5849_v63 = vld [vmem:[#allocation135_spill] sm:$0xff]  ;;  %v5855_v51 = vld [vmem:[#allocation140_spill] sm:$0xff] }
 0x1f8   :  { %5842 = vst [vmem:[#allocation131_spill] sm:$0xff] %v4623_v59  ;;  %5848 = vst [vmem:[#allocation134_spill] sm:$0xff] %v4635_v54  ;;  %v4643_v14 = vmul.f32 %v3891_v27, %v5849_v63  ;;  %v5851_v59 = vld [vmem:[#allocation137_spill] sm:$0xff]  ;;  %v4659_v54 = vmul.f32 %v3983_v9, %v5855_v51 }
 0x1f9   :  { %5844 = vst [vmem:[#allocation133_spill] sm:$0xff] %v4627_v19  ;;  %5846 = vst [vmem:[#allocation132_spill] sm:$0xff] %v4631_v11  ;;  %v4647_v22 = vmul.f32 %v3895_v26, %v5851_v59  ;;  %v5853_v19 = vld [vmem:[#allocation136_spill] sm:$0xff]  ;;  %v5857_v11 = vld [vmem:[#allocation142_spill] sm:$0xff] }
 0x1fa   :  { %5850 = vst [vmem:[#allocation135_spill] sm:$0xff] %v4643_v14  ;;  %v4651_v46 = vmul.f32 %v4091_v55, %v5853_v19  ;;  %5856 = vst [vmem:[#allocation136_spill] sm:$0xff] %v4659_v54  ;;  %v4663_v27 = vmul.f32 %v3987_v37, %v5857_v11  ;;  %v5859_v63 = vld [vmem:[#allocation141_spill] sm:$0xff]  ;;  %v5861_v59 = vld [vmem:[#allocation143_spill] sm:$0xff] }
 0x1fb   :  { %5852 = vst [vmem:[#allocation137_spill] sm:$0xff] %v4647_v22  ;;  %v4667_v26 = vmul.f32 %v4091_v55, %v5859_v63  ;;  %v4671_v19 = vmul.f32 %v4095_v61, %v5861_v59  ;;  %v5863_v22 = vld [vmem:[#allocation144_spill] sm:$0xff]  ;;  %v5865_v14 = vld [vmem:[#allocation146_spill] sm:$0xff]  ;;  %v5867_v54 = vld [vmem:[#allocation145_spill] sm:$0xff]  ;;  %v4691_v59 = vpop.f32.mrb[118].mxu0 }
 0x1fc   :  { %5858 = vst [vmem:[#allocation138_spill] sm:$0xff] %v4663_v27  ;;  %v4675_v8 = vmul.f32 %v3983_v9, %v5863_v22  ;;  %v4679_v51 = vmul.f32 %v3987_v37, %v5865_v14  ;;  %v4683_v11 = vmul.f32 %v4091_v55, %v5867_v54  ;;  %v5869_v27 = vld [vmem:[#allocation147_spill] sm:$0xff]  ;;  %v5877_v54 = vld [vmem:[#allocation154_spill] sm:$0xff] }
 0x1fd   :  { %5860 = vst [vmem:[#allocation140_spill] sm:$0xff] %v4667_v26  ;;  %5862 = vst [vmem:[#allocation142_spill] sm:$0xff] %v4671_v19  ;;  %v4687_v63 = vmul.f32 %v4095_v61, %v5869_v27  ;;  %v4689_v26 = vpop.f32.mrb[118].mxu1  ;;  %v5872_v19 = vld [vmem:[#allocation151_spill] sm:$0xff]  ;;  %v4707_v61 = vmul.f32 %v4183_v39, %v5877_v54 }
 0x1fe   :  { %5864 = vst [vmem:[#allocation141_spill] sm:$0xff] %v4675_v8  ;;  %5866 = vst [vmem:[#allocation143_spill] sm:$0xff] %v4679_v51  ;;  %v4695_v22 = vmul.f32 %v3983_v9, %v5872_v19  ;;  %v5874_v8 = vld [vmem:[#allocation153_spill] sm:$0xff]  ;;  %v5876_v51 = vld [vmem:[#allocation152_spill] sm:$0xff]  ;;  %v4709_v27 = vpop.f32.mrb[119].mxu1 }
 0x1ff   :  { %5868 = vst [vmem:[#allocation144_spill] sm:$0xff] %v4683_v11  ;;  %5870 = vst [vmem:[#allocation146_spill] sm:$0xff] %v4687_v63  ;;  %v4699_v14 = vmul.f32 %v3987_v37, %v5874_v8  ;;  %v4703_v55 = vmul.f32 %v4179_v5, %v5876_v51  ;;  %v5879_v63 = vld [vmem:[#allocation162_spill] sm:$0xff]  ;;  %v5884_v11 = vld [vmem:[#allocation169_spill] sm:$0xff] }
 0x200   :  { %5871 = vst [vmem:[#allocation145_spill] sm:$0xff] %v4689_v26  ;;  %5873 = vst [vmem:[#allocation147_spill] sm:$0xff] %v4695_v22  ;;  %v4711_v26 = vpop.f32.mrb[119].mxu0  ;;  %v4715_v19 = vmul.f32 %v3983_v9, %v5879_v63  ;;  %v5881_v22 = vld [vmem:[#allocation168_spill] sm:$0xff]  ;;  %v4727_v54 = vmul.f32 %v4183_v39, %v5884_v11  ;;  %v4735_v9 = vmul.f32 %v4079_v3, %v3769_v56 }
 0x201   :  { %5875 = vst [vmem:[#allocation151_spill] sm:$0xff] %v4699_v14  ;;  %5878 = vst [vmem:[#allocation153_spill] sm:$0xff] %v4709_v27  ;;  %v4719_v8 = vmul.f32 %v3987_v37, %v5881_v22  ;;  %v5883_v14 = vld [vmem:[#allocation163_spill] sm:$0xff]  ;;  %v4731_v27 = vmul.f32 %v4075_v48, %v3751_v42  ;;  %v5887_v63 = vld [vmem:[#allocation180_spill] sm:$0xff]  ;;  %v4743_v22 = vmul.f32 %v4183_v39, %v3771_v4  ;;  %v4763_v4 = vpop.f32.mrb[120].mxu0 }
 0x202   :  { %5880 = vst [vmem:[#allocation152_spill] sm:$0xff] %v4715_v19  ;;  %v4723_v51 = vmul.f32 %v4179_v5, %v5883_v14  ;;  %5886 = vst [vmem:[#allocation168_spill] sm:$0xff] %v4735_v9  ;;  %v4739_v37 = vmul.f32 %v4179_v5, %v5887_v63  ;;  %v4747_v11 = vmul.f32 %v4075_v48, %v3817_v58  ;;  %v4761_v63 = vpop.f32.mrb[120].mxu1 }
 0x203   :  { %5882 = vst [vmem:[#allocation154_spill] sm:$0xff] %v4719_v8  ;;  %5885 = vst [vmem:[#allocation162_spill] sm:$0xff] %v4731_v27  ;;  %v4751_v42 = vmul.f32 %v4079_v3, %v3835_v53  ;;  %v4755_v56 = vmul.f32 %v4179_v5, %v3819_v44  ;;  %v4759_v14 = vmul.f32 %v4183_v39, %v3837_v1  ;;  %v4781_v39 = vpop.f32.mrb[121].mxu1  ;;  %v4783_v5 = vpop.f32.mrb[121].mxu0 }
 0x204   :  { %5888 = vst [vmem:[#allocation163_spill] sm:$0xff] %v4747_v11  ;;  %5890 = vst [vmem:[#allocation180_spill] sm:$0xff] %v4761_v63  ;;  %v4767_v58 = vmul.f32 %v4075_v48, %v3897_v24  ;;  %v4771_v53 = vmul.f32 %v4079_v3, %v3917_v21  ;;  %v4775_v44 = vmul.f32 %v4273_v36, %v3899_v28  ;;  %v4833_v19 = vpop.f32.mrb[122].mxu1  ;;  %v5907_v63 = vld [vmem:[#allocation42_spill] sm:$0xff]  ;;  %v5922_v11 = vld [vmem:[#allocation59_spill] sm:$0xff] }
 0x205   :  { %5889 = vst [vmem:[#allocation169_spill] sm:$0xff] %v4751_v42  ;;  %v4779_v1 = vmul.f32 %v4277_v10, %v3919_v13  ;;  %5893 = vst [vmem:[#allocation217_spill] sm:$0xff] %v4781_v39  ;;  %v4787_v24 = vmul.f32 %v4075_v48, %v3969_v30  ;;  %v4791_v21 = vmul.f32 %v4079_v3, %v3989_v43  ;;  %v5898_v48 = vld [vmem:[#allocation165_spill] sm:$0xff]  ;;  %v5899_v3 = vld [vmem:[#allocation28_spill] sm:$0xff] }
 0x206   :  { %5891 = vst [vmem:[#allocation215_spill] sm:$0xff] %v4767_v58  ;;  %5892 = vst [vmem:[#allocation216_spill] sm:$0xff] %v4771_v53  ;;  %v4795_v28 = vmul.f32 %v4273_v36, %v3971_v34  ;;  %v4799_v13 = vmul.f32 %v4277_v10, %v3991_v40  ;;  %v4803_v8 = vmul.f32 %v4163_v25, %v4041_v23  ;;  %v5904_v39 = vld [vmem:[#allocation34_spill] sm:$0xff] }
 0x207   :  { %5894 = vst [vmem:[#allocation218_spill] sm:$0xff] %v4787_v24  ;;  %5895 = vst [vmem:[#allocation219_spill] sm:$0xff] %v4791_v21  ;;  %v4807_v30 = vmul.f32 %v4167_v7, %v4061_v17  ;;  %v4811_v43 = vmul.f32 %v4273_v36, %v4043_v31  ;;  %v4815_v34 = vmul.f32 %v4277_v10, %v5898_v48  ;;  %v5901_v21 = vld [vmem:[#allocation32_spill] sm:$0xff]  ;;  %v5903_v24 = vld [vmem:[#allocation29_spill] sm:$0xff]  ;;  %v1002_v48 = vpop.f32.mrb[122].mxu0 }
 0x208   :  { %5896 = vst [vmem:[#allocation220_spill] sm:$0xff] %v4803_v8  ;;  %v4819_v40 = vmul.f32 %v4163_v25, %v5899_v3  ;;  %v4823_v23 = vmul.f32 %v4167_v7, %v5901_v21  ;;  %v4827_v17 = vmul.f32 %v4273_v36, %v5903_v24  ;;  %v4831_v31 = vmul.f32 %v4277_v10, %v5904_v39  ;;  %v5909_v3 = vld [vmem:[#allocation46_spill] sm:$0xff]  ;;  %v5911_v21 = vld [vmem:[#allocation43_spill] sm:$0xff]  ;;  %v4851_v10 = vpop.f32.mrb[123].mxu1  ;;  %v1004_v39 = vpop.f32.mrb[123].mxu0 }
 0x209   :  { %5897 = vst [vmem:[#allocation221_spill] sm:$0xff] %v4807_v30  ;;  %5906 = vst [vmem:[#allocation29_spill] sm:$0xff] %v4833_v19  ;;  %v4837_v53 = vmul.f32 %v4163_v25, %v5907_v63  ;;  %v4841_v58 = vmul.f32 %v4167_v7, %v5909_v3  ;;  %v5912_v36 = vld [vmem:[#allocation47_spill] sm:$0xff]  ;;  %v5914_v19 = vld [vmem:[#allocation56_spill] sm:$0xff] }
 0x20a   :  { %5900 = vst [vmem:[#allocation165_spill] sm:$0xff] %v4819_v40  ;;  %5902 = vst [vmem:[#allocation28_spill] sm:$0xff] %v4823_v23  ;;  %v4845_v23 = vmul.f32 %v4363_v62, %v5911_v21  ;;  %v4849_v24 = vmul.f32 %v4367_v49, %v5912_v36  ;;  %v4855_v40 = vmul.f32 %v4163_v25, %v5914_v19  ;;  %v5916_v63 = vld [vmem:[#allocation61_spill] sm:$0xff]  ;;  %v5918_v3 = vld [vmem:[#allocation170_spill] sm:$0xff] }
 0x20b   :  { %5905 = vst [vmem:[#allocation32_spill] sm:$0xff] %v4831_v31  ;;  %5908 = vst [vmem:[#allocation34_spill] sm:$0xff] %v4837_v53  ;;  %v4859_v53 = vmul.f32 %v4167_v7, %v5916_v63  ;;  %v5919_v21 = vld [vmem:[#allocation171_spill] sm:$0xff]  ;;  %v5920_v36 = vld [vmem:[#allocation58_spill] sm:$0xff]  ;;  %v4875_v25 = vmul.f32 %v5922_v11, %v4341_v15  ;;  %v4879_v7 = vmul.f32 %v4363_v62, %v4331_v29 }
 0x20c   :  { %5910 = vst [vmem:[#allocation42_spill] sm:$0xff] %v4841_v58  ;;  %5913 = vst [vmem:[#allocation46_spill] sm:$0xff] %v4851_v10  ;;  %v4863_v58 = vmul.f32 %v4363_v62, %v5918_v3  ;;  %v4867_v42 = vmul.f32 %v4367_v49, %v5919_v21  ;;  %v4871_v10 = vmul.f32 %v5920_v36, %v4329_v47  ;;  %v5924_v19 = vld [vmem:[#allocation173_spill] sm:$0xff]  ;;  %v5927_v21 = vld [vmem:[#allocation84_spill] sm:$0xff] }
 0x20d   :  { %5915 = vst [vmem:[#allocation43_spill] sm:$0xff] %v4855_v40  ;;  %5917 = vst [vmem:[#allocation47_spill] sm:$0xff] %v4859_v53  ;;  %v4883_v63 = vmul.f32 %v4367_v49, %v5924_v19  ;;  %v4887_v3 = vmul.f32 %v5920_v36, %v4401_v45  ;;  %v4891_v47 = vmul.f32 %v5922_v11, %v4421_v18  ;;  %v1404_v53 = vpop.f32.mrb[124].mxu1  ;;  %v1008_v40 = vpop.f32.mrb[124].mxu0  ;;  %v5932_v18 = vld [vmem:[#allocation183_spill] sm:$0xff]  ;;  %v5960_v8 = vld [vmem:[#allocation190_spill] sm:$0xff] }
 0x20e   :  { %5921 = vst [vmem:[#allocation56_spill] sm:$0xff] %v4871_v10  ;;  %5923 = vst [vmem:[#allocation61_spill] sm:$0xff] %v4875_v25  ;;  %v4895_v15 = vmul.f32 %v4363_v62, %v5927_v21  ;;  %v4899_v29 = vmul.f32 %v4367_v49, %v4423_v60  ;;  %v4903_v19 = vmul.f32 %v5920_v36, %v4473_v38  ;;  %v1406_v21 = vpop.f32.mrb[125].mxu1  ;;  %v1010_v25 = vpop.f32.mrb[125].mxu0  ;;  %v5935_v60 = vld [vmem:[#allocation184_spill] sm:$0xff] }
 0x20f   :  { %5925 = vst [vmem:[#allocation170_spill] sm:$0xff] %v4887_v3  ;;  %5926 = vst [vmem:[#allocation171_spill] sm:$0xff] %v4891_v47  ;;  %v4907_v45 = vmul.f32 %v5922_v11, %v4493_v32  ;;  %v1443_v47 = vadd.f32 %v5932_v18, %v1404_v53  ;;  %v5933_v3 = vld [vmem:[#allocation176_spill] sm:$0xff]  ;;  %v4916_v49 = vmul.f32 %v5920_v36, %v4545_v35  ;;  %v5939_v53 = vld [vmem:[#allocation74_spill] sm:$0xff] }
 0x210   :  { %5928 = vst [vmem:[#allocation58_spill] sm:$0xff] %v4895_v15  ;;  %5929 = vst [vmem:[#allocation59_spill] sm:$0xff] %v4899_v29  ;;  %v4912_v62 = vmul.f32 %v5933_v3, %v4475_v6  ;;  %v1444_v10 = vadd.f32 %v5935_v60, %v1406_v21  ;;  %v5936_v38 = vld [vmem:[#allocation104_spill] sm:$0xff]  ;;  %v4925_v32 = vmul.f32 %v5933_v3, %v4547_v52  ;;  %v5941_v35 = vld [vmem:[#allocation199_spill] sm:$0xff] }
 0x211   :  { %5930 = vst [vmem:[#allocation173_spill] sm:$0xff] %v4903_v19  ;;  %5931 = vst [vmem:[#allocation84_spill] sm:$0xff] %v4907_v45  ;;  %v5937_v19 = vld [vmem:[#allocation92_spill] sm:$0xff]  ;;  %v4929_v6 = vmul.f32 %v5922_v11, %v4565_v57  ;;  %v4933_v18 = vmul.f32 %v5939_v53, %v4617_v2  ;;  %v1467_v36 = vadd.f32 %v5941_v35, %v1443_v47  ;;  %v5942_v60 = vld [vmem:[#allocation75_spill] sm:$0xff]  ;;  %v1410_v45 = vpop.f32.mrb[126].mxu1  ;;  %v1014_v11 = vpop.f32.mrb[126].mxu0 }
 0x212   :  { %5934 = vst [vmem:[#allocation183_spill] sm:$0xff] %v4916_v49  ;;  %v4921_v30 = vmul.f32 %v5937_v19, %v5936_v38  ;;  %v4938_v21 = vmul.f32 %v5937_v19, %v4567_v16  ;;  %v4942_v38 = vmul.f32 %v5942_v60, %v4637_v0  ;;  %v5944_v52 = vld [vmem:[#allocation200_spill] sm:$0xff]  ;;  %v4947_v57 = vmul.f32 %v5933_v3, %v4619_v41  ;;  %v5946_v47 = vld [vmem:[#allocation5_spill] sm:$0xff]  ;;  %v5947_v16 = vld [vmem:[#allocation187_spill] sm:$0xff]  ;;  %v1412_v53 = vpop.f32.mrb[127].mxu1  ;;  %v1016_v41 = vpop.f32.mrb[127].mxu0 }
 0x213   :  { %5938 = vst [vmem:[#allocation176_spill] sm:$0xff] %v4929_v6  ;;  %5940 = vst [vmem:[#allocation184_spill] sm:$0xff] %v4933_v18  ;;  %v1468_v49 = vadd.f32 %v5944_v52, %v1444_v10  ;;  %v4951_v2 = vmul.f32 %v5937_v19, %v4639_v33  ;;  %v1491_v35 = vadd.f32 %v5946_v47, %v1467_v36  ;;  %v5950_v52 = vld [vmem:[#allocation159_spill] sm:$0xff]  ;;  %v5952_v36 = vld [vmem:[#allocation17_spill] sm:$0xff] }
 0x214   :  { %5943 = vst [vmem:[#allocation104_spill] sm:$0xff] %v4942_v38  ;;  %v1445_v6 = vadd.f32 %v5947_v16, %v1410_v45  ;;  %v4957_v0 = vmul.f32 %v5933_v3, %v4691_v59  ;;  %v4961_v10 = vmul.f32 %v5937_v19, %v4711_v26  ;;  %v5951_v38 = vld [vmem:[#allocation188_spill] sm:$0xff]  ;;  %v4967_v18 = vmul.f32 %v4523_v50, %v4763_v4  ;;  %v5953_v3 = vld [vmem:[#allocation203_spill] sm:$0xff]  ;;  %v1416_v4 = vpop.f32.mrb[128].mxu1 }
 0x215   :  { %5945 = vst [vmem:[#allocation92_spill] sm:$0xff] %v4951_v2  ;;  %v1492_v60 = vadd.f32 %v5950_v52, %v1468_v49  ;;  %v1446_v33 = vadd.f32 %v5951_v38, %v1412_v53  ;;  %v4971_v45 = vmul.f32 %v4527_v12, %v4783_v5  ;;  %v1515_v59 = vadd.f32 %v5952_v36, %v1491_v35  ;;  %v5954_v49 = vld [vmem:[#allocation16_spill] sm:$0xff]  ;;  %v1020_v35 = vpop.f32.mrb[128].mxu0  ;;  %v5958_v36 = vld [vmem:[#allocation31_spill] sm:$0xff] }
 0x216   :  { %5948 = vst [vmem:[#allocation199_spill] sm:$0xff] %v4957_v0  ;;  %5949 = vst [vmem:[#allocation200_spill] sm:$0xff] %v4961_v10  ;;  %v1469_v47 = vadd.f32 %v5953_v3, %v1445_v6  ;;  %v4976_v26 = vmul.f32 %v4523_v50, %v1002_v48  ;;  %v4979_v19 = vmul.f32 %v4527_v12, %v1004_v39  ;;  %v5955_v38 = vld [vmem:[#allocation204_spill] sm:$0xff]  ;;  %v5959_v3 = vld [vmem:[#allocation7_spill] sm:$0xff]  ;;  %v1418_v39 = vpop.f32.mrb[129].mxu1 }
 0x217   :  { %v1516_v53 = vadd.f32 %v5954_v49, %v1492_v60  ;;  %v1470_v16 = vadd.f32 %v5955_v38, %v1446_v33  ;;  %v4984_v52 = vmul.f32 %v4523_v50, %v1008_v40  ;;  %v4987_v5 = vmul.f32 %v4527_v12, %v1010_v25  ;;  %v1022_v60 = vpop.f32.mrb[129].mxu0  ;;  %v5962_v33 = vld [vmem:[#allocation33_spill] sm:$0xff]  ;;  %v5964_v10 = vld [vmem:[#allocation192_spill] sm:$0xff]  ;;  %v5988_v2 = vld [vmem:[#allocation175_spill] sm:$0xff] }
 0x218   :  { %v1539_v6 = vadd.f32 %v5958_v36, %v1515_v59  ;;  %v1493_v48 = vadd.f32 %v5959_v3, %v1469_v47  ;;  %v1447_v9 = vadd.f32 %v5960_v8, %v1416_v4  ;;  %v4993_v27 = vmul.f32 %v4523_v50, %v1014_v11  ;;  %v5963_v38 = vld [vmem:[#allocation9_spill] sm:$0xff]  ;;  %v5968_v3 = vld [vmem:[#allocation206_spill] sm:$0xff]  ;;  %v5970_v50 = vld [vmem:[#allocation51_spill] sm:$0xff] }
 0x219   :  { %5956 = vst [vmem:[#allocation5_spill] sm:$0xff] %v4984_v52  ;;  %5957 = vst [vmem:[#allocation187_spill] sm:$0xff] %v4987_v5  ;;  %v1540_v49 = vadd.f32 %v5962_v33, %v1516_v53  ;;  %v1494_v40 = vadd.f32 %v5963_v38, %v1470_v16  ;;  %v1448_v0 = vadd.f32 %v5964_v10, %v1418_v39  ;;  %v5966_v5 = vld [vmem:[#allocation50_spill] sm:$0xff]  ;;  %v5967_v36 = vld [vmem:[#allocation21_spill] sm:$0xff]  ;;  %v1422_v38 = vpop.f32.mrb[130].mxu1 }
 0x21a   :  { %5961 = vst [vmem:[#allocation159_spill] sm:$0xff] %v4993_v27  ;;  %v4999_v25 = vmul.f32 %v4527_v12, %v1016_v41  ;;  %v1563_v59 = vadd.f32 %v5966_v5, %v1539_v6  ;;  %v1517_v47 = vadd.f32 %v5967_v36, %v1493_v48  ;;  %v1471_v8 = vadd.f32 %v5968_v3, %v1447_v9  ;;  %v5969_v4 = vld [vmem:[#allocation149_spill] sm:$0xff]  ;;  %v5971_v27 = vld [vmem:[#allocation20_spill] sm:$0xff]  ;;  %v5973_v10 = vld [vmem:[#allocation150_spill] sm:$0xff]  ;;  %v5013_v12 = vpop.f32.mrb[130].mxu0 }
 0x21b   :  { %v5005_v29 = vmul.f32 %v5969_v4, %v1020_v35  ;;  %v1564_v11 = vadd.f32 %v5970_v50, %v1540_v49  ;;  %v1518_v53 = vadd.f32 %v5971_v27, %v1494_v40  ;;  %v5972_v33 = vld [vmem:[#allocation208_spill] sm:$0xff]  ;;  %v5011_v39 = vmul.f32 %v5973_v10, %v1022_v60  ;;  %v5974_v41 = vld [vmem:[#allocation69_spill] sm:$0xff]  ;;  %v5976_v9 = vld [vmem:[#allocation10_spill] sm:$0xff]  ;;  %v5019_v49 = vpop.f32.mrb[131].mxu0 }
 0x21c   :  { %5965 = vst [vmem:[#allocation188_spill] sm:$0xff] %v4999_v25  ;;  %v1472_v16 = vadd.f32 %v5972_v33, %v1448_v0  ;;  %v1587_v5 = vadd.f32 %v5974_v41, %v1563_v59  ;;  %v5975_v6 = vld [vmem:[#allocation36_spill] sm:$0xff]  ;;  %v1495_v36 = vadd.f32 %v5976_v9, %v1471_v8  ;;  %v5977_v35 = vld [vmem:[#allocation195_spill] sm:$0xff]  ;;  %v1424_v25 = vpop.f32.mrb[131].mxu1  ;;  %5978 = vst [vmem:[#allocation17_spill] sm:$0xff] %v5019_v49 }
 0x21d   :  { %v1541_v48 = vadd.f32 %v5975_v6, %v1517_v47  ;;  %v1449_v3 = vadd.f32 %v5977_v35, %v1422_v38  ;;  %v5979_v27 = vld [vmem:[#allocation68_spill] sm:$0xff]  ;;  %v5980_v0 = vld [vmem:[#allocation38_spill] sm:$0xff]  ;;  %v5981_v33 = vld [vmem:[#allocation155_spill] sm:$0xff] }
 0x21e   :  { %v1588_v40 = vadd.f32 %v5979_v27, %v1564_v11  ;;  %v1542_v50 = vadd.f32 %v5980_v0, %v1518_v53  ;;  %v1496_v60 = vadd.f32 %v5981_v33, %v1472_v16  ;;  %v5982_v52 = vld [vmem:[#allocation196_spill] sm:$0xff]  ;;  %v5983_v10 = vld [vmem:[#allocation83_spill] sm:$0xff]  ;;  %v5984_v59 = vld [vmem:[#allocation54_spill] sm:$0xff] }
 0x21f   :  { %v1450_v15 = vadd.f32 %v5982_v52, %v1424_v25  ;;  %v1611_v31 = vadd.f32 %v5983_v10, %v1587_v5  ;;  %v1565_v41 = vadd.f32 %v5984_v59, %v1541_v48  ;;  %v5985_v47 = vld [vmem:[#allocation167_spill] sm:$0xff]  ;;  %v5987_v38 = vld [vmem:[#allocation85_spill] sm:$0xff]  ;;  %v5990_v27 = vld [vmem:[#allocation212_spill] sm:$0xff] }
 0x220   :  { %v1519_v6 = vadd.f32 %v5985_v47, %v1495_v36  ;;  %v5986_v8 = vld [vmem:[#allocation211_spill] sm:$0xff]  ;;  %v1612_v35 = vadd.f32 %v5987_v38, %v1588_v40  ;;  %v1566_v49 = vadd.f32 %v5988_v2, %v1542_v50  ;;  %v5989_v4 = vld [vmem:[#allocation25_spill] sm:$0xff]  ;;  %v5991_v0 = vld [vmem:[#allocation98_spill] sm:$0xff] }
 0x221   :  { %v1473_v9 = vadd.f32 %v5986_v8, %v1449_v3  ;;  %v1520_v11 = vadd.f32 %v5989_v4, %v1496_v60  ;;  %v1474_v53 = vadd.f32 %v5990_v27, %v1450_v15  ;;  %v1635_v16 = vadd.f32 %v5991_v0, %v1611_v31  ;;  %v5992_v33 = vld [vmem:[#allocation179_spill] sm:$0xff]  ;;  %v5994_v5 = vld [vmem:[#allocation13_spill] sm:$0xff]  ;;  %v5997_v8 = vld [vmem:[#allocation40_spill] sm:$0xff] }
 0x222   :  { %v1589_v52 = vadd.f32 %v5992_v33, %v1565_v41  ;;  %v5993_v25 = vld [vmem:[#allocation39_spill] sm:$0xff]  ;;  %v5998_v38 = vld [vmem:[#allocation157_spill] sm:$0xff]  ;;  %v5999_v50 = vld [vmem:[#allocation116_spill] sm:$0xff] }
 0x223   :  { %v1543_v10 = vadd.f32 %v5993_v25, %v1519_v6  ;;  %v1497_v48 = vadd.f32 %v5994_v5, %v1473_v9  ;;  %v5995_v59 = vld [vmem:[#allocation103_spill] sm:$0xff]  ;;  %v1544_v40 = vadd.f32 %v5997_v8, %v1520_v11  ;;  %v1498_v2 = vadd.f32 %v5998_v38, %v1474_v53  ;;  %v6000_v60 = vld [vmem:[#allocation89_spill] sm:$0xff]  ;;  %v6003_v33 = vld [vmem:[#allocation118_spill] sm:$0xff] }
 0x224   :  { %v1636_v36 = vadd.f32 %v5995_v59, %v1612_v35  ;;  %v5996_v47 = vld [vmem:[#allocation71_spill] sm:$0xff]  ;;  %v1659_v4 = vadd.f32 %v5999_v50, %v1635_v16  ;;  %v1613_v15 = vadd.f32 %v6000_v60, %v1589_v52  ;;  %v6001_v27 = vld [vmem:[#allocation57_spill] sm:$0xff]  ;;  %v6004_v25 = vld [vmem:[#allocation88_spill] sm:$0xff] }
 0x225   :  { %v1590_v3 = vadd.f32 %v5996_v47, %v1566_v49  ;;  %v1567_v31 = vadd.f32 %v6001_v27, %v1543_v10  ;;  %v6002_v0 = vld [vmem:[#allocation27_spill] sm:$0xff]  ;;  %v6005_v5 = vld [vmem:[#allocation156_spill] sm:$0xff]  ;;  %v6006_v59 = vld [vmem:[#allocation158_spill] sm:$0xff] }
 0x226   :  { %v1521_v41 = vadd.f32 %v6002_v0, %v1497_v48  ;;  %v1660_v6 = vadd.f32 %v6003_v33, %v1636_v36  ;;  %v1568_v35 = vadd.f32 %v6005_v5, %v1544_v40  ;;  %v1522_v49 = vadd.f32 %v6006_v59, %v1498_v2  ;;  %v6007_v47 = vld [vmem:[#allocation132_spill] sm:$0xff]  ;;  %v6008_v8 = vld [vmem:[#allocation102_spill] sm:$0xff]  ;;  %v6010_v50 = vld [vmem:[#allocation45_spill] sm:$0xff] }
 0x227   :  { %v1614_v9 = vadd.f32 %v6004_v25, %v1590_v3  ;;  %v1683_v11 = vadd.f32 %v6007_v47, %v1659_v4  ;;  %v1637_v53 = vadd.f32 %v6008_v8, %v1613_v15  ;;  %v6009_v38 = vld [vmem:[#allocation72_spill] sm:$0xff]  ;;  %v6011_v60 = vld [vmem:[#allocation134_spill] sm:$0xff]  ;;  %v6013_v0 = vld [vmem:[#allocation77_spill] sm:$0xff] }
 0x228   :  { %v1591_v16 = vadd.f32 %v6009_v38, %v1567_v31  ;;  %v1545_v52 = vadd.f32 %v6010_v50, %v1521_v41  ;;  %v1684_v10 = vadd.f32 %v6011_v60, %v1660_v6  ;;  %v6012_v27 = vld [vmem:[#allocation106_spill] sm:$0xff]  ;;  %v1592_v36 = vadd.f32 %v6013_v0, %v1568_v35  ;;  %v6015_v25 = vld [vmem:[#allocation120_spill] sm:$0xff]  ;;  %v6016_v5 = vld [vmem:[#allocation91_spill] sm:$0xff] }
 0x229   :  { %v1638_v48 = vadd.f32 %v6012_v27, %v1614_v9  ;;  %v6014_v33 = vld [vmem:[#allocation166_spill] sm:$0xff]  ;;  %v1707_v40 = vadd.f32 %v4703_v55, %v1683_v11  ;;  %v1661_v2 = vadd.f32 %v6015_v25, %v1637_v53  ;;  %v6017_v59 = vld [vmem:[#allocation65_spill] sm:$0xff]  ;;  %v6019_v8 = vld [vmem:[#allocation95_spill] sm:$0xff] }
 0x22a   :  { %v1546_v3 = vadd.f32 %v6014_v33, %v1522_v49  ;;  %v1615_v4 = vadd.f32 %v6016_v5, %v1591_v16  ;;  %v1569_v15 = vadd.f32 %v6017_v59, %v1545_v52  ;;  %v1708_v31 = vadd.f32 %v4707_v61, %v1684_v10  ;;  %v6018_v47 = vld [vmem:[#allocation122_spill] sm:$0xff]  ;;  %v6020_v38 = vld [vmem:[#allocation64_spill] sm:$0xff]  ;;  %v6022_v11 = vld [vmem:[#allocation79_spill] sm:$0xff] }
 0x22b   :  { %v1662_v41 = vadd.f32 %v6018_v47, %v1638_v48  ;;  %v1616_v6 = vadd.f32 %v6019_v8, %v1592_v36  ;;  %v1731_v35 = vadd.f32 %v4775_v44, %v1707_v40  ;;  %v1685_v49 = vadd.f32 %v4651_v46, %v1661_v2  ;;  %v6021_v50 = vld [vmem:[#allocation108_spill] sm:$0xff]  ;;  %v6023_v60 = vld [vmem:[#allocation110_spill] sm:$0xff]  ;;  %v6024_v10 = vld [vmem:[#allocation81_spill] sm:$0xff] }
 0x22c   :  { %v1570_v9 = vadd.f32 %v6020_v38, %v1546_v3  ;;  %v1639_v55 = vadd.f32 %v6021_v50, %v1615_v4  ;;  %v1593_v53 = vadd.f32 %v6022_v11, %v1569_v15  ;;  %v1732_v16 = vadd.f32 %v4779_v1, %v1708_v31  ;;  %v6025_v36 = vld [vmem:[#allocation124_spill] sm:$0xff]  ;;  %v6026_v33 = vld [vmem:[#allocation94_spill] sm:$0xff]  ;;  %v6028_v2 = vld [vmem:[#allocation99_spill] sm:$0xff] }
 0x22d   :  { %v1686_v52 = vadd.f32 %v4655_v20, %v1662_v41  ;;  %v1640_v61 = vadd.f32 %v6023_v60, %v1616_v6  ;;  %v1755_v48 = vadd.f32 %v4845_v23, %v1731_v35  ;;  %v1709_v0 = vadd.f32 %v4723_v51, %v1685_v49  ;;  %v6027_v25 = vld [vmem:[#allocation126_spill] sm:$0xff]  ;;  %v6029_v59 = vld [vmem:[#allocation140_spill] sm:$0xff] }
 0x22e   :  { %v1594_v27 = vadd.f32 %v6024_v10, %v1570_v9  ;;  %v1663_v44 = vadd.f32 %v6025_v36, %v1639_v55  ;;  %v1617_v46 = vadd.f32 %v6026_v33, %v1593_v53  ;;  %v1756_v3 = vadd.f32 %v4849_v24, %v1732_v16  ;;  %v6030_v15 = vld [vmem:[#allocation112_spill] sm:$0xff]  ;;  %v6031_v41 = vld [vmem:[#allocation142_spill] sm:$0xff] }
 0x22f   :  { %v1710_v40 = vadd.f32 %v4727_v54, %v1686_v52  ;;  %v1664_v1 = vadd.f32 %v6027_v25, %v1640_v61  ;;  %v1779_v5 = vadd.f32 %v4912_v62, %v1755_v48  ;;  %v1733_v4 = vadd.f32 %v4795_v28, %v1709_v0  ;;  %v6032_v8 = vld [vmem:[#allocation114_spill] sm:$0xff]  ;;  %v6033_v9 = vld [vmem:[#allocation128_spill] sm:$0xff]  ;;  %v6037_v61 = vld [vmem:[#allocation189_spill] sm:$0xff] }
 0x230   :  { %v1618_v20 = vadd.f32 %v6028_v2, %v1594_v27  ;;  %v1687_v23 = vadd.f32 %v6029_v59, %v1663_v44  ;;  %v1641_v51 = vadd.f32 %v6030_v15, %v1617_v46  ;;  %v1780_v31 = vadd.f32 %v4921_v30, %v1756_v3  ;;  %v6034_v50 = vld [vmem:[#allocation130_spill] sm:$0xff]  ;;  %v6035_v53 = vld [vmem:[#allocation144_spill] sm:$0xff]  ;;  %v6038_v27 = vld [vmem:[#allocation191_spill] sm:$0xff] }
 0x231   :  { %v1734_v47 = vadd.f32 %v4799_v13, %v1710_v40  ;;  %v1688_v24 = vadd.f32 %v6031_v41, %v1664_v1  ;;  %v1757_v6 = vadd.f32 %v4863_v58, %v1733_v4  ;;  %v1803_v28 = vadd.f32 %v4967_v18, %v1779_v5  ;;  %v6036_v52 = vld [vmem:[#allocation146_spill] sm:$0xff]  ;;  %v6039_v0 = vld [vmem:[#allocation205_spill] sm:$0xff]  ;;  %v6042_v33 = vld [vmem:[#allocation32_spill] sm:$0xff] }
 0x232   :  { %v1642_v54 = vadd.f32 %v6032_v8, %v1618_v20  ;;  %v1711_v38 = vadd.f32 %v4739_v37, %v1687_v23  ;;  %v1665_v62 = vadd.f32 %v6033_v9, %v1641_v51  ;;  %v1804_v13 = vadd.f32 %v4971_v45, %v1780_v31  ;;  %v6045_v40 = vld [vmem:[#allocation150_spill] sm:$0xff]  ;;  %v6047_v2 = vld [vmem:[#allocation5_spill] sm:$0xff]  ;;  %v6048_v20 = vld [vmem:[#allocation8_spill] sm:$0xff] }
 0x233   :  { %v1758_v35 = vadd.f32 %v4867_v42, %v1734_v47  ;;  %v1712_v49 = vadd.f32 %v4743_v22, %v1688_v24  ;;  %v1781_v55 = vadd.f32 %v4925_v32, %v1757_v6  ;;  %v1827_v37 = vadd.f32 %v5005_v29, %v1803_v28  ;;  %v6046_v25 = vld [vmem:[#allocation58_spill] sm:$0xff]  ;;  %v6049_v4 = vld [vmem:[#allocation59_spill] sm:$0xff]  ;;  %v6053_v24 = vld [vmem:[#allocation181_spill] sm:$0xff] }
 0x234   :  { %v1666_v30 = vadd.f32 %v6034_v50, %v1642_v54  ;;  %v1735_v11 = vadd.f32 %v4811_v43, %v1711_v38  ;;  %v1689_v58 = vadd.f32 %v6035_v53, %v1665_v62  ;;  %v1828_v22 = vadd.f32 %v5011_v39, %v1804_v13  ;;  %v6050_v23 = vld [vmem:[#allocation187_spill] sm:$0xff]  ;;  %v6054_v54 = vld [vmem:[#allocation22_spill] sm:$0xff]  ;;  %v6055_v38 = vld [vmem:[#allocation193_spill] sm:$0xff] }
 0x235   :  { %v1782_v16 = vadd.f32 %v4938_v21, %v1758_v35  ;;  %v1736_v18 = vadd.f32 %v4815_v34, %v1712_v49  ;;  %v1805_v32 = vadd.f32 %v4976_v26, %v1781_v55  ;;  %v1851_v43 = vadd.f32 %v6037_v61, %v1827_v37  ;;  %v6041_v26 = vld [vmem:[#allocation92_spill] sm:$0xff]  ;;  %v6051_v15 = vld [vmem:[#allocation11_spill] sm:$0xff]  ;;  %v6057_v35 = vld [vmem:[#allocation182_spill] sm:$0xff] }
 0x236   :  { %v1690_v42 = vadd.f32 %v6036_v52, %v1666_v30  ;;  %v1759_v60 = vadd.f32 %v4879_v7, %v1735_v11  ;;  %v1713_v45 = vadd.f32 %v4755_v56, %v1689_v58  ;;  %v1852_v34 = vadd.f32 %v6038_v27, %v1828_v22  ;;  %v6040_v56 = vld [vmem:[#allocation149_spill] sm:$0xff]  ;;  %v6052_v47 = vld [vmem:[#allocation199_spill] sm:$0xff]  ;;  %v6056_v62 = vld [vmem:[#allocation200_spill] sm:$0xff] }
 0x237   :  { %v1760_v10 = vadd.f32 %v4883_v63, %v1736_v18  ;;  %v1806_v21 = vadd.f32 %v4979_v19, %v1782_v16  ;;  %v1875_v7 = vadd.f32 %v6039_v0, %v1851_v43  ;;  %v1821_v36 = vmul.f32 %v6040_v56, %v5013_v12  ;;  %v6043_v63 = vld [vmem:[#allocation207_spill] sm:$0xff]  ;;  %v6059_v13 = vld [vmem:[#allocation194_spill] sm:$0xff]  ;;  %v6060_v11 = vld [vmem:[#allocation197_spill] sm:$0xff] }
 0x238   :  { %v1714_v29 = vadd.f32 %v4759_v14, %v1690_v42  ;;  %v1783_v48 = vadd.f32 %v4947_v57, %v1759_v60  ;;  %v1737_v39 = vadd.f32 %v4827_v17, %v1713_v45  ;;  %v1876_v3 = vadd.f32 %v6043_v63, %v1852_v34  ;;  %v6044_v14 = vld [vmem:[#allocation17_spill] sm:$0xff]  ;;  %v6058_v50 = vld [vmem:[#allocation23_spill] sm:$0xff]  ;;  %v6062_v16 = vld [vmem:[#allocation172_spill] sm:$0xff] }
 0x239   :  { %v1784_v44 = vadd.f32 %v6041_v26, %v1760_v10  ;;  %v1822_v19 = vmul.f32 %v6045_v40, %v6044_v14  ;;  %v1899_v17 = vadd.f32 %v6048_v20, %v1875_v7  ;;  %v1829_v5 = vadd.f32 %v1821_v36, %v1805_v32  ;;  %v6061_v58 = vld [vmem:[#allocation159_spill] sm:$0xff]  ;;  %v6063_v52 = vld [vmem:[#allocation209_spill] sm:$0xff]  ;;  %v6064_v22 = vld [vmem:[#allocation198_spill] sm:$0xff] }
 0x23a   :  { %v1738_v46 = vadd.f32 %v6042_v33, %v1714_v29  ;;  %v1761_v1 = vadd.f32 %v6046_v25, %v1737_v39  ;;  %v1807_v57 = vadd.f32 %v6047_v2, %v1783_v48  ;;  %v1900_v51 = vadd.f32 %v6051_v15, %v1876_v3  ;;  %v6065_v45 = vld [vmem:[#allocation188_spill] sm:$0xff]  ;;  %v6066_v61 = vld [vmem:[#allocation41_spill] sm:$0xff]  ;;  %v6067_v10 = vld [vmem:[#allocation210_spill] sm:$0xff] }
 0x23b   :  { %v1808_v12 = vadd.f32 %v6050_v23, %v1784_v44  ;;  %v1830_v31 = vadd.f32 %v1822_v19, %v1806_v21  ;;  %v1923_v6 = vadd.f32 %v6054_v54, %v1899_v17  ;;  %v1853_v9 = vadd.f32 %v6055_v38, %v1829_v5  ;;  %v6068_v21 = vld [vmem:[#allocation213_spill] sm:$0xff]  ;;  %v6070_v39 = vld [vmem:[#allocation55_spill] sm:$0xff]  ;;  %v6071_v7 = vld [vmem:[#allocation12_spill] sm:$0xff] }
 0x23c   :  { %v1762_v59 = vadd.f32 %v6049_v4, %v1738_v46  ;;  %v1785_v41 = vadd.f32 %v6052_v47, %v1761_v1  ;;  %v1831_v8 = vadd.f32 %v6053_v24, %v1807_v57  ;;  %v1924_v30 = vadd.f32 %v6058_v50, %v1900_v51  ;;  %v6069_v34 = vld [vmem:[#allocation185_spill] sm:$0xff]  ;;  %v6072_v36 = vld [vmem:[#allocation214_spill] sm:$0xff]  ;;  %v6074_v46 = vld [vmem:[#allocation60_spill] sm:$0xff] }
 0x23d   :  { %v1832_v49 = vadd.f32 %v6057_v35, %v1808_v12  ;;  %v1854_v55 = vadd.f32 %v6059_v13, %v1830_v31  ;;  %v1947_v18 = vadd.f32 %v6062_v16, %v1923_v6  ;;  %v1877_v42 = vadd.f32 %v6063_v52, %v1853_v9  ;;  %v6073_v44 = vld [vmem:[#allocation186_spill] sm:$0xff]  ;;  %v6075_v3 = vld [vmem:[#allocation148_spill] sm:$0xff]  ;;  %v6077_v25 = vld [vmem:[#allocation201_spill] sm:$0xff] }
 0x23e   :  { %v1786_v28 = vadd.f32 %v6056_v62, %v1762_v59  ;;  %v1855_v53 = vadd.f32 %v6060_v11, %v1831_v8  ;;  %v1809_v37 = vadd.f32 %v6061_v58, %v1785_v41  ;;  %v1948_v43 = vadd.f32 %v6066_v61, %v1924_v30  ;;  %v6076_v40 = vld [vmem:[#allocation14_spill] sm:$0xff]  ;;  %v6078_v2 = vld [vmem:[#allocation73_spill] sm:$0xff]  ;;  %v6079_v20 = vld [vmem:[#allocation24_spill] sm:$0xff] }
 0x23f   :  { %v1856_v60 = vadd.f32 %v6064_v22, %v1832_v49  ;;  %v1878_v29 = vadd.f32 %v6067_v10, %v1854_v55  ;;  %v1971_v0 = vadd.f32 %v6070_v39, %v1947_v18  ;;  %v1901_v56 = vadd.f32 %v6071_v7, %v1877_v42  ;;  %v6080_v5 = vld [vmem:[#allocation15_spill] sm:$0xff]  ;;  %v6081_v59 = vld [vmem:[#allocation202_spill] sm:$0xff]  ;;  %v6082_v12 = vld [vmem:[#allocation76_spill] sm:$0xff] }
 0x240   :  { %v1810_v32 = vadd.f32 %v6065_v45, %v1786_v28  ;;  %v1879_v27 = vadd.f32 %v6068_v21, %v1855_v53  ;;  %v1833_v48 = vadd.f32 %v6069_v34, %v1809_v37  ;;  %v1972_v63 = vadd.f32 %v6074_v46, %v1948_v43  ;;  %v6083_v51 = vld [vmem:[#allocation26_spill] sm:$0xff]  ;;  %v6084_v47 = vld [vmem:[#allocation160_spill] sm:$0xff]  ;;  %v6089_v35 = vld [vmem:[#allocation161_spill] sm:$0xff] }
 0x241   :  { %v1880_v26 = vadd.f32 %v6072_v36, %v1856_v60  ;;  %v1902_v14 = vadd.f32 %v6075_v3, %v1878_v29  ;;  %v1995_v57 = vadd.f32 %v6078_v2, %v1971_v0  ;;  %v1925_v17 = vadd.f32 %v6079_v20, %v1901_v56  ;;  %v6085_v24 = vld [vmem:[#allocation6_spill] sm:$0xff]  ;;  %v6086_v54 = vld [vmem:[#allocation164_spill] sm:$0xff]  ;;  %v6091_v13 = vld [vmem:[#allocation93_spill] sm:$0xff] }
 0x242   :  { %v1834_v33 = vadd.f32 %v6073_v44, %v1810_v32  ;;  %v1903_v19 = vadd.f32 %v6076_v40, %v1879_v27  ;;  %v1857_v1 = vadd.f32 %v6077_v25, %v1833_v48  ;;  %v1996_v15 = vadd.f32 %v6082_v12, %v1972_v63  ;;  %v6087_v38 = vld [vmem:[#allocation90_spill] sm:$0xff]  ;;  %v6090_v50 = vld [vmem:[#allocation44_spill] sm:$0xff]  ;;  %v6092_v11 = vld [vmem:[#allocation49_spill] sm:$0xff] }
 0x243   :  { %v1904_v4 = vadd.f32 %v6080_v5, %v1880_v26  ;;  %v1926_v31 = vadd.f32 %v6083_v51, %v1902_v14  ;;  %v1949_v6 = vadd.f32 %v6086_v54, %v1925_v17  ;;  %v2019_v9 = vadd.f32 %v6087_v38, %v1995_v57  ;;  %v6088_v62 = vld [vmem:[#allocation30_spill] sm:$0xff]  ;;  %v6095_v52 = vld [vmem:[#allocation107_spill] sm:$0xff]  ;;  %v6096_v22 = vld [vmem:[#allocation48_spill] sm:$0xff] }
 0x244   :  { %v1858_v23 = vadd.f32 %v6081_v59, %v1834_v33  ;;  %v1927_v41 = vadd.f32 %v6084_v47, %v1903_v19  ;;  %v1881_v8 = vadd.f32 %v6085_v24, %v1857_v1  ;;  %v2020_v55 = vadd.f32 %v6091_v13, %v1996_v15  ;;  %v6093_v58 = vld [vmem:[#allocation18_spill] sm:$0xff]  ;;  %v6097_v45 = vld [vmem:[#allocation19_spill] sm:$0xff]  ;;  %v6099_v10 = vld [vmem:[#allocation109_spill] sm:$0xff] }
 0x245   :  { %v1928_v28 = vadd.f32 %v6088_v62, %v1904_v4  ;;  %v1950_v30 = vadd.f32 %v6090_v50, %v1926_v31  ;;  %v6094_v16 = vld [vmem:[#allocation62_spill] sm:$0xff]  ;;  %v2043_v42 = vadd.f32 %v6095_v52, %v2019_v9  ;;  %v6098_v61 = vld [vmem:[#allocation63_spill] sm:$0xff]  ;;  %v6105_v44 = vld [vmem:[#allocation37_spill] sm:$0xff] }
 0x246   :  { %v1882_v49 = vadd.f32 %v6089_v35, %v1858_v23  ;;  %v1951_v53 = vadd.f32 %v6092_v11, %v1927_v41  ;;  %v1905_v37 = vadd.f32 %v6093_v58, %v1881_v8  ;;  %v1973_v18 = vadd.f32 %v6094_v16, %v1949_v6  ;;  %v6100_v21 = vld [vmem:[#allocation66_spill] sm:$0xff]  ;;  %v6101_v34 = vld [vmem:[#allocation35_spill] sm:$0xff]  ;;  %v6107_v3 = vld [vmem:[#allocation125_spill] sm:$0xff] }
 0x247   :  { %v1952_v60 = vadd.f32 %v6096_v22, %v1928_v28  ;;  %v1974_v43 = vadd.f32 %v6098_v61, %v1950_v30  ;;  %v2044_v29 = vadd.f32 %v6099_v10, %v2020_v55  ;;  %v6102_v39 = vld [vmem:[#allocation174_spill] sm:$0xff]  ;;  %v6103_v7 = vld [vmem:[#allocation123_spill] sm:$0xff]  ;;  %v6108_v40 = vld [vmem:[#allocation80_spill] sm:$0xff] }
 0x248   :  { %v1906_v32 = vadd.f32 %v6097_v45, %v1882_v49  ;;  %v1975_v27 = vadd.f32 %v6100_v21, %v1951_v53  ;;  %v1929_v48 = vadd.f32 %v6101_v34, %v1905_v37  ;;  %v1997_v0 = vadd.f32 %v6102_v39, %v1973_v18  ;;  %v6104_v36 = vld [vmem:[#allocation67_spill] sm:$0xff]  ;;  %v6106_v46 = vld [vmem:[#allocation78_spill] sm:$0xff]  ;;  %v6109_v25 = vld [vmem:[#allocation53_spill] sm:$0xff] }
 0x249   :  { %v2067_v56 = vadd.f32 %v6103_v7, %v2043_v42  ;;  %v1976_v26 = vadd.f32 %v6104_v36, %v1952_v60  ;;  %v1998_v63 = vadd.f32 %v6106_v46, %v1974_v43  ;;  %v2068_v14 = vadd.f32 %v6107_v3, %v2044_v29  ;;  %v6110_v2 = vld [vmem:[#allocation136_spill] sm:$0xff]  ;;  %v6111_v20 = vld [vmem:[#allocation178_spill] sm:$0xff]  ;;  %v6116_v47 = vld [vmem:[#allocation177_spill] sm:$0xff]  ;;  %v2202_v36 = vpop.permute.xlu0 %2201 }
 0x24a   :  { %v1930_v33 = vadd.f32 %v6105_v44, %v1906_v32  ;;  %v1999_v19 = vadd.f32 %v6108_v40, %v1975_v27  ;;  %v1953_v1 = vadd.f32 %v6109_v25, %v1929_v48  ;;  %v2021_v17 = vadd.f32 %v6111_v20, %v1997_v0  ;;  %v6112_v5 = vld [vmem:[#allocation82_spill] sm:$0xff]  ;;  %v6113_v59 = vld [vmem:[#allocation52_spill] sm:$0xff]  ;;  %v6118_v54 = vld [vmem:[#allocation111_spill] sm:$0xff] }
 0x24b   :  { %v2091_v57 = vadd.f32 %v6110_v2, %v2067_v56  ;;  %v2000_v4 = vadd.f32 %v6112_v5, %v1976_v26  ;;  %v6114_v12 = vld [vmem:[#allocation138_spill] sm:$0xff]  ;;  %v6115_v51 = vld [vmem:[#allocation96_spill] sm:$0xff]  ;;  %v6119_v38 = vld [vmem:[#allocation97_spill] sm:$0xff] }
 0x24c   :  { %v1954_v23 = vadd.f32 %v6113_v59, %v1930_v33  ;;  %v2092_v15 = vadd.f32 %v6114_v12, %v2068_v14  ;;  %v2022_v31 = vadd.f32 %v6115_v51, %v1998_v63  ;;  %v1977_v41 = vadd.f32 %v6116_v47, %v1953_v1  ;;  %v6117_v24 = vld [vmem:[#allocation162_spill] sm:$0xff]  ;;  %v6121_v35 = vld [vmem:[#allocation168_spill] sm:$0xff]  ;;  %v6122_v50 = vld [vmem:[#allocation113_spill] sm:$0xff] }
 0x24d   :  { %v2115_v8 = vadd.f32 %v6117_v24, %v2091_v57  ;;  %v2045_v6 = vadd.f32 %v6118_v54, %v2021_v17  ;;  %v2023_v9 = vadd.f32 %v6119_v38, %v1999_v19  ;;  %v6120_v62 = vld [vmem:[#allocation70_spill] sm:$0xff]  ;;  %v6123_v13 = vld [vmem:[#allocation100_spill] sm:$0xff]  ;;  %v6125_v58 = vld [vmem:[#allocation127_spill] sm:$0xff] }
 0x24e   :  { %v1978_v28 = vadd.f32 %v6120_v62, %v1954_v23  ;;  %v2116_v49 = vadd.f32 %v6121_v35, %v2092_v15  ;;  %v2046_v30 = vadd.f32 %v6122_v50, %v2022_v31  ;;  %v2024_v55 = vadd.f32 %v6123_v13, %v2000_v4  ;;  %v6124_v11 = vld [vmem:[#allocation220_spill] sm:$0xff]  ;;  %v6126_v16 = vld [vmem:[#allocation115_spill] sm:$0xff]  ;;  %v6127_v52 = vld [vmem:[#allocation86_spill] sm:$0xff] }
 0x24f   :  { %v2139_v53 = vadd.f32 %v6124_v11, %v2115_v8  ;;  %v2069_v37 = vadd.f32 %v6125_v58, %v2045_v6  ;;  %v2047_v18 = vadd.f32 %v6126_v16, %v2023_v9  ;;  %v2001_v42 = vadd.f32 %v6127_v52, %v1977_v41  ;;  %v6128_v22 = vld [vmem:[#allocation221_spill] sm:$0xff]  ;;  %v6131_v10 = vld [vmem:[#allocation87_spill] sm:$0xff]  ;;  %v6132_v21 = vld [vmem:[#allocation56_spill] sm:$0xff] }
 0x250   :  { %v2140_v60 = vadd.f32 %v6128_v22, %v2116_v49  ;;  %v6129_v45 = vld [vmem:[#allocation129_spill] sm:$0xff]  ;;  %v2002_v29 = vadd.f32 %v6131_v10, %v1978_v28  ;;  %v6134_v39 = vld [vmem:[#allocation131_spill] sm:$0xff]  ;;  %v6140_v19 = vld [vmem:[#allocation184_spill] sm:$0xff] }
 0x251   :  { %v2070_v32 = vadd.f32 %v6129_v45, %v2046_v30  ;;  %v6130_v61 = vld [vmem:[#allocation117_spill] sm:$0xff]  ;;  %v2163_v27 = vadd.f32 %v6132_v21, %v2139_v53  ;;  %v2071_v0 = vadd.f32 %v6134_v39, %v2047_v18  ;;  %v6137_v33 = vld [vmem:[#allocation143_spill] sm:$0xff]  ;;  %v6144_v4 = vld [vmem:[#allocation104_spill] sm:$0xff] }
 0x252   :  { %v2048_v43 = vadd.f32 %v6130_v61, %v2024_v55  ;;  %v6133_v34 = vld [vmem:[#allocation141_spill] sm:$0xff]  ;;  %v6141_v1 = vld [vmem:[#allocation163_spill] sm:$0xff]  ;;  %v6149_v24 = vld [vmem:[#allocation74_spill] sm:$0xff] }
 0x253   :  { %v2093_v48 = vadd.f32 %v6133_v34, %v2069_v37  ;;  %v6135_v7 = vld [vmem:[#allocation101_spill] sm:$0xff]  ;;  %v2094_v46 = vadd.f32 %v6137_v33, %v2070_v32  ;;  %v2187_v25 = vadd.f32 %v6140_v19, %v2163_v27  ;;  %v6142_v57 = vld [vmem:[#allocation147_spill] sm:$0xff]  ;;  %v6155_v30 = vld [vmem:[#allocation28_spill] sm:$0xff] }
 0x254   :  { %v2025_v56 = vadd.f32 %v6135_v7, %v2001_v42  ;;  %v6136_v26 = vld [vmem:[#allocation61_spill] sm:$0xff]  ;;  %v2095_v20 = vadd.f32 %v6142_v57, %v2071_v0  ;;  %v6143_v17 = vld [vmem:[#allocation119_spill] sm:$0xff]  ;;  %v6156_v55 = vld [vmem:[#allocation216_spill] sm:$0xff] }
 0x255   :  { %v2164_v44 = vadd.f32 %v6136_v26, %v2140_v60  ;;  %v6138_v63 = vld [vmem:[#allocation133_spill] sm:$0xff]  ;;  %v2117_v2 = vadd.f32 %v6141_v1, %v2093_v48  ;;  %v6146_v15 = vld [vmem:[#allocation151_spill] sm:$0xff]  ;;  %v6158_v37 = vld [vmem:[#allocation180_spill] sm:$0xff]  ;;  %v2219_v39 = vadd.f32 %v2202_v36, %v2187_v25 }
 0x256   :  { %v2072_v3 = vadd.f32 %v6138_v63, %v2048_v43  ;;  %v6139_v14 = vld [vmem:[#allocation105_spill] sm:$0xff]  ;;  %v2049_v5 = vadd.f32 %v6143_v17, %v2025_v56  ;;  %v6151_v38 = vld [vmem:[#allocation215_spill] sm:$0xff]  ;;  %v2183_v16 = vmul.f32 %v6149_v24, %v6158_v37  ;;  %v6159_v18 = vld [vmem:[#allocation170_spill] sm:$0xff]  ;;  %v2207_v43 = vpop.permute.xlu0 %2206 }
 0x257   :  { %v2026_v40 = vadd.f32 %v6139_v14, %v2002_v29  ;;  %v2188_v59 = vadd.f32 %v6144_v4, %v2164_v44  ;;  %v6145_v23 = vld [vmem:[#allocation169_spill] sm:$0xff]  ;;  %v2119_v9 = vadd.f32 %v6151_v38, %v2095_v20  ;;  %v6152_v62 = vld [vmem:[#allocation135_spill] sm:$0xff]  ;;  %v6160_v42 = vld [vmem:[#allocation34_spill] sm:$0xff]  ;;  %v2212_v14 = vpop.permute.xlu1 %2211 }
 0x258   :  { %v2118_v12 = vadd.f32 %v6145_v23, %v2094_v46  ;;  %v2096_v51 = vadd.f32 %v6146_v15, %v2072_v3  ;;  %v6147_v31 = vld [vmem:[#allocation121_spill] sm:$0xff]  ;;  %v2073_v28 = vadd.f32 %v6152_v62, %v2049_v5  ;;  %v6154_v49 = vld [vmem:[#allocation75_spill] sm:$0xff]  ;;  %v6161_v60 = vld [vmem:[#allocation152_spill] sm:$0xff] }
 0x259   :  { %v2050_v47 = vadd.f32 %v6147_v31, %v2026_v40  ;;  %v6148_v41 = vld [vmem:[#allocation145_spill] sm:$0xff]  ;;  %v2143_v22 = vadd.f32 %v6160_v42, %v2119_v9  ;;  %v6163_v10 = vld [vmem:[#allocation171_spill] sm:$0xff]  ;;  %v6164_v21 = vld [vmem:[#allocation42_spill] sm:$0xff]  ;;  %v2220_v46 = vadd.f32 %v2202_v36, %v2188_v59 }
 0x25a   :  { %v2181_v8 = vmul.f32 %v6149_v24, %v6148_v41  ;;  %v6150_v54 = vld [vmem:[#allocation165_spill] sm:$0xff]  ;;  %v2142_v13 = vadd.f32 %v6155_v30, %v2118_v12  ;;  %v2120_v11 = vadd.f32 %v6156_v55, %v2096_v51  ;;  %v2097_v45 = vadd.f32 %v6161_v60, %v2073_v28  ;;  %v6165_v34 = vld [vmem:[#allocation154_spill] sm:$0xff]  ;;  %v6168_v40 = vld [vmem:[#allocation84_spill] sm:$0xff] }
 0x25b   :  { %v2141_v6 = vadd.f32 %v6150_v54, %v2117_v2  ;;  %v6153_v35 = vld [vmem:[#allocation153_spill] sm:$0xff]  ;;  %v6167_v26 = vld [vmem:[#allocation218_spill] sm:$0xff]  ;;  %v6169_v1 = vld [vmem:[#allocation219_spill] sm:$0xff] }
 0x25c   :  { %v2182_v50 = vmul.f32 %v6154_v49, %v6153_v35  ;;  %v6157_v53 = vld [vmem:[#allocation137_spill] sm:$0xff]  ;;  %v2166_v29 = vadd.f32 %v6163_v10, %v2142_v13  ;;  %v2144_v27 = vadd.f32 %v6164_v21, %v2120_v11  ;;  %v2121_v44 = vadd.f32 %v6167_v26, %v2097_v45  ;;  %v2312_v63 = vld [vmem:[%s5295_s0 + $0x90] sm:$0xff]  ;;  %v2313_v36 = vld [vmem:[%s5295_s0 + $0x98] sm:$0xff] }
 0x25d   :  { %v2074_v58 = vadd.f32 %v6157_v53, %v2050_v47  ;;  %v2165_v52 = vadd.f32 %v6159_v18, %v2141_v6  ;;  %v6162_v32 = vld [vmem:[#allocation217_spill] sm:$0xff]  ;;  %v6171_v4 = vld [vmem:[#allocation43_spill] sm:$0xff]  ;;  %v6172_v23 = vld [vmem:[#allocation46_spill] sm:$0xff] }
 0x25e   :  { %v2184_v61 = vmul.f32 %v6154_v49, %v6162_v32  ;;  %v6166_v7 = vld [vmem:[#allocation173_spill] sm:$0xff]  ;;  %v2190_v3 = vadd.f32 %v2182_v50, %v2166_v29  ;;  %v2168_v19 = vadd.f32 %v6168_v40, %v2144_v27  ;;  %v2145_v59 = vadd.f32 %v6171_v4, %v2121_v44  ;;  %v6173_v47 = vld [vmem:[#allocation47_spill] sm:$0xff] }
 0x25f   :  { %v2098_v48 = vadd.f32 %v6165_v34, %v2074_v58  ;;  %v2189_v0 = vadd.f32 %v2181_v8, %v2165_v52  ;;  %v2167_v56 = vadd.f32 %v6166_v7, %v2143_v22  ;;  %v2310_v33 = vld [vmem:[%s5295_s0 + $0x80] sm:$0xff]  ;;  %v2311_v20 = vld [vmem:[%s5295_s0 + $0x88] sm:$0xff]  ;;  %v2186_v12 = vmul.f32 %v6154_v49, %v6172_v23  ;;  %v6174_v38 = vld [vmem:[#allocation183_spill] sm:$0xff]  ;;  %v2217_v58 = vpop.permute.xlu1 %2216 }
 0x260   :  { %v6170_v2 = vld [vmem:[#allocation29_spill] sm:$0xff]  ;;  %v2222_v15 = vadd.f32 %v2207_v43, %v2190_v3  ;;  %v2192_v31 = vadd.f32 %v2184_v61, %v2168_v19  ;;  %v2169_v9 = vadd.f32 %v6174_v38, %v2145_v59  ;;  %v2228_v62 = vmul.f32 %v2311_v20, %v2220_v46  ;;  %v6175_v49 = vld [vmem:[#allocation176_spill] sm:$0xff]  ;;  %v2316_v37 = vld [vmem:[%s5295_s0 + $0xb0] sm:$0xff] }
 0x261   :  { %v2122_v25 = vadd.f32 %v6169_v1, %v2098_v48  ;;  %v2185_v57 = vmul.f32 %v6149_v24, %v6170_v2  ;;  %v2221_v17 = vadd.f32 %v2207_v43, %v2189_v0  ;;  %v2191_v5 = vadd.f32 %v2183_v16, %v2167_v56  ;;  %v2314_v51 = vld [vmem:[%s5295_s0 + $0xa0] sm:$0xff]  ;;  %v2315_v54 = vld [vmem:[%s5295_s0 + $0xa8] sm:$0xff]  ;;  %v2317_v52 = vld [vmem:[%s5295_s0 + $0xb8] sm:$0xff]  ;;  %s2505_s0 = smov [#allocation2]  }
 0x262   :  { %v2227_v24 = vmul.f32 %v2310_v33, %v2219_v39  ;;  %v2230_v28 = vmul.f32 %v2313_v36, %v2222_v15  ;;  %v2224_v35 = vadd.f32 %v2212_v14, %v2192_v31  ;;  %v2504_v19 = vmov 1966171168   ;;  %s2294_s4 = sshll.u32 %s2505_s0, 4  ;;  %s2295_s4 = int_to_ptr.vmem [resolvable:$true] %s2294_s4 }
 0x263   :  { %v2146_v41 = vadd.f32 %v6173_v47, %v2122_v25  ;;  %v2229_v8 = vmul.f32 %v2312_v63, %v2221_v17  ;;  %v2223_v6 = vadd.f32 %v2212_v14, %v2191_v5  ;;  %v2193_v55 = vadd.f32 %v2185_v57, %v2169_v9  ;;  %v6176_v57 = vld [vmem:[#allocation139_spill] sm:$0xff]  ;;  %s2478_s5 = scalar_lea.vmem %s2295_s4, 32  ;;  %p2483_p1 = scmp.lt.s32.totalorder %s2295_s4, %s2295_s4 }
 0x264   :  { %v2244_v11 = vadd.f32 %v2230_v28, %v2228_v62  ;;  %v2232_v53 = vmul.f32 %v2315_v54, %v2224_v35  ;;  %v2269_v1 = vunpack.c.l.s4 %v2504_v19  ;;  %v6177_v4 = vlaneseq  ;;  %p2479_p0 = scmp.ne.s32.totalorder %s2295_s4, %s2478_s5  ;;  %p2484_p2 = scmp.lt.s32.totalorder %s2478_s5, %s2478_s5 }
 0x265   :  { %v2170_v50 = vadd.f32 %v6175_v49, %v2146_v41  ;;  %v2235_v30 = vadd.f32 %v2229_v8, %v2227_v24  ;;  %v2231_v13 = vmul.f32 %v2314_v51, %v2223_v6  ;;  %v2225_v42 = vadd.f32 %v2217_v58, %v2193_v55 }
 0x266   :  { %v2245_v22 = vadd.f32 %v2244_v11, %v2232_v53  ;;  %v2270_v25 = vunpack.c.0.s8 %v2269_v1  ;;  %vm2285_vm1 = vcmp.lt.s32.totalorder %v6177_v4, 256  ;;  %p2485_p3 = por %p2484_p2, %p2483_p1 }
 0x267   :  { %v2194_v16 = vadd.f32 %v2186_v12, %v2170_v50  ;;  %v2236_v18 = vadd.f32 %v2235_v30, %v2231_v13  ;;  %v2233_v45 = vmul.f32 %v2316_v37, %v2225_v42 }
 0x268   :  { %v2273_v20 = vsub.s32 %v2270_v25, %v6176_v57  ;;  %p2486_p4 = pnand %p2485_p3, %p2479_p0 }
 0x269   :  { %v2226_v60 = vadd.f32 %v2217_v58, %v2194_v16  ;;  %v2237_v61 = vadd.f32 %v2236_v18, %v2233_v45 }
 0x26b   :  { %v2234_v32 = vmul.f32 %v2317_v52, %v2226_v60  ;;  %v2238_v10 = vrot.slane %v2237_v61, 4 }
 0x26d   :  { %v2246_v43 = vadd.f32 %v2245_v22, %v2234_v32  ;;  %v2239_v21 = vadd.f32 %v2238_v10, %v2237_v61 }
 0x26f   :  { %v2247_v29 = vrot.slane %v2246_v43, 4  ;;  %v2240_v34 = vrot.slane %v2239_v21, 2 }
 0x271   :  { %v2248_v27 = vadd.f32 %v2247_v29, %v2246_v43  ;;  %v2241_v39 = vadd.f32 %v2240_v34, %v2239_v21 }
 0x273   :  { %v2249_v48 = vrot.slane %v2248_v27, 2  ;;  %v2242_v7 = vrot.slane %v2241_v39, 1 }
 0x275   :  { %v2250_v0 = vadd.f32 %v2249_v48, %v2248_v27  ;;  %v2243_v26 = vadd.f32 %v2242_v7, %v2241_v39 }
 0x277   :  { %v2251_v56 = vrot.slane %v2250_v0, 1  ;;  %v2450_v33 = vmul.f32 -1.442695, %v2243_v26 }
 0x279   :  { %v2252_v44 = vadd.f32 %v2251_v56, %v2250_v0  ;;  %2470 = vpow2.f32 %v2450_v33 }
 0x27b   :  { %v2451_v46 = vmul.f32 -1.442695, %v2252_v44 }
 0x27d   :  { %2472 = vpow2.f32 %v2451_v46 }
 0x283   :  { %v2471_v63 = vpop.eup %2470 }
 0x284   :  { %v2259_v14 = vadd.f32 1.0, %v2471_v63 }
 0x286   :  { %2474 = vrcp.f32 %v2259_v14 }
 0x287   :  { %v2473_v3 = vpop.eup %2472 }
 0x288   :  { %v2260_v40 = vadd.f32 1.0, %v2473_v3 }
 0x28a   :  { %2476 = vrcp.f32 %v2260_v40 }
 0x290   :  { %v2475_v2 = vpop.eup %2474 }
 0x294   :  { %v2477_v36 = vpop.eup %2476 }
 0x295   :  { %v2267_v17 = vcombine.low %v2475_v2, %v2477_v36 }
 0x297   :  { %v2274_v5 = vrot.slane %v2267_v17, %v2273_v20 }
 0x299   :  { %v2281_v59 = vrot.slane %v2274_v5, %v2273_v20 }
 0x29b   :  { %2287 = vst.msk [vmem:[#allocation2] sm:$0x3] %vm2285_vm1, %v2281_v59 }
 0x29c   :  { %2489 = shalt.err (!%p2486_p4)
}
 0x29d   :  { %s2490_s8 = scalar_lea.hbm %s5298_s3, 32 }
 0x29e   :  { %p2491_p5 = scmp.ne.s32.totalorder %s5298_s3, %s2490_s8  ;;  %p2494_p6 = scmp.lt.u32.totalorder %s2490_s8, %s5298_s3 }
 0x2a0   :  { %p2496_p7 = pnand %p2494_p6, %p2491_p5 }
 0x2a2   :  { %2499 = shalt.err (!%p2496_p7)
}
 0x2a3   :  { %2297 = dma.vmem_to_hbm [thread:$0]  %s2295_s4, 32, %s5298_s3, [#allocation3]  }
 0x2a4   :  { %2500 = dma.done.wait [#allocation3], 32  }
 0x2a5   :  { %2501 = vsyncadd [#allocation3], 4294967264 }
 0x2a6   :  { %2301 = vsyncpa [#allocation3], 1 }

</bundles_post_ra>
